<compile_context>
chip_gen: v7x
topology: tpu7x:2x2x1
jax: 0.10.0
libtpu: 0.0.40
codegen_flags: <defaults>
</compile_context>

<pallas_src>
import numpy as np

import jax
import jax.numpy as jnp
from jax.experimental import pallas as pl
from jax.experimental.pallas import tpu as pltpu

# ---- constants from the reference module ------------------------------------
N_SAMPLES = 2 ** 17
TRANSFORM_STEP = 256
N_FRAMES = N_SAMPLES // TRANSFORM_STEP     # 512
WINDOW = 512                               # ConvSTFT.window_size
HOP = WINDOW // 2                          # 256 (ConvSTFT.step_size)
N_COEFFS = WINDOW // 2 + 1                 # 257
TOTAL_COEFFS = 2 * N_COEFFS                # 514
assert N_FRAMES * HOP == N_SAMPLES


def _windowed_irfft_basis_t():
    """Transposed, interleaved irfft(norm='ortho') basis with the periodic Hann window folded in.

    Returns basis_t of shape (WINDOW, TOTAL_COEFFS) with
      basis_t[n, 2k]   =  w_k/sqrt(W) * cos(2*pi*k*n/W) * hann[n]     (real-part row)
      basis_t[n, 2k+1] = -w_k/sqrt(W) * sin(2*pi*k*n/W) * hann[n]     (imag-part row)
    so frames[t, n] = sum_c raw[c, t] * basis_t[n, c] with raw in the net's native
    interleaved channel layout (channel 2k = Re, 2k+1 = Im).  DC/Nyquist imag rows are zero
    (irfft ignores them), matching torch.fft.irfft.
    """
    n = np.arange(WINDOW, dtype=np.float64)[None, :]          # (1, W)
    k = np.arange(N_COEFFS, dtype=np.float64)[:, None]        # (K, 1)
    ang = 2.0 * np.pi * k * n / WINDOW
    w = np.full((N_COEFFS, 1), 2.0)
    w[0, 0] = 1.0                                             # DC bin
    w[-1, 0] = 1.0                                            # Nyquist bin
    scale = w / np.sqrt(WINDOW)                               # norm='ortho'
    hann = 0.5 - 0.5 * np.cos(2.0 * np.pi * np.arange(WINDOW, dtype=np.float64) / WINDOW)
    cos_b = scale * np.cos(ang) * hann[None, :]               # (K, W)
    sin_b = -scale * np.sin(ang) * hann[None, :]              # (K, W)
    inter = np.zeros((TOTAL_COEFFS, WINDOW), dtype=np.float64)
    inter[0::2] = cos_b                                       # real-part rows
    inter[1::2] = sin_b                                       # imag-part rows
    return np.ascontiguousarray(inter.T).astype(np.float32), hann.astype(np.float32)


_BASIS_T_NP, _HANN_NP = _windowed_irfft_basis_t()             # (W, 2K), (W,)


def conv_stft_kernel(c_ref, basis_t_ref, o_ref):
    """Raw (nb, 2K, T) f32 net output -> (nb, T, HOP) overlap-added, truncated audio segments."""
    # Grid-invariant basis (bf16), loaded once per kernel invocation; static ref slices are free.
    bh_t = basis_t_ref[:HOP, :]                               # (HOP, 2K): output samples 0..HOP-1
    bt_t = basis_t_ref[HOP:, :]                               # (HOP, 2K): output samples HOP..W-1
    lane_t = jax.lax.broadcasted_iota(jnp.int32, (HOP, N_FRAMES), 1)   # frame index along lanes

    for i in range(c_ref.shape[0]):                           # static unroll over packed batches
        # Raw interleaved layout straight from HBM; f32 -> bf16 cast on the VPU.
        cb = c_ref[i].astype(jnp.bfloat16)                    # (2K, T)

        # irfft + window as two plain MXU matmuls (f32 accumulation), contraction over 2K=514.
        head_t = jnp.dot(bh_t, cb, preferred_element_type=jnp.float32)   # (HOP, T) = frames[t, :HOP]^T
        tail_t = jnp.dot(bt_t, cb, preferred_element_type=jnp.float32)   # (HOP, T) = frames[t, HOP:]^T

        # 50%-overlap add + truncation to n_samples, in the transposed (HOP, T) domain:
        #   out[t*HOP + j] = frames[t, j] + frames[t-1, HOP + j]
        # Lane roll by 1 frame (XLU) + zero out frame 0's (nonexistent) predecessor.
        tail_prev_t = jnp.where(lane_t == 0, 0.0, pltpu.roll(tail_t, shift=1, axis=1))

        # Single aligned f32 (HOP, T) -> (T, HOP) transpose so the output is written lane-dense
        # in (frame, hop) order; wrapper reshape to (B, n_samples) is then free.
        o_ref[i] = jnp.transpose(head_t + tail_prev_t).astype(o_ref.dtype)


@jax.jit
def conv_stft_synthesize(coeffs):
    """ConvSTFT synthesis: net output (B, 2*n_coeffs, n_frames) f32 -> (B, n_samples) f32."""
    B = coeffs.shape[0]
    # Pack 2 batch elements per grid step when B is large enough to amortize per-step overhead,
    # while keeping >=2 'parallel' steps so both v7x TensorCores stay fed.
    blk_b = 2 if (B >= 4 and B % 2 == 0) else 1
    grid = (B // blk_b,)

    basis_t = jnp.asarray(_BASIS_T_NP, jnp.bfloat16)          # (W, 2K), grid-invariant

    flops = int(2 * B * WINDOW * TOTAL_COEFFS * N_FRAMES)     # irfft-as-matmul FLOPs
    bytes_accessed = int(
        B * (TOTAL_COEFFS * N_FRAMES * 4 + N_FRAMES * HOP * 4)
        + WINDOW * TOTAL_COEFFS * 2
    )

    seg = pl.pallas_call(
        conv_stft_kernel,
        out_shape=jax.ShapeDtypeStruct((B, N_FRAMES, HOP), jnp.float32),
        grid_spec=pltpu.PrefetchScalarGridSpec(
            num_scalar_prefetch=0,
            grid=grid,
            in_specs=[
                # Raw net output, native layout: no wrapper-side transpose/cast passes.
                pl.BlockSpec((blk_b, TOTAL_COEFFS, N_FRAMES), lambda b: (b, 0, 0)),
                # Grid-invariant basis: constant index_map, fetched once.
                pl.BlockSpec((WINDOW, TOTAL_COEFFS), lambda b: (0, 0)),
            ],
            out_specs=pl.BlockSpec((blk_b, N_FRAMES, HOP), lambda b: (b, 0, 0)),
        ),
        compiler_params=pltpu.CompilerParams(
            dimension_semantics=("parallel",),
            vmem_limit_bytes=32 * 1024 * 1024,   # actual footprint ~5-10 MB/step, fits v7x too
        ),
        cost_estimate=pl.CostEstimate(
            flops=flops, transcendentals=0, bytes_accessed=bytes_accessed),
    )(coeffs, basis_t)

    return seg.reshape(B, N_SAMPLES)                          # contiguous, free reshape


def _reference(coeffs):
    """Pure-JAX reference: irfft(norm='ortho') + Hann-windowed overlap-add + truncate."""
    B = coeffs.shape[0]
    c4 = coeffs.reshape(B, N_COEFFS, 2, N_FRAMES)
    spec = jnp.transpose(c4[:, :, 0, :] + 1j * c4[:, :, 1, :], (0, 2, 1))   # (B, T, K)
    frames = jnp.fft.irfft(spec, n=WINDOW, axis=-1, norm="ortho")           # (B, T, W)
    wf = frames * jnp.asarray(_HANN_NP)[None, None, :]
    full_len = (N_FRAMES - 1) * HOP + WINDOW

    def ola_one(w):
        def body(t, acc):
            cur = jax.lax.dynamic_slice(acc, (t * HOP,), (WINDOW,))
            return jax.lax.dynamic_update_slice(acc, cur + w[t], (t * HOP,))
        return jax.lax.fori_loop(0, N_FRAMES, body, jnp.zeros((full_len,), jnp.float32))

    return jax.vmap(ola_one)(wf)[:, :N_SAMPLES]


if __name__ == "__main__":
    key = jax.random.PRNGKey(0)
    B = 2
    # Stand-in for the (unspecified) ConvUpsample net output: (B, 2*n_coeffs, n_frames).
    coeffs = jax.random.normal(key, (B, TOTAL_COEFFS, N_FRAMES), jnp.float32)

    out = jax.block_until_ready(conv_stft_synthesize(coeffs))
    assert out.shape == (B, N_SAMPLES), out.shape
    assert bool(jnp.all(jnp.isfinite(out)))

    ref = jax.block_until_ready(jax.jit(_reference)(coeffs))
    rel = float(jnp.linalg.norm(out - ref) / jnp.linalg.norm(ref))
    assert rel < 2e-2, f"relative L2 error too high: {rel}"

    print("KERNEL_OK")
</pallas_src>

<mosaic_0001>
module attributes {stable_mosaic.version = 11 : i64} {
  func.func @conv_stft_kernel(%arg0: i32, %arg1: memref<1x514x512xf32, #tpu.memory_space<vmem>>, %arg2: memref<512x514xbf16, #tpu.memory_space<vmem>>, %arg3: memref<1x512x256xf32, #tpu.memory_space<vmem>>) attributes {dimension_semantics = [#tpu.dimension_semantics<parallel>], iteration_bounds = array<i64: 2>, scalar_prefetch = 0 : i64, scratch_operands = 0 : i64, tpu.core_type = #tpu.core_type<tc>, window_params = [{transform_indices = @transform_0, window_bounds = array<i64: 1, 514, 512>}, {pipeline_mode = #tpu.pipeline_mode<synchronous>, transform_indices = @transform_1, window_bounds = array<i64: 512, 514>}, {transform_indices = @transform_2, window_bounds = array<i64: 1, 512, 256>}]} {
    %c0 = arith.constant 0 : index
    %c0_0 = arith.constant 0 : index
    %0 = vector.load %arg2[%c0, %c0_0] : memref<512x514xbf16, #tpu.memory_space<vmem>>, vector<256x514xbf16>
    %c256 = arith.constant 256 : index
    %c0_1 = arith.constant 0 : index
    %1 = vector.load %arg2[%c256, %c0_1] : memref<512x514xbf16, #tpu.memory_space<vmem>>, vector<256x514xbf16>
    %2 = tpu.iota {dimensions = array<i32: 1>} : vector<256x512xi32>
    %c0_2 = arith.constant 0 : index
    %c0_3 = arith.constant 0 : index
    %c0_4 = arith.constant 0 : index
    %3 = vector.load %arg1[%c0_2, %c0_3, %c0_4] : memref<1x514x512xf32, #tpu.memory_space<vmem>>, vector<1x514x512xf32>
    %4 = vector.shape_cast %3 : vector<1x514x512xf32> to vector<514x512xf32>
    %5 = arith.truncf %4 : vector<514x512xf32> to vector<514x512xbf16>
    %cst = arith.constant dense<0.000000e+00> : vector<256x512xf32>
    %6 = tpu.matmul %0, %5, %cst {dimension_numbers = #tpu.dot_dimension_numbers<[1], [0], [0], [1], [0, 0, 1, 1], [], []>} : vector<256x514xbf16>, vector<514x512xbf16>, vector<256x512xf32> -> vector<256x512xf32>
    %cst_5 = arith.constant dense<0.000000e+00> : vector<256x512xf32>
    %7 = tpu.matmul %1, %5, %cst_5 {dimension_numbers = #tpu.dot_dimension_numbers<[1], [0], [0], [1], [0, 0, 1, 1], [], []>} : vector<256x514xbf16>, vector<514x512xbf16>, vector<256x512xf32> -> vector<256x512xf32>
    %c0_i32 = arith.constant 0 : i32
    %8 = vector.broadcast %c0_i32 : i32 to vector<256x512xi32>
    %9 = arith.cmpi eq, %2, %8 : vector<256x512xi32>
    %c1_i32 = arith.constant 1 : i32
    %10 = tpu.dynamic_rotate %7 by %c1_i32 dim 1 : vector<256x512xf32>, i32 -> vector<256x512xf32>
    %cst_6 = arith.constant 0.000000e+00 : f32
    %11 = vector.broadcast %cst_6 : f32 to vector<256x512xf32>
    %12 = arith.select %9, %11, %10 : vector<256x512xi1>, vector<256x512xf32>
    %13 = arith.addf %6, %12 : vector<256x512xf32>
    %14 = tpu.transpose %13, [1, 0] : vector<256x512xf32> -> vector<512x256xf32>
    %c0_7 = arith.constant 0 : index
    %c0_8 = arith.constant 0 : index
    %c0_9 = arith.constant 0 : index
    %15 = vector.load %arg3[%c0_7, %c0_8, %c0_9] : memref<1x512x256xf32, #tpu.memory_space<vmem>>, vector<1x512x256xf32>
    %16 = vector.shape_cast %15 : vector<1x512x256xf32> to vector<512x256xf32>
    %17 = vector.shape_cast %14 : vector<512x256xf32> to vector<1x512x256xf32>
    tpu.vector_store %arg3[%c0_7, %c0_8, %c0_9], %17 {strides = array<i32>} : memref<1x512x256xf32, #tpu.memory_space<vmem>>, vector<1x512x256xf32>,
    return
  }
  func.func @transform_0(%arg0: i32) -> (i32, i32, i32) {
    %c0_i32 = arith.constant 0 : i32
    %c0_i32_0 = arith.constant 0 : i32
    %c0_i32_1 = arith.constant 0 : i32
    return %arg0, %c0_i32, %c0_i32_0 : i32, i32, i32
  }
  func.func @transform_1(%arg0: i32) -> (i32, i32) {
    %c0_i32 = arith.constant 0 : i32
    %c0_i32_0 = arith.constant 0 : i32
    %c0_i32_1 = arith.constant 0 : i32
    return %c0_i32, %c0_i32_0 : i32, i32
  }
  func.func @transform_2(%arg0: i32) -> (i32, i32, i32) {
    %c0_i32 = arith.constant 0 : i32
    %c0_i32_0 = arith.constant 0 : i32
    %c0_i32_1 = arith.constant 0 : i32
    return %arg0, %c0_i32, %c0_i32_0 : i32, i32, i32
  }
}

</mosaic_0001>

<bundles_post_ra>
// kernel: conv_stft_synthesize.1
= control target key start
LH: loop header
LB: loop body
LE: loop exit
PB: predicated region body
PF: predicated region fallthrough
CT: control target
= control target key end

     0   :  { %s6055_s9 = smov 0   ;;  %s9100_s0 = inlined_call_operand.vmem [shape: f32[2,514,512], index: 0, kind: input, shape index: {}]   ;;  %s9101_s1 = inlined_call_operand.vmem [shape: bf16[512,514], index: 1, kind: input, shape index: {}]   ;;  %s9102_s2 = inlined_call_operand.vmem [shape: f32[2,512,256], index: 2, kind: output, shape index: {}]  }
   0x1 LB: > { %s4916_s10 = sadd.s32 4294967295, %s6036_s9   ;;  %p4920_p0 = scmp.ge.s32.totalorder %s6036_s9, 1  ;;  %s6036_s9 = sphi %s6055_s9, %s12_s9  }
   0x2   : > { %p112_p1 = scmp.lt.s32.totalorder %s6036_s9, 3 }
   0x4   : > { %p113_p2 = pnand %p4920_p0, %p112_p1 }
   0x6   : > { %116 = sbr.rel (%p113_p2) target bundleno = 1324 (0x52c), region = 28 }
   0xd   : > { %p134_p3 = scmp.lt.s32.totalorder %s4916_s10, 1  ;;  %v5808_v0 = vld [vmem:[%s9101_s1 + $0x284] ss:$20 sps:$4 sm:$0xff]   ;;  %vm1183_vm0 = vcmask 1040384   ;;  %vm1134_vm1 = vcmask 15360   ;;  %s6039_s14 = smov 1  }
   0xe   : > { %1228 = vmatprep.mubr.bf16.mxu0 %v5808_v0  ;;  %1807 = vmatprep.mubr.bf16.mxu1 %v5808_v0 }
   0xf   : > { %s9598_s10 = smov (!%p134_p3, %s4916_s10), 1 }
  0x10   : > { %s5795_s13 = smul.u32 2080, %s9598_s10  ;;  %s5154_s29 = sshll.u32 %s9598_s10, 10 }
  0x11   : > { %s8903_s4 = scalar_lea.vmem %s9102_s2, %s5154_s29 }
  0x12   : > { %s6072_s16 = scalar_lea.vmem %s9100_s0, %s5795_s13 }
  0x13   : > { %v343_v1 = vld [vmem:[%s6072_s16 + $0x8] sm:$0xff]  ;;  %v345_v3 = vld [vmem:[%s6072_s16 + $0x18] sm:$0xff]  ;;  %v342_v6 = vld [vmem:[%s6072_s16] sm:$0xff] }
  0x14   : > { %v347_v2 = vld [vmem:[%s6072_s16 + $0x28] sm:$0xff]  ;;  %v349_v5 = vld [vmem:[%s6072_s16 + $0x38] sm:$0xff]  ;;  %v346_v7 = vld [vmem:[%s6072_s16 + $0x20] sm:$0xff] }
  0x15   : > { %v6077_v4 = vpack.c.bf16 %v347_v2, %v343_v1  ;;  %v6082_v8 = vpack.c.bf16 %v349_v5, %v345_v3  ;;  %v6084_v9 = vpack.c.bf16 %v346_v7, %v342_v6  ;;  %v344_v10 = vld [vmem:[%s6072_s16 + $0x10] sm:$0xff]  ;;  %v351_v12 = vld [vmem:[%s6072_s16 + $0x48] sm:$0xff]  ;;  %v353_v15 = vld [vmem:[%s6072_s16 + $0x58] sm:$0xff] }
  0x16   : > { %v348_v11 = vld [vmem:[%s6072_s16 + $0x30] sm:$0xff]  ;;  %v355_v14 = vld [vmem:[%s6072_s16 + $0x68] sm:$0xff]  ;;  %v357_v16 = vld [vmem:[%s6072_s16 + $0x78] sm:$0xff] }
  0x17   : > { %1196 = vmatprep.subr.bf16.mxu0 %v6077_v4  ;;  %v6090_v13 = vpack.c.bf16 %v348_v11, %v344_v10  ;;  %1775 = vmatprep.subr.bf16.mxu1 %v6082_v8  ;;  %v6097_v17 = vpack.c.bf16 %v355_v14, %v351_v12  ;;  %v6099_v18 = vpack.c.bf16 %v357_v16, %v353_v15  ;;  %v350_v19 = vld [vmem:[%s6072_s16 + $0x40] sm:$0xff]  ;;  %v352_v21 = vld [vmem:[%s6072_s16 + $0x50] sm:$0xff]  ;;  %v359_v24 = vld [vmem:[%s6072_s16 + $0x88] sm:$0xff] }
  0x18   : > { %1197 = vmatpush1.bf16.msra.mxu0 %v6084_v9  ;;  %v354_v20 = vld [vmem:[%s6072_s16 + $0x60] sm:$0xff]  ;;  %v356_v23 = vld [vmem:[%s6072_s16 + $0x70] sm:$0xff]  ;;  %v363_v25 = vld [vmem:[%s6072_s16 + $0xa8] sm:$0xff] }
  0x19   : > { %1776 = vmatpush1.bf16.msra.mxu1 %v6090_v13  ;;  %v6105_v22 = vpack.c.bf16 %v354_v20, %v350_v19  ;;  %1198 = vmatprep.subr.bf16.mxu0 %v6097_v17  ;;  %v6112_v26 = vpack.c.bf16 %v356_v23, %v352_v21  ;;  %v6114_v27 = vpack.c.bf16 %v363_v25, %v359_v24  ;;  %v361_v28 = vld [vmem:[%s6072_s16 + $0x98] sm:$0xff]  ;;  %v358_v30 = vld [vmem:[%s6072_s16 + $0x80] sm:$0xff]  ;;  %v360_v33 = vld [vmem:[%s6072_s16 + $0x90] sm:$0xff] }
  0x1a   : > { %1777 = vmatprep.subr.bf16.mxu1 %v6099_v18  ;;  %v365_v29 = vld [vmem:[%s6072_s16 + $0xb8] sm:$0xff]  ;;  %v362_v32 = vld [vmem:[%s6072_s16 + $0xa0] sm:$0xff]  ;;  %v364_v34 = vld [vmem:[%s6072_s16 + $0xb0] sm:$0xff] }
  0x1b   : > { %v6119_v31 = vpack.c.bf16 %v365_v29, %v361_v28  ;;  %v6125_v35 = vpack.c.bf16 %v362_v32, %v358_v30  ;;  %v367_v36 = vld [vmem:[%s6072_s16 + $0xc8] sm:$0xff]  ;;  %v369_v38 = vld [vmem:[%s6072_s16 + $0xd8] sm:$0xff]  ;;  %v6132_v39 = vpack.c.bf16 %v364_v34, %v360_v33  ;;  %v366_v42 = vld [vmem:[%s6072_s16 + $0xc0] sm:$0xff] }
  0x1c   : > { %1199 = vmatpush1.bf16.msra.mxu0 %v6105_v22  ;;  %v371_v37 = vld [vmem:[%s6072_s16 + $0xe8] sm:$0xff]  ;;  %v373_v41 = vld [vmem:[%s6072_s16 + $0xf8] sm:$0xff]  ;;  %v370_v43 = vld [vmem:[%s6072_s16 + $0xe0] sm:$0xff] }
  0x1d   : > { %1778 = vmatpush1.bf16.msra.mxu1 %v6112_v26  ;;  %1200 = vmatprep.subr.bf16.mxu0 %v6114_v27  ;;  %v6134_v40 = vpack.c.bf16 %v371_v37, %v367_v36  ;;  %v6140_v44 = vpack.c.bf16 %v373_v41, %v369_v38  ;;  %v368_v45 = vld [vmem:[%s6072_s16 + $0xd0] sm:$0xff]  ;;  %v375_v47 = vld [vmem:[%s6072_s16 + $0x108] sm:$0xff]  ;;  %v377_v49 = vld [vmem:[%s6072_s16 + $0x118] sm:$0xff]  ;;  %v6149_v51 = vpack.c.bf16 %v370_v43, %v366_v42 }
  0x1e   : > { %1779 = vmatprep.subr.bf16.mxu1 %v6119_v31  ;;  %v372_v46 = vld [vmem:[%s6072_s16 + $0xf0] sm:$0xff]  ;;  %v379_v48 = vld [vmem:[%s6072_s16 + $0x128] sm:$0xff]  ;;  %v381_v50 = vld [vmem:[%s6072_s16 + $0x138] sm:$0xff] }
  0x1f   : > { %v6153_v52 = vpack.c.bf16 %v372_v46, %v368_v45  ;;  %v6155_v53 = vpack.c.bf16 %v379_v48, %v375_v47  ;;  %v374_v54 = vld [vmem:[%s6072_s16 + $0x100] sm:$0xff]  ;;  %v376_v56 = vld [vmem:[%s6072_s16 + $0x110] sm:$0xff]  ;;  %v6161_v57 = vpack.c.bf16 %v381_v50, %v377_v49  ;;  %v383_v59 = vld [vmem:[%s6072_s16 + $0x148] sm:$0xff] }
  0x20   : > { %1201 = vmatpush1.bf16.msra.mxu0 %v6125_v35  ;;  %v378_v55 = vld [vmem:[%s6072_s16 + $0x120] sm:$0xff]  ;;  %v380_v58 = vld [vmem:[%s6072_s16 + $0x130] sm:$0xff]  ;;  %v387_v60 = vld [vmem:[%s6072_s16 + $0x168] sm:$0xff] }
  0x21   : > { %1780 = vmatpush1.bf16.msra.mxu1 %v6132_v39  ;;  %1202 = vmatprep.subr.bf16.mxu0 %v6134_v40  ;;  %v385_v61 = vld [vmem:[%s6072_s16 + $0x158] sm:$0xff]  ;;  %v6169_v63 = vpack.c.bf16 %v378_v55, %v374_v54  ;;  %v6173_v0 = vpack.c.bf16 %v380_v58, %v376_v56  ;;  %v6175_v1 = vpack.c.bf16 %v387_v60, %v383_v59  ;;  %v382_v2 = vld [vmem:[%s6072_s16 + $0x140] sm:$0xff]  ;;  %v384_v5 = vld [vmem:[%s6072_s16 + $0x150] sm:$0xff] }
  0x22   : > { %1781 = vmatprep.subr.bf16.mxu1 %v6140_v44  ;;  %v389_v62 = vld [vmem:[%s6072_s16 + $0x178] sm:$0xff]  ;;  %v386_v3 = vld [vmem:[%s6072_s16 + $0x160] sm:$0xff]  ;;  %v388_v7 = vld [vmem:[%s6072_s16 + $0x170] sm:$0xff] }
  0x23   : > { %v6181_v6 = vpack.c.bf16 %v389_v62, %v385_v61  ;;  %v391_v10 = vld [vmem:[%s6072_s16 + $0x188] sm:$0xff]  ;;  %v393_v12 = vld [vmem:[%s6072_s16 + $0x198] sm:$0xff]  ;;  %v6189_v15 = vpack.c.bf16 %v386_v3, %v382_v2  ;;  %v6193_v16 = vpack.c.bf16 %v388_v7, %v384_v5  ;;  %v390_v20 = vld [vmem:[%s6072_s16 + $0x180] sm:$0xff] }
  0x24   : > { %1203 = vmatpush1.bf16.msra.mxu0 %v6149_v51  ;;  %v395_v11 = vld [vmem:[%s6072_s16 + $0x1a8] sm:$0xff]  ;;  %v397_v14 = vld [vmem:[%s6072_s16 + $0x1b8] sm:$0xff]  ;;  %v394_v21 = vld [vmem:[%s6072_s16 + $0x1a0] sm:$0xff] }
  0x25   : > { %1782 = vmatpush1.bf16.msra.mxu1 %v6153_v52  ;;  %1204 = vmatprep.subr.bf16.mxu0 %v6155_v53  ;;  %v6195_v19 = vpack.c.bf16 %v395_v11, %v391_v10  ;;  %v392_v23 = vld [vmem:[%s6072_s16 + $0x190] sm:$0xff]  ;;  %v6201_v24 = vpack.c.bf16 %v397_v14, %v393_v12  ;;  %v399_v28 = vld [vmem:[%s6072_s16 + $0x1c8] sm:$0xff]  ;;  %v401_v30 = vld [vmem:[%s6072_s16 + $0x1d8] sm:$0xff]  ;;  %v6209_v33 = vpack.c.bf16 %v394_v21, %v390_v20 }
  0x26   : > { %1783 = vmatprep.subr.bf16.mxu1 %v6161_v57  ;;  %v396_v25 = vld [vmem:[%s6072_s16 + $0x1b0] sm:$0xff]  ;;  %v403_v29 = vld [vmem:[%s6072_s16 + $0x1e8] sm:$0xff]  ;;  %v405_v32 = vld [vmem:[%s6072_s16 + $0x1f8] sm:$0xff] }
  0x27   : > { %v6213_v34 = vpack.c.bf16 %v396_v25, %v392_v23  ;;  %v6215_v36 = vpack.c.bf16 %v403_v29, %v399_v28  ;;  %v398_v37 = vld [vmem:[%s6072_s16 + $0x1c0] sm:$0xff]  ;;  %v400_v41 = vld [vmem:[%s6072_s16 + $0x1d0] sm:$0xff]  ;;  %v6221_v42 = vpack.c.bf16 %v405_v32, %v401_v30  ;;  %v407_v45 = vld [vmem:[%s6072_s16 + $0x208] sm:$0xff] }
  0x28   : > { %1205 = vmatpush1.bf16.msra.mxu0 %v6169_v63  ;;  %v402_v38 = vld [vmem:[%s6072_s16 + $0x1e0] sm:$0xff]  ;;  %v404_v43 = vld [vmem:[%s6072_s16 + $0x1f0] sm:$0xff]  ;;  %v411_v46 = vld [vmem:[%s6072_s16 + $0x228] sm:$0xff] }
  0x29   : > { %1784 = vmatpush1.bf16.msra.mxu1 %v6173_v0  ;;  %1206 = vmatprep.subr.bf16.mxu0 %v6175_v1  ;;  %v409_v47 = vld [vmem:[%s6072_s16 + $0x218] sm:$0xff]  ;;  %v6229_v49 = vpack.c.bf16 %v402_v38, %v398_v37  ;;  %v6233_v50 = vpack.c.bf16 %v404_v43, %v400_v41  ;;  %v6235_v54 = vpack.c.bf16 %v411_v46, %v407_v45  ;;  %v406_v55 = vld [vmem:[%s6072_s16 + $0x200] sm:$0xff]  ;;  %v408_v58 = vld [vmem:[%s6072_s16 + $0x210] sm:$0xff] }
  0x2a   : > { %1785 = vmatprep.subr.bf16.mxu1 %v6181_v6  ;;  %v413_v48 = vld [vmem:[%s6072_s16 + $0x238] sm:$0xff]  ;;  %v410_v56 = vld [vmem:[%s6072_s16 + $0x220] sm:$0xff]  ;;  %v412_v60 = vld [vmem:[%s6072_s16 + $0x230] sm:$0xff] }
  0x2b   : > { %v6241_v59 = vpack.c.bf16 %v413_v48, %v409_v47  ;;  %v415_v61 = vld [vmem:[%s6072_s16 + $0x248] sm:$0xff]  ;;  %v417_v2 = vld [vmem:[%s6072_s16 + $0x258] sm:$0xff]  ;;  %v6249_v5 = vpack.c.bf16 %v410_v56, %v406_v55  ;;  %v6253_v7 = vpack.c.bf16 %v412_v60, %v408_v58  ;;  %v414_v11 = vld [vmem:[%s6072_s16 + $0x240] sm:$0xff] }
  0x2c   : > { %1207 = vmatpush1.bf16.msra.mxu0 %v6189_v15  ;;  %v419_v62 = vld [vmem:[%s6072_s16 + $0x268] sm:$0xff]  ;;  %v421_v3 = vld [vmem:[%s6072_s16 + $0x278] sm:$0xff]  ;;  %v418_v12 = vld [vmem:[%s6072_s16 + $0x260] sm:$0xff] }
  0x2d   : > { %1786 = vmatpush1.bf16.msra.mxu1 %v6193_v16  ;;  %1208 = vmatprep.subr.bf16.mxu0 %v6195_v19  ;;  %v6255_v10 = vpack.c.bf16 %v419_v62, %v415_v61  ;;  %v416_v14 = vld [vmem:[%s6072_s16 + $0x250] sm:$0xff]  ;;  %v6261_v20 = vpack.c.bf16 %v421_v3, %v417_v2  ;;  %v423_v23 = vld [vmem:[%s6072_s16 + $0x288] sm:$0xff]  ;;  %v425_v28 = vld [vmem:[%s6072_s16 + $0x298] sm:$0xff]  ;;  %v6269_v30 = vpack.c.bf16 %v418_v12, %v414_v11 }
  0x2e   : > { %1787 = vmatprep.subr.bf16.mxu1 %v6201_v24  ;;  %v420_v21 = vld [vmem:[%s6072_s16 + $0x270] sm:$0xff]  ;;  %v427_v25 = vld [vmem:[%s6072_s16 + $0x2a8] sm:$0xff]  ;;  %v429_v29 = vld [vmem:[%s6072_s16 + $0x2b8] sm:$0xff] }
  0x2f   : > { %9210 = vst [vmem:[#allocation2_spill] sm:$0xff] %v6261_v20  ;;  %9211 = vst [vmem:[#allocation3_spill] sm:$0xff] %v6269_v30  ;;  %v6273_v32 = vpack.c.bf16 %v420_v21, %v416_v14  ;;  %v6275_v37 = vpack.c.bf16 %v427_v25, %v423_v23  ;;  %v422_v38 = vld [vmem:[%s6072_s16 + $0x280] sm:$0xff]  ;;  %v424_v43 = vld [vmem:[%s6072_s16 + $0x290] sm:$0xff]  ;;  %v6281_v45 = vpack.c.bf16 %v429_v29, %v425_v28 }
  0x30   : > { %1209 = vmatpush1.bf16.msra.mxu0 %v6209_v33  ;;  %v426_v41 = vld [vmem:[%s6072_s16 + $0x2a0] sm:$0xff]  ;;  %v428_v46 = vld [vmem:[%s6072_s16 + $0x2b0] sm:$0xff]  ;;  %v431_v47 = vld [vmem:[%s6072_s16 + $0x2c8] sm:$0xff] }
  0x31   : > { %1788 = vmatpush1.bf16.msra.mxu1 %v6213_v34  ;;  %1210 = vmatprep.subr.bf16.mxu0 %v6215_v36  ;;  %9212 = vst [vmem:[#allocation4_spill] sm:$0xff] %v6273_v32  ;;  %9213 = vst [vmem:[#allocation5_spill] sm:$0xff] %v6275_v37  ;;  %v435_v48 = vld [vmem:[%s6072_s16 + $0x2e8] sm:$0xff]  ;;  %v433_v55 = vld [vmem:[%s6072_s16 + $0x2d8] sm:$0xff]  ;;  %v6289_v58 = vpack.c.bf16 %v426_v41, %v422_v38  ;;  %v6293_v60 = vpack.c.bf16 %v428_v46, %v424_v43 }
  0x32   : > { %1789 = vmatprep.subr.bf16.mxu1 %v6221_v42  ;;  %9214 = vst [vmem:[#allocation6_spill] sm:$0xff] %v6281_v45  ;;  %v437_v56 = vld [vmem:[%s6072_s16 + $0x2f8] sm:$0xff]  ;;  %v6295_v61 = vpack.c.bf16 %v435_v48, %v431_v47  ;;  %v430_v62 = vld [vmem:[%s6072_s16 + $0x2c0] sm:$0xff]  ;;  %v432_v3 = vld [vmem:[%s6072_s16 + $0x2d0] sm:$0xff] }
  0x33   : > { %9215 = vst [vmem:[#allocation7_spill] sm:$0xff] %v6289_v58  ;;  %9216 = vst [vmem:[#allocation8_spill] sm:$0xff] %v6293_v60  ;;  %v434_v2 = vld [vmem:[%s6072_s16 + $0x2e0] sm:$0xff]  ;;  %v6301_v11 = vpack.c.bf16 %v437_v56, %v433_v55  ;;  %v436_v12 = vld [vmem:[%s6072_s16 + $0x2f0] sm:$0xff] }
  0x34   : > { %1211 = vmatpush1.bf16.msra.mxu0 %v6229_v49  ;;  %9217 = vst [vmem:[#allocation9_spill] sm:$0xff] %v6295_v61  ;;  %v439_v14 = vld [vmem:[%s6072_s16 + $0x308] sm:$0xff]  ;;  %v441_v23 = vld [vmem:[%s6072_s16 + $0x318] sm:$0xff]  ;;  %v6309_v28 = vpack.c.bf16 %v434_v2, %v430_v62  ;;  %v6313_v29 = vpack.c.bf16 %v436_v12, %v432_v3  ;;  %v438_v41 = vld [vmem:[%s6072_s16 + $0x300] sm:$0xff] }
  0x35   : > { %1790 = vmatpush1.bf16.msra.mxu1 %v6233_v50  ;;  %1212 = vmatprep.subr.bf16.mxu0 %v6235_v54  ;;  %9218 = vst [vmem:[#allocation10_spill] sm:$0xff] %v6301_v11  ;;  %v443_v21 = vld [vmem:[%s6072_s16 + $0x328] sm:$0xff]  ;;  %v445_v25 = vld [vmem:[%s6072_s16 + $0x338] sm:$0xff]  ;;  %v442_v43 = vld [vmem:[%s6072_s16 + $0x320] sm:$0xff] }
  0x36   : > { %1791 = vmatprep.subr.bf16.mxu1 %v6241_v59  ;;  %9219 = vst [vmem:[#allocation11_spill] sm:$0xff] %v6309_v28  ;;  %9220 = vst [vmem:[#allocation12_spill] sm:$0xff] %v6313_v29  ;;  %v6315_v38 = vpack.c.bf16 %v443_v21, %v439_v14  ;;  %v440_v46 = vld [vmem:[%s6072_s16 + $0x310] sm:$0xff]  ;;  %v6321_v47 = vpack.c.bf16 %v445_v25, %v441_v23  ;;  %v447_v55 = vld [vmem:[%s6072_s16 + $0x348] sm:$0xff]  ;;  %v6329_v3 = vpack.c.bf16 %v442_v43, %v438_v41 }
  0x37   : > { %v444_v48 = vld [vmem:[%s6072_s16 + $0x330] sm:$0xff]  ;;  %v451_v56 = vld [vmem:[%s6072_s16 + $0x368] sm:$0xff]  ;;  %v449_v62 = vld [vmem:[%s6072_s16 + $0x358] sm:$0xff] }
  0x38   : > { %1213 = vmatpush1.bf16.msra.mxu0 %v6249_v5  ;;  %9221 = vst [vmem:[#allocation13_spill] sm:$0xff] %v6315_v38  ;;  %9222 = vst [vmem:[#allocation14_spill] sm:$0xff] %v6321_v47  ;;  %v453_v2 = vld [vmem:[%s6072_s16 + $0x378] sm:$0xff]  ;;  %v446_v12 = vld [vmem:[%s6072_s16 + $0x340] sm:$0xff]  ;;  %v6334_v14 = vpack.c.bf16 %v444_v48, %v440_v46  ;;  %v6336_v21 = vpack.c.bf16 %v451_v56, %v447_v55 }
  0x39   : > { %1792 = vmatpush1.bf16.msra.mxu1 %v6253_v7  ;;  %1214 = vmatprep.subr.bf16.mxu0 %v6255_v10  ;;  %9223 = vst [vmem:[#allocation15_spill] sm:$0xff] %v6329_v3  ;;  %v450_v23 = vld [vmem:[%s6072_s16 + $0x360] sm:$0xff]  ;;  %v448_v25 = vld [vmem:[%s6072_s16 + $0x350] sm:$0xff]  ;;  %v455_v43 = vld [vmem:[%s6072_s16 + $0x388] sm:$0xff] }
  0x3a   : > { %1793 = vmatprep.subr.bf16.mxu1 %v6261_v20  ;;  %9224 = vst [vmem:[#allocation16_spill] sm:$0xff] %v6334_v14  ;;  %9225 = vst [vmem:[#allocation17_spill] sm:$0xff] %v6336_v21  ;;  %v452_v41 = vld [vmem:[%s6072_s16 + $0x370] sm:$0xff]  ;;  %v6349_v46 = vpack.c.bf16 %v450_v23, %v446_v12  ;;  %v454_v48 = vld [vmem:[%s6072_s16 + $0x380] sm:$0xff] }
  0x3b   : > { %v458_v55 = vld [vmem:[%s6072_s16 + $0x3a0] sm:$0xff]  ;;  %v6355_v56 = vpack.c.bf16 %v452_v41, %v448_v25  ;;  %v467_v23 = vld [vmem:[%s6072_s16 + $0x3e8] sm:$0xff]  ;;  %v592_v20 = vld [vmem:[%s6072_s16 + $0x7d0] sm:$0xff] }
  0x3c   : > { %1215 = vmatpush1.bf16.msra.mxu0 %v6269_v30  ;;  %9227 = vst [vmem:[#allocation19_spill] sm:$0xff] %v6349_v46  ;;  %v462_v25 = vld [vmem:[%s6072_s16 + $0x3c0] sm:$0xff] }
  0x3d   : > { %1794 = vmatpush1.bf16.msra.mxu1 %v6273_v32  ;;  %1216 = vmatprep.subr.bf16.mxu0 %v6275_v37  ;;  %9228 = vst [vmem:[#allocation20_spill] sm:$0xff] %v6355_v56  ;;  %v466_v41 = vld [vmem:[%s6072_s16 + $0x3e0] sm:$0xff]  ;;  %v565_v37 = vld [vmem:[%s6072_s16 + $0x6f8] sm:$0xff] }
  0x3e   : > { %1795 = vmatprep.subr.bf16.mxu1 %v6281_v45  ;;  %v558_v45 = vld [vmem:[%s6072_s16 + $0x6c0] sm:$0xff] }
  0x3f   : > { %v562_v32 = vld [vmem:[%s6072_s16 + $0x6e0] sm:$0xff] }
  0x40   : > { %1217 = vmatpush1.bf16.msra.mxu0 %v6289_v58  ;;  %v557_v58 = vld [vmem:[%s6072_s16 + $0x6b8] sm:$0xff] }
  0x41   : > { %1796 = vmatpush1.bf16.msra.mxu1 %v6293_v60  ;;  %1218 = vmatprep.subr.bf16.mxu0 %v6295_v61  ;;  %v463_v60 = vld [vmem:[%s6072_s16 + $0x3c8] sm:$0xff] }
  0x42   : > { %1797 = vmatprep.subr.bf16.mxu1 %v6301_v11  ;;  %v459_v11 = vld [vmem:[%s6072_s16 + $0x3a8] sm:$0xff] }
  0x44   : > { %1219 = vmatpush1.bf16.msra.mxu0 %v6309_v28  ;;  %v6341_v28 = vpack.c.bf16 %v453_v2, %v449_v62  ;;  %v6357_v62 = vpack.c.bf16 %v459_v11, %v455_v43  ;;  %v456_v2 = vld [vmem:[%s6072_s16 + $0x390] sm:$0xff]  ;;  %v6369_v11 = vpack.c.bf16 %v458_v55, %v454_v48  ;;  %v471_v55 = vld [vmem:[%s6072_s16 + $0x408] sm:$0xff] }
  0x45   : > { %1798 = vmatpush1.bf16.msra.mxu1 %v6313_v29  ;;  %1220 = vmatprep.subr.bf16.mxu0 %v6315_v38  ;;  %v457_v29 = vld [vmem:[%s6072_s16 + $0x398] sm:$0xff]  ;;  %v468_v48 = vld [vmem:[%s6072_s16 + $0x3f0] sm:$0xff] }
  0x46   : > { %1799 = vmatprep.subr.bf16.mxu1 %v6321_v47  ;;  %9226 = vst [vmem:[#allocation18_spill] sm:$0xff] %v6341_v28  ;;  %v461_v38 = vld [vmem:[%s6072_s16 + $0x3b8] sm:$0xff]  ;;  %9229 = vst [vmem:[#allocation21_spill] sm:$0xff] %v6357_v62  ;;  %v460_v47 = vld [vmem:[%s6072_s16 + $0x3b0] sm:$0xff] }
  0x47   : > { %v6363_v12 = vpack.c.bf16 %v461_v38, %v457_v29  ;;  %9231 = vst [vmem:[#allocation23_spill] sm:$0xff] %v6369_v11  ;;  %v6375_v43 = vpack.c.bf16 %v460_v47, %v456_v2  ;;  %v6377_v29 = vpack.c.bf16 %v467_v23, %v463_v60  ;;  %v464_v38 = vld [vmem:[%s6072_s16 + $0x3d0] sm:$0xff]  ;;  %v6389_v60 = vpack.c.bf16 %v466_v41, %v462_v25  ;;  %v470_v2 = vld [vmem:[%s6072_s16 + $0x400] sm:$0xff]  ;;  %v479_v25 = vld [vmem:[%s6072_s16 + $0x448] sm:$0xff] }
  0x48   : > { %1221 = vmatpush1.bf16.msra.mxu0 %v6329_v3  ;;  %v465_v3 = vld [vmem:[%s6072_s16 + $0x3d8] sm:$0xff]  ;;  %v6393_v47 = vpack.c.bf16 %v468_v48, %v464_v38  ;;  %v474_v23 = vld [vmem:[%s6072_s16 + $0x420] sm:$0xff]  ;;  %v472_v38 = vld [vmem:[%s6072_s16 + $0x410] sm:$0xff] }
  0x49   : > { %1800 = vmatpush1.bf16.msra.mxu1 %v6334_v14  ;;  %1222 = vmatprep.subr.bf16.mxu0 %v6336_v21  ;;  %9230 = vst [vmem:[#allocation22_spill] sm:$0xff] %v6363_v12  ;;  %v469_v14 = vld [vmem:[%s6072_s16 + $0x3f8] sm:$0xff]  ;;  %9232 = vst [vmem:[#allocation24_spill] sm:$0xff] %v6375_v43  ;;  %v476_v48 = vld [vmem:[%s6072_s16 + $0x430] sm:$0xff] }
  0x4a   : > { %1801 = vmatprep.subr.bf16.mxu1 %v6341_v28  ;;  %9233 = vst [vmem:[#allocation25_spill] sm:$0xff] %v6377_v29  ;;  %v6381_v28 = vpack.c.bf16 %v469_v14, %v465_v3  ;;  %9235 = vst [vmem:[#allocation27_spill] sm:$0xff] %v6389_v60  ;;  %v5806_v3 = vld [vmem:[%s9101_s1 + $0x280] ss:$20 sps:$4 sm:$0xff]   ;;  %v507_v21 = vld [vmem:[%s6072_s16 + $0x528] sm:$0xff] }
  0x4b   : > { %9236 = vst [vmem:[#allocation28_spill] sm:$0xff] %v6393_v47 }
  0x4c   : > { %1223 = vmatpush1.bf16.msra.mxu0 %v6349_v46  ;;  %9234 = vst [vmem:[#allocation26_spill] sm:$0xff] %v6381_v28  ;;  %v475_v46 = vld [vmem:[%s6072_s16 + $0x428] sm:$0xff] }
  0x4d   : > { %1802 = vmatpush1.bf16.msra.mxu1 %v6355_v56  ;;  %1224 = vmatprep.subr.bf16.mxu0 %v6357_v62  ;;  %v473_v56 = vld [vmem:[%s6072_s16 + $0x418] sm:$0xff]  ;;  %v6398_v14 = vpack.c.bf16 %v475_v46, %v471_v55 }
  0x4e   : > { %1803 = vmatprep.subr.bf16.mxu1 %v6363_v12  ;;  %v477_v62 = vld [vmem:[%s6072_s16 + $0x438] sm:$0xff]  ;;  %v484_v12 = vld [vmem:[%s6072_s16 + $0x470] sm:$0xff] }
  0x4f   : > { %9237 = vst [vmem:[#allocation29_spill] sm:$0xff] %v6398_v14  ;;  %v6404_v41 = vpack.c.bf16 %v477_v62, %v473_v56  ;;  %v481_v46 = vld [vmem:[%s6072_s16 + $0x458] sm:$0xff]  ;;  %v5809_v56 = vld [vmem:[%s9101_s1 + $0x2ac] ss:$20 sps:$4 sm:$0xff]  }
  0x50   : > { %1225 = vmatpush1.bf16.msra.mxu0 %v6369_v11  ;;  %v485_v55 = vld [vmem:[%s6072_s16 + $0x478] sm:$0xff]  ;;  %v478_v62 = vld [vmem:[%s6072_s16 + $0x440] sm:$0xff] }
  0x51   : > { %1804 = vmatpush1.bf16.msra.mxu1 %v6375_v43  ;;  %1226 = vmatprep.subr.bf16.mxu0 %v6377_v29  ;;  %9238 = vst [vmem:[#allocation30_spill] sm:$0xff] %v6404_v41  ;;  %v483_v43 = vld [vmem:[%s6072_s16 + $0x468] sm:$0xff]  ;;  %v6410_v29 = vpack.c.bf16 %v474_v23, %v470_v2  ;;  %v6426_v23 = vpack.c.bf16 %v476_v48, %v472_v38 }
  0x52   : > { %1805 = vmatprep.subr.bf16.mxu1 %v6381_v28  ;;  %v482_v28 = vld [vmem:[%s6072_s16 + $0x460] sm:$0xff]  ;;  %v6421_v11 = vpack.c.bf16 %v483_v43, %v479_v25  ;;  %v491_v2 = vld [vmem:[%s6072_s16 + $0x4a8] sm:$0xff]  ;;  %v489_v25 = vld [vmem:[%s6072_s16 + $0x498] sm:$0xff] }
  0x53   : > { %9239 = vst [vmem:[#allocation31_spill] sm:$0xff] %v6410_v29  ;;  %9241 = vst [vmem:[#allocation33_spill] sm:$0xff] %v6426_v23  ;;  %v6433_v43 = vpack.c.bf16 %v482_v28, %v478_v62  ;;  %v5811_v38 = vld [vmem:[%s9101_s1 + $0x2a8] ss:$20 sps:$4 sm:$0xff]  }
  0x54   : > { %1227 = vmatpush1.bf16.msra.mxu0 %v6389_v60  ;;  %9240 = vst [vmem:[#allocation32_spill] sm:$0xff] %v6421_v11  ;;  %v487_v60 = vld [vmem:[%s6072_s16 + $0x488] sm:$0xff] }
  0x55   : > { %1806 = vmatpush1.bf16.msra.mxu1 %v6393_v47  ;;  %1389 = vmatprep.subr.bf16.mxu0 %v6398_v14  ;;  %v6428_v14 = vpack.c.bf16 %v485_v55, %v481_v46  ;;  %v480_v47 = vld [vmem:[%s6072_s16 + $0x450] sm:$0xff]  ;;  %9243 = vst [vmem:[#allocation35_spill] sm:$0xff] %v6433_v43  ;;  %v6440_v48 = vpack.c.bf16 %v491_v2, %v487_v60  ;;  %v490_v46 = vld [vmem:[%s6072_s16 + $0x4a0] sm:$0xff]  ;;  %v495_v28 = vld [vmem:[%s6072_s16 + $0x4c8] sm:$0xff] }
  0x56   : > { %1968 = vmatprep.subr.bf16.mxu1 %v6404_v41  ;;  %v493_v41 = vld [vmem:[%s6072_s16 + $0x4b8] sm:$0xff]  ;;  %v6447_v55 = vpack.c.bf16 %v484_v12, %v480_v47  ;;  %v488_v60 = vld [vmem:[%s6072_s16 + $0x490] sm:$0xff] }
  0x57   : > { %1229 = vmatmul.mubr.bf16.vlgmr.msra.gmra.mrb[0].mxu0 %v5806_v3  ;;  %9242 = vst [vmem:[#allocation34_spill] sm:$0xff] %v6428_v14  ;;  %9244 = vst [vmem:[#allocation36_spill] sm:$0xff] %v6440_v48  ;;  %v6451_v62 = vpack.c.bf16 %v493_v41, %v489_v25  ;;  %v492_v2 = vld [vmem:[%s6072_s16 + $0x4b0] sm:$0xff]  ;;  %v494_v41 = vld [vmem:[%s6072_s16 + $0x4c0] sm:$0xff] }
  0x58   : > { %1808 = vmatmul.mubr.bf16.vlgmr.msra.gmra.mrb[0].mxu1 %v5806_v3  ;;  %1390 = vmatpush1.bf16.msra.mxu0 %v6410_v29  ;;  %v486_v3 = vld [vmem:[%s6072_s16 + $0x480] sm:$0xff]  ;;  %9245 = vst [vmem:[#allocation37_spill] sm:$0xff] %v6447_v55  ;;  %v501_v29 = vld [vmem:[%s6072_s16 + $0x4f8] sm:$0xff] }
  0x59   : > { %1238 = vmatprep.mubr.bf16.mxu0 %v5809_v56  ;;  %1817 = vmatprep.mubr.bf16.mxu1 %v5809_v56  ;;  %v499_v56 = vld [vmem:[%s6072_s16 + $0x4e8] sm:$0xff]  ;;  %9246 = vst [vmem:[#allocation38_spill] sm:$0xff] %v6451_v62  ;;  %v6462_v12 = vpack.c.bf16 %v490_v46, %v486_v3  ;;  %v498_v25 = vld [vmem:[%s6072_s16 + $0x4e0] sm:$0xff]  ;;  %v496_v3 = vld [vmem:[%s6072_s16 + $0x4d0] sm:$0xff] }
  0x5a   : > { %1391 = vmatprep.subr.bf16.mxu0 %v6421_v11  ;;  %1969 = vmatpush1.bf16.msra.mxu1 %v6426_v23  ;;  %v5812_v11 = vld [vmem:[%s9101_s1 + $0x2d4] ss:$20 sps:$4 sm:$0xff]   ;;  %v497_v23 = vld [vmem:[%s6072_s16 + $0x4d8] sm:$0xff]  ;;  %v6464_v47 = vpack.c.bf16 %v499_v56, %v495_v28 }
  0x5b   : > { %1970 = vmatprep.subr.bf16.mxu1 %v6428_v14  ;;  %9247 = vst [vmem:[#allocation39_spill] sm:$0xff] %v6462_v12  ;;  %v503_v14 = vld [vmem:[%s6072_s16 + $0x508] sm:$0xff]  ;;  %v500_v46 = vld [vmem:[%s6072_s16 + $0x4f0] sm:$0xff]  ;;  %v505_v28 = vld [vmem:[%s6072_s16 + $0x518] sm:$0xff] }
  0x5c   : > { %1392 = vmatpush1.bf16.msra.mxu0 %v6433_v43  ;;  %9248 = vst [vmem:[#allocation40_spill] sm:$0xff] %v6464_v47  ;;  %v6470_v43 = vpack.c.bf16 %v492_v2, %v488_v60  ;;  %v509_v56 = vld [vmem:[%s6072_s16 + $0x538] sm:$0xff]  ;;  %v5814_v60 = vld [vmem:[%s9101_s1 + $0x2d0] ss:$20 sps:$4 sm:$0xff]  }
  0x5d   : > { %1393 = vmatprep.subr.bf16.mxu0 %v6440_v48  ;;  %v6474_v48 = vpack.c.bf16 %v501_v29, %v497_v23  ;;  %v6484_v29 = vpack.c.bf16 %v498_v25, %v494_v41  ;;  %v502_v23 = vld [vmem:[%s6072_s16 + $0x500] sm:$0xff]  ;;  %v6497_v41 = vpack.c.bf16 %v509_v56, %v505_v28  ;;  %v504_v25 = vld [vmem:[%s6072_s16 + $0x510] sm:$0xff] }
  0x5e   : > { %1971 = vmatpush1.bf16.msra.mxu1 %v6447_v55  ;;  %9249 = vst [vmem:[#allocation41_spill] sm:$0xff] %v6470_v43  ;;  %v506_v2 = vld [vmem:[%s6072_s16 + $0x520] sm:$0xff]  ;;  %v515_v55 = vld [vmem:[%s6072_s16 + $0x568] sm:$0xff] }
  0x5f   : > { %1239 = vmatmul.mubr.bf16.gmra.mrb[4].mxu0 %v5811_v38  ;;  %1972 = vmatprep.subr.bf16.mxu1 %v6451_v62  ;;  %9250 = vst [vmem:[#allocation42_spill] sm:$0xff] %v6474_v48  ;;  %9251 = vst [vmem:[#allocation43_spill] sm:$0xff] %v6484_v29  ;;  %v511_v62 = vld [vmem:[%s6072_s16 + $0x548] sm:$0xff]  ;;  %v514_v56 = vld [vmem:[%s6072_s16 + $0x560] sm:$0xff] }
  0x60   : > { %1818 = vmatmul.mubr.bf16.gmra.mrb[4].mxu1 %v5811_v38  ;;  %1248 = vmatprep.mubr.bf16.mxu0 %v5812_v11  ;;  %v6489_v38 = vpack.c.bf16 %v507_v21, %v503_v14  ;;  %9254 = vst [vmem:[#allocation46_spill] sm:$0xff] %v6497_v41  ;;  %v5815_v21 = vld [vmem:[%s9101_s1 + $0x2fc] ss:$20 sps:$4 sm:$0xff]   ;;  %v6511_v28 = vpack.c.bf16 %v515_v55, %v511_v62 }
  0x61   : > { %1827 = vmatprep.mubr.bf16.mxu1 %v5812_v11  ;;  %1394 = vmatpush1.bf16.msra.mxu0 %v6462_v12  ;;  %v6493_v11 = vpack.c.bf16 %v500_v46, %v496_v3  ;;  %v508_v12 = vld [vmem:[%s6072_s16 + $0x530] sm:$0xff]  ;;  %v513_v14 = vld [vmem:[%s6072_s16 + $0x558] sm:$0xff]  ;;  %v6507_v3 = vpack.c.bf16 %v506_v2, %v502_v23  ;;  %v510_v46 = vld [vmem:[%s6072_s16 + $0x540] sm:$0xff] }
  0x62   : > { %1395 = vmatprep.subr.bf16.mxu0 %v6464_v47  ;;  %9252 = vst [vmem:[#allocation44_spill] sm:$0xff] %v6489_v38  ;;  %1973 = vmatpush1.bf16.msra.mxu1 %v6470_v43  ;;  %v517_v47 = vld [vmem:[%s6072_s16 + $0x578] sm:$0xff]  ;;  %9256 = vst [vmem:[#allocation48_spill] sm:$0xff] %v6511_v28  ;;  %v523_v43 = vld [vmem:[%s6072_s16 + $0x5a8] sm:$0xff]  ;;  %v6517_v61 = vpack.c.bf16 %v508_v12, %v504_v25 }
  0x63   : > { %9253 = vst [vmem:[#allocation45_spill] sm:$0xff] %v6493_v11  ;;  %1974 = vmatprep.subr.bf16.mxu1 %v6474_v48  ;;  %9255 = vst [vmem:[#allocation47_spill] sm:$0xff] %v6507_v3  ;;  %v519_v48 = vld [vmem:[%s6072_s16 + $0x588] sm:$0xff]  ;;  %v6520_v23 = vpack.c.bf16 %v517_v47, %v513_v14  ;;  %v512_v2 = vld [vmem:[%s6072_s16 + $0x550] sm:$0xff]  ;;  %v6530_v47 = vpack.c.bf16 %v514_v56, %v510_v46 }
  0x64   : > { %9257 = vst [vmem:[#allocation49_spill] sm:$0xff] %v6517_v61  ;;  %v521_v55 = vld [vmem:[%s6072_s16 + $0x598] sm:$0xff]  ;;  %v6533_v25 = vpack.c.bf16 %v523_v43, %v519_v48  ;;  %v522_v14 = vld [vmem:[%s6072_s16 + $0x5a0] sm:$0xff]  ;;  %v520_v46 = vld [vmem:[%s6072_s16 + $0x590] sm:$0xff] }
  0x65   : > { %1396 = vmatpush1.bf16.msra.mxu0 %v6484_v29  ;;  %9258 = vst [vmem:[#allocation50_spill] sm:$0xff] %v6520_v23  ;;  %v516_v29 = vld [vmem:[%s6072_s16 + $0x570] sm:$0xff]  ;;  %v525_v62 = vld [vmem:[%s6072_s16 + $0x5b8] sm:$0xff]  ;;  %9259 = vst [vmem:[#allocation51_spill] sm:$0xff] %v6530_v47 }
  0x66   : > { %1397 = vmatprep.subr.bf16.mxu0 %v6489_v38  ;;  %1975 = vmatpush1.bf16.msra.mxu1 %v6493_v11  ;;  %v5817_v12 = vld [vmem:[%s9101_s1 + $0x2f8] ss:$20 sps:$4 sm:$0xff]   ;;  %9260 = vst [vmem:[#allocation52_spill] sm:$0xff] %v6533_v25  ;;  %v524_v56 = vld [vmem:[%s6072_s16 + $0x5b0] sm:$0xff] }
  0x67   : > { %1249 = vmatmul.mubr.bf16.gmra.mrb[8].mxu0 %v5814_v60  ;;  %1976 = vmatprep.subr.bf16.mxu1 %v6497_v41  ;;  %v527_v41 = vld [vmem:[%s6072_s16 + $0x5c8] sm:$0xff]  ;;  %v5818_v43 = vld [vmem:[%s9101_s1 + $0x324] ss:$20 sps:$4 sm:$0xff]  }
  0x68   : > { %1828 = vmatmul.mubr.bf16.gmra.mrb[8].mxu1 %v5814_v60  ;;  %1258 = vmatprep.mubr.bf16.mxu0 %v5815_v21  ;;  %v518_v60 = vld [vmem:[%s6072_s16 + $0x580] sm:$0xff]  ;;  %v531_v11 = vld [vmem:[%s6072_s16 + $0x5e8] sm:$0xff]  ;;  %v529_v48 = vld [vmem:[%s6072_s16 + $0x5d8] sm:$0xff] }
  0x69   : > { %1837 = vmatprep.mubr.bf16.mxu1 %v5815_v21  ;;  %1398 = vmatpush1.bf16.msra.mxu0 %v6507_v3  ;;  %v6539_v21 = vpack.c.bf16 %v516_v29, %v512_v2  ;;  %v6543_v3 = vpack.c.bf16 %v525_v62, %v521_v55  ;;  %v6553_v29 = vpack.c.bf16 %v522_v14, %v518_v60  ;;  %v526_v55 = vld [vmem:[%s6072_s16 + $0x5c0] sm:$0xff]  ;;  %v539_v38 = vld [vmem:[%s6072_s16 + $0x628] sm:$0xff]  ;;  %v528_v14 = vld [vmem:[%s6072_s16 + $0x5d0] sm:$0xff] }
  0x6a   : > { %1399 = vmatprep.subr.bf16.mxu0 %v6511_v28  ;;  %1977 = vmatpush1.bf16.msra.mxu1 %v6517_v61  ;;  %v533_v28 = vld [vmem:[%s6072_s16 + $0x5f8] sm:$0xff]  ;;  %v6556_v2 = vpack.c.bf16 %v531_v11, %v527_v41  ;;  %v530_v62 = vld [vmem:[%s6072_s16 + $0x5e0] sm:$0xff]  ;;  %v6562_v61 = vpack.c.bf16 %v524_v56, %v520_v46 }
  0x6b   : > { %9261 = vst [vmem:[#allocation53_spill] sm:$0xff] %v6539_v21  ;;  %1978 = vmatprep.subr.bf16.mxu1 %v6520_v23  ;;  %9262 = vst [vmem:[#allocation54_spill] sm:$0xff] %v6543_v3  ;;  %v535_v23 = vld [vmem:[%s6072_s16 + $0x608] sm:$0xff]  ;;  %v6566_v60 = vpack.c.bf16 %v533_v28, %v529_v48  ;;  %v537_v11 = vld [vmem:[%s6072_s16 + $0x618] sm:$0xff]  ;;  %v6576_v28 = vpack.c.bf16 %v530_v62, %v526_v55 }
  0x6c   : > { %9263 = vst [vmem:[#allocation55_spill] sm:$0xff] %v6553_v29  ;;  %9264 = vst [vmem:[#allocation56_spill] sm:$0xff] %v6556_v2  ;;  %v541_v41 = vld [vmem:[%s6072_s16 + $0x638] sm:$0xff]  ;;  %v5820_v46 = vld [vmem:[%s9101_s1 + $0x320] ss:$20 sps:$4 sm:$0xff]  }
  0x6d   : > { %1400 = vmatpush1.bf16.msra.mxu0 %v6530_v47  ;;  %9265 = vst [vmem:[#allocation57_spill] sm:$0xff] %v6562_v61  ;;  %9266 = vst [vmem:[#allocation58_spill] sm:$0xff] %v6566_v60  ;;  %v534_v56 = vld [vmem:[%s6072_s16 + $0x600] sm:$0xff]  ;;  %v6589_v55 = vpack.c.bf16 %v541_v41, %v537_v11  ;;  %v536_v62 = vld [vmem:[%s6072_s16 + $0x610] sm:$0xff] }
  0x6e   : > { %1401 = vmatprep.subr.bf16.mxu0 %v6533_v25  ;;  %1979 = vmatpush1.bf16.msra.mxu1 %v6539_v21  ;;  %v532_v25 = vld [vmem:[%s6072_s16 + $0x5f0] sm:$0xff]  ;;  %9267 = vst [vmem:[#allocation59_spill] sm:$0xff] %v6576_v28  ;;  %v538_v48 = vld [vmem:[%s6072_s16 + $0x620] sm:$0xff]  ;;  %v547_v21 = vld [vmem:[%s6072_s16 + $0x668] sm:$0xff] }
  0x6f   : > { %1259 = vmatmul.mubr.bf16.gmra.mrb[12].mxu0 %v5817_v12  ;;  %1980 = vmatprep.subr.bf16.mxu1 %v6543_v3  ;;  %v543_v3 = vld [vmem:[%s6072_s16 + $0x648] sm:$0xff]  ;;  %9270 = vst [vmem:[#allocation62_spill] sm:$0xff] %v6589_v55  ;;  %v546_v41 = vld [vmem:[%s6072_s16 + $0x660] sm:$0xff] }
  0x70   : > { %1838 = vmatmul.mubr.bf16.gmra.mrb[12].mxu1 %v5817_v12  ;;  %1268 = vmatprep.mubr.bf16.mxu0 %v5818_v43  ;;  %v6581_v12 = vpack.c.bf16 %v539_v38, %v535_v23  ;;  %v5821_v38 = vld [vmem:[%s9101_s1 + $0x34c] ss:$20 sps:$4 sm:$0xff]   ;;  %v545_v23 = vld [vmem:[%s6072_s16 + $0x658] sm:$0xff]  ;;  %v6603_v11 = vpack.c.bf16 %v547_v21, %v543_v3 }
  0x71   : > { %1847 = vmatprep.mubr.bf16.mxu1 %v5818_v43  ;;  %1402 = vmatpush1.bf16.msra.mxu0 %v6553_v29  ;;  %v6585_v43 = vpack.c.bf16 %v532_v25, %v528_v14  ;;  %v540_v29 = vld [vmem:[%s6072_s16 + $0x630] sm:$0xff]  ;;  %v6599_v25 = vpack.c.bf16 %v538_v48, %v534_v56  ;;  %v542_v14 = vld [vmem:[%s6072_s16 + $0x640] sm:$0xff] }
  0x72   : > { %1403 = vmatprep.subr.bf16.mxu0 %v6556_v2  ;;  %9268 = vst [vmem:[#allocation60_spill] sm:$0xff] %v6581_v12  ;;  %1981 = vmatpush1.bf16.msra.mxu1 %v6562_v61  ;;  %v549_v2 = vld [vmem:[%s6072_s16 + $0x678] sm:$0xff]  ;;  %9272 = vst [vmem:[#allocation64_spill] sm:$0xff] %v6603_v11  ;;  %v555_v61 = vld [vmem:[%s6072_s16 + $0x6a8] sm:$0xff]  ;;  %v6609_v47 = vpack.c.bf16 %v540_v29, %v536_v62 }
  0x73   : > { %9269 = vst [vmem:[#allocation61_spill] sm:$0xff] %v6585_v43  ;;  %1982 = vmatprep.subr.bf16.mxu1 %v6566_v60  ;;  %9271 = vst [vmem:[#allocation63_spill] sm:$0xff] %v6599_v25  ;;  %v551_v60 = vld [vmem:[%s6072_s16 + $0x688] sm:$0xff]  ;;  %v6612_v56 = vpack.c.bf16 %v549_v2, %v545_v23  ;;  %v544_v48 = vld [vmem:[%s6072_s16 + $0x650] sm:$0xff]  ;;  %v6624_v2 = vpack.c.bf16 %v546_v41, %v542_v14 }
  0x74   : > { %9273 = vst [vmem:[#allocation65_spill] sm:$0xff] %v6609_v47  ;;  %v550_v3 = vld [vmem:[%s6072_s16 + $0x680] sm:$0xff]  ;;  %v5823_v29 = vld [vmem:[%s9101_s1 + $0x348] ss:$20 sps:$4 sm:$0xff]   ;;  %v556_v14 = vld [vmem:[%s6072_s16 + $0x6b0] sm:$0xff] }
  0x75   : > { %1404 = vmatpush1.bf16.msra.mxu0 %v6576_v28  ;;  %9274 = vst [vmem:[#allocation66_spill] sm:$0xff] %v6612_v56  ;;  %v554_v21 = vld [vmem:[%s6072_s16 + $0x6a0] sm:$0xff]  ;;  %v553_v28 = vld [vmem:[%s6072_s16 + $0x698] sm:$0xff]  ;;  %9275 = vst [vmem:[#allocation67_spill] sm:$0xff] %v6624_v2 }
  0x76   : > { %1405 = vmatprep.subr.bf16.mxu0 %v6581_v12  ;;  %1983 = vmatpush1.bf16.msra.mxu1 %v6585_v43  ;;  %v548_v12 = vld [vmem:[%s6072_s16 + $0x670] sm:$0xff]  ;;  %v563_v62 = vld [vmem:[%s6072_s16 + $0x6e8] sm:$0xff]  ;;  %v6640_v41 = vpack.c.bf16 %v557_v58, %v553_v28  ;;  %v561_v43 = vld [vmem:[%s6072_s16 + $0x6d8] sm:$0xff] }
  0x77   : > { %1269 = vmatmul.mubr.bf16.gmra.mrb[16].mxu0 %v5820_v46  ;;  %1984 = vmatprep.subr.bf16.mxu1 %v6589_v55  ;;  %v5824_v23 = vld [vmem:[%s9101_s1 + $0x374] ss:$20 sps:$4 sm:$0xff]   ;;  %v6635_v55 = vpack.c.bf16 %v548_v12, %v544_v48 }
  0x78   : > { %1848 = vmatmul.mubr.bf16.gmra.mrb[16].mxu1 %v5820_v46  ;;  %1278 = vmatprep.mubr.bf16.mxu0 %v5821_v38  ;;  %v559_v46 = vld [vmem:[%s6072_s16 + $0x6c8] sm:$0xff]  ;;  %9278 = vst [vmem:[#allocation70_spill] sm:$0xff] %v6640_v41  ;;  %v560_v28 = vld [vmem:[%s6072_s16 + $0x6d0] sm:$0xff] }
  0x79   : > { %1857 = vmatprep.mubr.bf16.mxu1 %v5821_v38  ;;  %1406 = vmatpush1.bf16.msra.mxu0 %v6599_v25  ;;  %v6632_v38 = vpack.c.bf16 %v555_v61, %v551_v60  ;;  %9277 = vst [vmem:[#allocation69_spill] sm:$0xff] %v6635_v55  ;;  %v552_v25 = vld [vmem:[%s6072_s16 + $0x690] sm:$0xff]  ;;  %v6647_v61 = vpack.c.bf16 %v554_v21, %v550_v3  ;;  %v567_v60 = vld [vmem:[%s6072_s16 + $0x708] sm:$0xff]  ;;  %v569_v21 = vld [vmem:[%s6072_s16 + $0x718] sm:$0xff] }
  0x7a   : > { %1407 = vmatprep.subr.bf16.mxu0 %v6603_v11  ;;  %1985 = vmatpush1.bf16.msra.mxu1 %v6609_v47  ;;  %v571_v12 = vld [vmem:[%s6072_s16 + $0x728] sm:$0xff]  ;;  %v6652_v48 = vpack.c.bf16 %v563_v62, %v559_v46  ;;  %v6655_v58 = vpack.c.bf16 %v556_v14, %v552_v25  ;;  %v6660_v3 = vpack.c.bf16 %v565_v37, %v561_v43  ;;  %v566_v46 = vld [vmem:[%s6072_s16 + $0x700] sm:$0xff]  ;;  %v573_v25 = vld [vmem:[%s6072_s16 + $0x738] sm:$0xff] }
  0x7b   : > { %9276 = vst [vmem:[#allocation68_spill] sm:$0xff] %v6632_v38  ;;  %1986 = vmatprep.subr.bf16.mxu1 %v6612_v56  ;;  %9279 = vst [vmem:[#allocation71_spill] sm:$0xff] %v6647_v61  ;;  %v564_v56 = vld [vmem:[%s6072_s16 + $0x6f0] sm:$0xff]  ;;  %v570_v62 = vld [vmem:[%s6072_s16 + $0x720] sm:$0xff] }
  0x7c   : > { %9280 = vst [vmem:[#allocation72_spill] sm:$0xff] %v6652_v48  ;;  %9281 = vst [vmem:[#allocation73_spill] sm:$0xff] %v6655_v58  ;;  %v5826_v14 = vld [vmem:[%s9101_s1 + $0x370] ss:$20 sps:$4 sm:$0xff]   ;;  %v575_v37 = vld [vmem:[%s6072_s16 + $0x748] sm:$0xff]  ;;  %v6693_v30 = vpack.c.bf16 %v570_v62, %v566_v46 }
  0x7d   : > { %1408 = vmatpush1.bf16.msra.mxu0 %v6624_v2  ;;  %9282 = vst [vmem:[#allocation74_spill] sm:$0xff] %v6660_v3  ;;  %v579_v43 = vld [vmem:[%s6072_s16 + $0x768] sm:$0xff]  ;;  %v6688_v2 = vpack.c.bf16 %v573_v25, %v569_v21  ;;  %v574_v47 = vld [vmem:[%s6072_s16 + $0x740] sm:$0xff]  ;;  %v585_v25 = vld [vmem:[%s6072_s16 + $0x798] sm:$0xff] }
  0x7e   : > { %1409 = vmatprep.subr.bf16.mxu0 %v6632_v38  ;;  %1987 = vmatpush1.bf16.msra.mxu1 %v6635_v55  ;;  %v572_v55 = vld [vmem:[%s6072_s16 + $0x730] sm:$0xff]  ;;  %v6680_v38 = vpack.c.bf16 %v571_v12, %v567_v60  ;;  %v578_v11 = vld [vmem:[%s6072_s16 + $0x760] sm:$0xff]  ;;  %9287 = vst [vmem:[#allocation79_spill] sm:$0xff] %v6693_v30  ;;  %v583_v60 = vld [vmem:[%s6072_s16 + $0x788] sm:$0xff] }
  0x7f   : > { %1279 = vmatmul.mubr.bf16.gmra.mrb[20].mxu0 %v5823_v29  ;;  %1988 = vmatprep.subr.bf16.mxu1 %v6640_v41  ;;  %v6670_v41 = vpack.c.bf16 %v562_v32, %v558_v45  ;;  %v6683_v32 = vpack.c.bf16 %v564_v56, %v560_v28  ;;  %v577_v45 = vld [vmem:[%s6072_s16 + $0x758] sm:$0xff]  ;;  %9286 = vst [vmem:[#allocation78_spill] sm:$0xff] %v6688_v2  ;;  %v587_v12 = vld [vmem:[%s6072_s16 + $0x7a8] sm:$0xff]  ;;  %v576_v56 = vld [vmem:[%s6072_s16 + $0x750] sm:$0xff] }
  0x80   : > { %1858 = vmatmul.mubr.bf16.gmra.mrb[20].mxu1 %v5823_v29  ;;  %1288 = vmatprep.mubr.bf16.mxu0 %v5824_v23  ;;  %v568_v29 = vld [vmem:[%s6072_s16 + $0x710] sm:$0xff]  ;;  %9284 = vst [vmem:[#allocation76_spill] sm:$0xff] %v6680_v38  ;;  %v582_v62 = vld [vmem:[%s6072_s16 + $0x780] sm:$0xff] }
  0x81   : > { %1867 = vmatprep.mubr.bf16.mxu1 %v5824_v23  ;;  %1410 = vmatpush1.bf16.msra.mxu0 %v6647_v61  ;;  %9283 = vst [vmem:[#allocation75_spill] sm:$0xff] %v6670_v41  ;;  %v5827_v23 = vld [vmem:[%s9101_s1 + $0x39c] ss:$20 sps:$4 sm:$0xff]   ;;  %9285 = vst [vmem:[#allocation77_spill] sm:$0xff] %v6683_v32  ;;  %v6703_v21 = vpack.c.bf16 %v572_v55, %v568_v29  ;;  %v5829_v55 = vld [vmem:[%s9101_s1 + $0x398] ss:$20 sps:$4 sm:$0xff]   ;;  %v6716_v29 = vpack.c.bf16 %v578_v11, %v574_v47 }
  0x82   : > { %1411 = vmatprep.subr.bf16.mxu0 %v6652_v48  ;;  %1989 = vmatpush1.bf16.msra.mxu1 %v6655_v58  ;;  %v581_v61 = vld [vmem:[%s6072_s16 + $0x778] sm:$0xff]  ;;  %v580_v28 = vld [vmem:[%s6072_s16 + $0x770] sm:$0xff]  ;;  %v6700_v58 = vpack.c.bf16 %v579_v43, %v575_v37  ;;  %v586_v37 = vld [vmem:[%s6072_s16 + $0x7a0] sm:$0xff] }
  0x83   : > { %1990 = vmatprep.subr.bf16.mxu1 %v6660_v3  ;;  %v6707_v46 = vpack.c.bf16 %v581_v61, %v577_v45  ;;  %v589_v43 = vld [vmem:[%s6072_s16 + $0x7b8] sm:$0xff]  ;;  %v591_v61 = vld [vmem:[%s6072_s16 + $0x7c8] sm:$0xff]  ;;  %v594_v3 = vld [vmem:[%s6072_s16 + $0x7e0] sm:$0xff]  ;;  %v6739_v48 = vpack.c.bf16 %v586_v37, %v582_v62 }
  0x84   : > { %9288 = vst [vmem:[#allocation80_spill] sm:$0xff] %v6700_v58  ;;  %v595_v45 = vld [vmem:[%s6072_s16 + $0x7e8] sm:$0xff]  ;;  %v593_v47 = vld [vmem:[%s6072_s16 + $0x7d8] sm:$0xff] }
  0x85   : > { %1412 = vmatpush1.bf16.msra.mxu0 %v6670_v41  ;;  %v597_v11 = vld [vmem:[%s6072_s16 + $0x7f8] sm:$0xff]  ;;  %v590_v41 = vld [vmem:[%s6072_s16 + $0x7c0] sm:$0xff] }
  0x86   : > { %1413 = vmatprep.subr.bf16.mxu0 %v6680_v38  ;;  %1991 = vmatpush1.bf16.msra.mxu1 %v6683_v32  ;;  %v6726_v32 = vpack.c.bf16 %v587_v12, %v583_v60  ;;  %v6734_v38 = vpack.c.bf16 %v589_v43, %v585_v25  ;;  %v599_v60 = vld [vmem:[%s6072_s16 + $0x808] sm:$0x3]  ;;  %v6746_v12 = vpack.c.bf16 %v595_v45, %v591_v61  ;;  %v5832_v25 = vld [vmem:[%s9101_s1 + $0x3c0] ss:$20 sps:$4 sm:$0xff]   ;;  %v5839_v61 = vld [vmem:[%s9101_s1 + $0x43c] ss:$20 sps:$4 sm:$0xff]  }
  0x87   : > { %1289 = vmatmul.mubr.bf16.gmra.mrb[24].mxu0 %v5826_v14  ;;  %1992 = vmatprep.subr.bf16.mxu1 %v6688_v2  ;;  %v588_v2 = vld [vmem:[%s6072_s16 + $0x7b0] sm:$0xff]  ;;  %v6757_v62 = vpack.c.bf16 %v594_v3, %v590_v41  ;;  %v6766_v43 = vpack.c.bf16 %v599_v60, %v599_v60  ;;  %v601_v41 = vld [vmem:[%s6072_s16 + $0x818] sm:$0x3] }
  0x88   : > { %1868 = vmatmul.mubr.bf16.gmra.mrb[24].mxu1 %v5826_v14  ;;  %1298 = vmatprep.mubr.bf16.mxu0 %v5827_v23  ;;  %v584_v14 = vld [vmem:[%s6072_s16 + $0x790] sm:$0xff]  ;;  %v5841_v45 = vld [vmem:[%s9101_s1 + $0x438] ss:$20 sps:$4 sm:$0xff]  }
  0x89   : > { %1877 = vmatprep.mubr.bf16.mxu1 %v5827_v23  ;;  %1414 = vmatpush1.bf16.msra.mxu0 %v6693_v30  ;;  %v5830_v23 = vld [vmem:[%s9101_s1 + $0x3c4] ss:$20 sps:$4 sm:$0xff]   ;;  %v6729_v30 = vpack.c.bf16 %v580_v28, %v576_v56  ;;  %v6748_v56 = vpack.c.bf16 %v588_v2, %v584_v14  ;;  %v6751_v28 = vpack.c.bf16 %v597_v11, %v593_v47  ;;  %v5833_v2 = vld [vmem:[%s9101_s1 + $0x3ec] ss:$20 sps:$4 sm:$0xff]   ;;  %v5836_v3 = vld [vmem:[%s9101_s1 + $0x414] ss:$20 sps:$4 sm:$0xff]  }
  0x8a   : > { %1415 = vmatprep.subr.bf16.mxu0 %v6700_v58  ;;  %1993 = vmatpush1.bf16.msra.mxu1 %v6703_v21  ;;  %v596_v58 = vld [vmem:[%s6072_s16 + $0x7f0] sm:$0xff]  ;;  %v5842_v14 = vld [vmem:[%s9101_s1 + $0x464] ss:$20 sps:$4 sm:$0xff]   ;;  %v5845_v47 = vld [vmem:[%s9101_s1 + $0x48c] ss:$20 sps:$4 sm:$0xff]  }
  0x8b   : > { %1994 = vmatprep.subr.bf16.mxu1 %v6707_v46  ;;  %v6764_v37 = vpack.c.bf16 %v596_v58, %v592_v20  ;;  %v5835_v20 = vld [vmem:[%s9101_s1 + $0x3e8] ss:$20 sps:$4 sm:$0xff]   ;;  %v6777_v58 = vpack.c.bf16 %v601_v41, %v601_v41  ;;  %v5853_v41 = vld [vmem:[%s9101_s1 + $0x4d8] ss:$20 sps:$4 sm:$0xff]  }
  0x8c   : > { %v5847_v11 = vld [vmem:[%s9101_s1 + $0x488] ss:$20 sps:$4 sm:$0xff]  }
  0x8d   : > { %1416 = vmatpush1.bf16.msra.mxu0 %v6716_v29  ;;  %v5848_v60 = vld [vmem:[%s9101_s1 + $0x4b4] ss:$20 sps:$4 sm:$0xff]  }
  0x8e   : > { %1417 = vmatprep.subr.bf16.mxu0 %v6726_v32  ;;  %1995 = vmatpush1.bf16.msra.mxu1 %v6729_v30 }
  0x8f   : > { %1299 = vmatmul.mubr.bf16.gmra.mrb[28].mxu0 %v5829_v55  ;;  %1996 = vmatprep.subr.bf16.mxu1 %v6734_v38 }
  0x90   : > { %1878 = vmatmul.mubr.bf16.gmra.mrb[28].mxu1 %v5829_v55  ;;  %1308 = vmatprep.mubr.bf16.mxu0 %v5830_v23  ;;  %v5838_v55 = vld [vmem:[%s9101_s1 + $0x410] ss:$20 sps:$4 sm:$0xff]  }
  0x91   : > { %1887 = vmatprep.mubr.bf16.mxu1 %v5830_v23  ;;  %1418 = vmatpush1.bf16.msra.mxu0 %v6739_v48  ;;  %v5844_v23 = vld [vmem:[%s9101_s1 + $0x460] ss:$20 sps:$4 sm:$0xff]  }
  0x92   : > { %1419 = vmatprep.subr.bf16.mxu0 %v6746_v12  ;;  %1997 = vmatpush1.bf16.msra.mxu1 %v6748_v56 }
  0x93   : > { %1998 = vmatprep.subr.bf16.mxu1 %v6751_v28 }
  0x95   : > { %1420 = vmatpush1.bf16.msra.mxu0 %v6757_v62 }
  0x96   : > { %1999 = vmatpush1.bf16.msra.mxu1 %v6764_v37  ;;  %5004 = vmatprep.subr.msk.bf16.mxu0 %vm1183_vm0, %v6766_v43 }
  0x97   : > { %1309 = vmatmul.mubr.bf16.gmra.mrb[32].mxu0 %v5832_v25  ;;  %5021 = vmatprep.subr.msk.bf16.mxu1 %vm1183_vm0, %v6777_v58 }
  0x98   : > { %1888 = vmatmul.mubr.bf16.gmra.mrb[32].mxu1 %v5832_v25  ;;  %1318 = vmatprep.mubr.bf16.mxu0 %v5833_v2  ;;  %v5850_v25 = vld [vmem:[%s9101_s1 + $0x4b0] ss:$20 sps:$4 sm:$0xff]  }
  0x99   : > { %1897 = vmatprep.mubr.bf16.mxu1 %v5833_v2  ;;  %v5851_v2 = vld [vmem:[%s9101_s1 + $0x4dc] ss:$20 sps:$4 sm:$0xff]  }
  0x9f   : > { %1319 = vmatmul.mubr.bf16.gmra.mrb[36].mxu0 %v5835_v20 }
  0xa0   : > { %1898 = vmatmul.mubr.bf16.gmra.mrb[36].mxu1 %v5835_v20  ;;  %1328 = vmatprep.mubr.bf16.mxu0 %v5836_v3  ;;  %v5856_v20 = vld [vmem:[%s9101_s1 + $0x28c] ss:$20 sps:$4 sm:$0xff]  }
  0xa1   : > { %1907 = vmatprep.mubr.bf16.mxu1 %v5836_v3  ;;  %v598_v3 = vld [vmem:[%s6072_s16 + $0x800] sm:$0x3] }
  0xa7   : > { %1329 = vmatmul.mubr.bf16.gmra.mrb[40].mxu0 %v5838_v55 }
  0xa8   : > { %1908 = vmatmul.mubr.bf16.gmra.mrb[40].mxu1 %v5838_v55  ;;  %1338 = vmatprep.mubr.bf16.mxu0 %v5839_v61  ;;  %v600_v55 = vld [vmem:[%s6072_s16 + $0x810] sm:$0x3] }
  0xa9   : > { %1917 = vmatprep.mubr.bf16.mxu1 %v5839_v61  ;;  %v730_v61 = vpack.c.bf16 %v598_v3, %v598_v3  ;;  %v5869_v3 = vld [vmem:[%s9101_s1 + $0x354] ss:$20 sps:$4 sm:$0xff]  }
  0xaf   : > { %1339 = vmatmul.mubr.bf16.gmra.mrb[44].mxu0 %v5841_v45 }
  0xb0   : > { %1918 = vmatmul.mubr.bf16.gmra.mrb[44].mxu1 %v5841_v45  ;;  %1348 = vmatprep.mubr.bf16.mxu0 %v5842_v14  ;;  %v5854_v45 = vld [vmem:[%s9101_s1 + $0x288] ss:$20 sps:$4 sm:$0xff]  }
  0xb1   : > { %1927 = vmatprep.mubr.bf16.mxu1 %v5842_v14  ;;  %v732_v14 = vpack.c.bf16 %v600_v55, %v600_v55  ;;  %v5871_v55 = vld [vmem:[%s9101_s1 + $0x350] ss:$20 sps:$4 sm:$0xff]  }
  0xb7   : > { %1349 = vmatmul.mubr.bf16.gmra.mrb[48].mxu0 %v5844_v23 }
  0xb8   : > { %1928 = vmatmul.mubr.bf16.gmra.mrb[48].mxu1 %v5844_v23  ;;  %1358 = vmatprep.mubr.bf16.mxu0 %v5845_v47  ;;  %v6826_v23 = vsel %vm1183_vm0, %v730_v61, 0  ;;  %v5872_v61 = vld [vmem:[%s9101_s1 + $0x37c] ss:$20 sps:$4 sm:$0xff]  }
  0xb9   : > { %1937 = vmatprep.mubr.bf16.mxu1 %v5845_v47  ;;  %v5857_v47 = vld [vmem:[%s9101_s1 + $0x2b4] ss:$20 sps:$4 sm:$0xff]  }
  0xbf   : > { %1359 = vmatmul.mubr.bf16.gmra.mrb[52].mxu0 %v5847_v11 }
  0xc0   : > { %1938 = vmatmul.mubr.bf16.gmra.mrb[52].mxu1 %v5847_v11  ;;  %1368 = vmatprep.mubr.bf16.mxu0 %v5848_v60  ;;  %v6832_v11 = vsel %vm1183_vm0, %v732_v14, 0  ;;  %v5875_v14 = vld [vmem:[%s9101_s1 + $0x3a4] ss:$20 sps:$4 sm:$0xff]  }
  0xc1   : > { %1947 = vmatprep.mubr.bf16.mxu1 %v5848_v60  ;;  %v5859_v60 = vld [vmem:[%s9101_s1 + $0x2b0] ss:$20 sps:$4 sm:$0xff]  }
  0xc7   : > { %1369 = vmatmul.mubr.bf16.gmra.mrb[56].mxu0 %v5850_v25 }
  0xc8   : > { %1948 = vmatmul.mubr.bf16.gmra.mrb[56].mxu1 %v5850_v25  ;;  %1378 = vmatprep.mubr.bf16.mxu0 %v5851_v2  ;;  %v5860_v25 = vld [vmem:[%s9101_s1 + $0x2dc] ss:$20 sps:$4 sm:$0xff]  }
  0xc9   : > { %1957 = vmatprep.mubr.bf16.mxu1 %v5851_v2  ;;  %v5862_v2 = vld [vmem:[%s9101_s1 + $0x2d8] ss:$20 sps:$4 sm:$0xff]  }
  0xcf   : > { %1379 = vmatmul.mubr.bf16.gmra.mrb[60].mxu0 %v5853_v41 }
  0xd0   : > { %1958 = vmatmul.mubr.bf16.gmra.mrb[60].mxu1 %v5853_v41  ;;  %1421 = vmatprep.mubr.bf16.mxu0 %v5856_v20  ;;  %v5866_v41 = vld [vmem:[%s9101_s1 + $0x32c] ss:$20 sps:$4 sm:$0xff]  }
  0xd1   : > { %2000 = vmatprep.mubr.bf16.mxu1 %v5856_v20  ;;  %v5868_v20 = vld [vmem:[%s9101_s1 + $0x328] ss:$20 sps:$4 sm:$0xff]  }
  0xd7   : > { %1422 = vmatmul.mubr.bf16.vlgmr.msra.gmra.mrb[0].mxu0 %v5854_v45 }
  0xd8   : > { %2001 = vmatmul.mubr.bf16.vlgmr.msra.gmra.mrb[0].mxu1 %v5854_v45  ;;  %1583 = vmatpush1.bf16.msra.mxu0 %v6826_v23  ;;  %v5874_v45 = vld [vmem:[%s9101_s1 + $0x378] ss:$20 sps:$4 sm:$0xff]  }
  0xd9   : > { %1431 = vmatprep.mubr.bf16.mxu0 %v5857_v47  ;;  %2010 = vmatprep.mubr.bf16.mxu1 %v5857_v47  ;;  %v5877_v47 = vld [vmem:[%s9101_s1 + $0x3a0] ss:$20 sps:$4 sm:$0xff]  }
  0xda   : > { %2162 = vmatpush1.bf16.msra.mxu1 %v6832_v11  ;;  %3319 = vmatprep.subr.bf16.mxu0 %v6077_v4  ;;  %v5863_v4 = vld [vmem:[%s9101_s1 + $0x304] ss:$20 sps:$4 sm:$0xff]  }
  0xdb   : > { %3898 = vmatprep.subr.bf16.mxu1 %v6082_v8  ;;  %v5865_v8 = vld [vmem:[%s9101_s1 + $0x300] ss:$20 sps:$4 sm:$0xff]  }
  0xdf   : > { %1432 = vmatmul.mubr.bf16.gmra.mrb[4].mxu0 %v5859_v60 }
  0xe0   : > { %2011 = vmatmul.mubr.bf16.gmra.mrb[4].mxu1 %v5859_v60  ;;  %1441 = vmatprep.mubr.bf16.mxu0 %v5860_v25  ;;  %v5878_v60 = vld [vmem:[%s9101_s1 + $0x3cc] ss:$20 sps:$4 sm:$0xff]  }
  0xe1   : > { %2020 = vmatprep.mubr.bf16.mxu1 %v5860_v25  ;;  %v5880_v25 = vld [vmem:[%s9101_s1 + $0x3c8] ss:$20 sps:$4 sm:$0xff]  }
  0xe7   : > { %1442 = vmatmul.mubr.bf16.gmra.mrb[8].mxu0 %v5862_v2 }
  0xe8   : > { %2021 = vmatmul.mubr.bf16.gmra.mrb[8].mxu1 %v5862_v2  ;;  %1451 = vmatprep.mubr.bf16.mxu0 %v5863_v4  ;;  %v5881_v2 = vld [vmem:[%s9101_s1 + $0x3f4] ss:$20 sps:$4 sm:$0xff]  }
  0xe9   : > { %2030 = vmatprep.mubr.bf16.mxu1 %v5863_v4  ;;  %v5883_v4 = vld [vmem:[%s9101_s1 + $0x3f0] ss:$20 sps:$4 sm:$0xff]  }
  0xef   : > { %1452 = vmatmul.mubr.bf16.gmra.mrb[12].mxu0 %v5865_v8 }
  0xf0   : > { %2031 = vmatmul.mubr.bf16.gmra.mrb[12].mxu1 %v5865_v8  ;;  %1461 = vmatprep.mubr.bf16.mxu0 %v5866_v41  ;;  %v5884_v8 = vld [vmem:[%s9101_s1 + $0x41c] ss:$20 sps:$4 sm:$0xff]  }
  0xf1   : > { %2040 = vmatprep.mubr.bf16.mxu1 %v5866_v41  ;;  %v5886_v41 = vld [vmem:[%s9101_s1 + $0x418] ss:$20 sps:$4 sm:$0xff]  }
  0xf7   : > { %1462 = vmatmul.mubr.bf16.gmra.mrb[16].mxu0 %v5868_v20 }
  0xf8   : > { %2041 = vmatmul.mubr.bf16.gmra.mrb[16].mxu1 %v5868_v20  ;;  %1471 = vmatprep.mubr.bf16.mxu0 %v5869_v3  ;;  %v5887_v20 = vld [vmem:[%s9101_s1 + $0x444] ss:$20 sps:$4 sm:$0xff]  }
  0xf9   : > { %2050 = vmatprep.mubr.bf16.mxu1 %v5869_v3  ;;  %v5889_v3 = vld [vmem:[%s9101_s1 + $0x440] ss:$20 sps:$4 sm:$0xff]  }
  0xff   : > { %1472 = vmatmul.mubr.bf16.gmra.mrb[20].mxu0 %v5871_v55 }
 0x100   : > { %2051 = vmatmul.mubr.bf16.gmra.mrb[20].mxu1 %v5871_v55  ;;  %1481 = vmatprep.mubr.bf16.mxu0 %v5872_v61  ;;  %v5890_v55 = vld [vmem:[%s9101_s1 + $0x46c] ss:$20 sps:$4 sm:$0xff]  }
 0x101   : > { %2060 = vmatprep.mubr.bf16.mxu1 %v5872_v61  ;;  %v5892_v61 = vld [vmem:[%s9101_s1 + $0x468] ss:$20 sps:$4 sm:$0xff]  }
 0x107   : > { %1482 = vmatmul.mubr.bf16.gmra.mrb[24].mxu0 %v5874_v45 }
 0x108   : > { %2061 = vmatmul.mubr.bf16.gmra.mrb[24].mxu1 %v5874_v45  ;;  %1491 = vmatprep.mubr.bf16.mxu0 %v5875_v14  ;;  %v5893_v45 = vld [vmem:[%s9101_s1 + $0x494] ss:$20 sps:$4 sm:$0xff]  }
 0x109   : > { %2070 = vmatprep.mubr.bf16.mxu1 %v5875_v14  ;;  %v5895_v14 = vld [vmem:[%s9101_s1 + $0x490] ss:$20 sps:$4 sm:$0xff]  }
 0x10f   : > { %1492 = vmatmul.mubr.bf16.gmra.mrb[28].mxu0 %v5877_v47 }
 0x110   : > { %2071 = vmatmul.mubr.bf16.gmra.mrb[28].mxu1 %v5877_v47  ;;  %1501 = vmatprep.mubr.bf16.mxu0 %v5878_v60  ;;  %v5896_v47 = vld [vmem:[%s9101_s1 + $0x4bc] ss:$20 sps:$4 sm:$0xff]  }
 0x111   : > { %2080 = vmatprep.mubr.bf16.mxu1 %v5878_v60  ;;  %v5898_v60 = vld [vmem:[%s9101_s1 + $0x4b8] ss:$20 sps:$4 sm:$0xff]  }
 0x117   : > { %1502 = vmatmul.mubr.bf16.gmra.mrb[32].mxu0 %v5880_v25 }
 0x118   : > { %2081 = vmatmul.mubr.bf16.gmra.mrb[32].mxu1 %v5880_v25  ;;  %1511 = vmatprep.mubr.bf16.mxu0 %v5881_v2  ;;  %v5899_v25 = vld [vmem:[%s9101_s1 + $0x4e4] ss:$20 sps:$4 sm:$0xff]  }
 0x119   : > { %2090 = vmatprep.mubr.bf16.mxu1 %v5881_v2  ;;  %v5901_v2 = vld [vmem:[%s9101_s1 + $0x4e0] ss:$20 sps:$4 sm:$0xff]  }
 0x11f   : > { %1512 = vmatmul.mubr.bf16.gmra.mrb[36].mxu0 %v5883_v4 }
 0x120   : > { %2091 = vmatmul.mubr.bf16.gmra.mrb[36].mxu1 %v5883_v4  ;;  %1521 = vmatprep.mubr.bf16.mxu0 %v5884_v8  ;;  %v9182_v4 = vmov 0  }
 0x121   : > { %2100 = vmatprep.mubr.bf16.mxu1 %v5884_v8  ;;  %v5902_v8 = vld [vmem:[%s9101_s1 + $0x290] ss:$20 sps:$4 sm:$0xff]  }
 0x127   : > { %1522 = vmatmul.mubr.bf16.gmra.mrb[40].mxu0 %v5886_v41 }
 0x128   : > { %2101 = vmatmul.mubr.bf16.gmra.mrb[40].mxu1 %v5886_v41  ;;  %1531 = vmatprep.mubr.bf16.mxu0 %v5887_v20  ;;  %v5903_v41 = vld [vmem:[%s9101_s1 + $0x2b8] ss:$20 sps:$4 sm:$0xff]  }
 0x129   : > { %2110 = vmatprep.mubr.bf16.mxu1 %v5887_v20  ;;  %v9317_v20 = vld [vmem:[#allocation30_spill] sm:$0xff] }
 0x12f   : > { %1532 = vmatmul.mubr.bf16.gmra.mrb[44].mxu0 %v5889_v3 }
 0x130   : > { %2111 = vmatmul.mubr.bf16.gmra.mrb[44].mxu1 %v5889_v3  ;;  %1541 = vmatprep.mubr.bf16.mxu0 %v5890_v55  ;;  %v5911_v3 = vld [vmem:[%s9101_s1 + $0x3f8] ss:$20 sps:$4 sm:$0xff]  }
 0x131   : > { %2120 = vmatprep.mubr.bf16.mxu1 %v5890_v55  ;;  %v5912_v55 = vld [vmem:[%s9101_s1 + $0x420] ss:$20 sps:$4 sm:$0xff]  }
 0x137   : > { %1542 = vmatmul.mubr.bf16.gmra.mrb[48].mxu0 %v5892_v61 }
 0x138   : > { %2121 = vmatmul.mubr.bf16.gmra.mrb[48].mxu1 %v5892_v61  ;;  %1551 = vmatprep.mubr.bf16.mxu0 %v5893_v45  ;;  %v5913_v61 = vld [vmem:[%s9101_s1 + $0x448] ss:$20 sps:$4 sm:$0xff]  }
 0x139   : > { %2130 = vmatprep.mubr.bf16.mxu1 %v5893_v45  ;;  %v5914_v45 = vld [vmem:[%s9101_s1 + $0x470] ss:$20 sps:$4 sm:$0xff]  }
 0x13f   : > { %1552 = vmatmul.mubr.bf16.gmra.mrb[52].mxu0 %v5895_v14 }
 0x140   : > { %2131 = vmatmul.mubr.bf16.gmra.mrb[52].mxu1 %v5895_v14  ;;  %1561 = vmatprep.mubr.bf16.mxu0 %v5896_v47  ;;  %v5915_v14 = vld [vmem:[%s9101_s1 + $0x498] ss:$20 sps:$4 sm:$0xff]  }
 0x141   : > { %2140 = vmatprep.mubr.bf16.mxu1 %v5896_v47  ;;  %v5916_v47 = vld [vmem:[%s9101_s1 + $0x4c0] ss:$20 sps:$4 sm:$0xff]  }
 0x147   : > { %1562 = vmatmul.mubr.bf16.gmra.mrb[56].mxu0 %v5898_v60 }
 0x148   : > { %2141 = vmatmul.mubr.bf16.gmra.mrb[56].mxu1 %v5898_v60  ;;  %1571 = vmatprep.mubr.bf16.mxu0 %v5899_v25  ;;  %v5917_v60 = vld [vmem:[%s9101_s1 + $0x4e8] ss:$20 sps:$4 sm:$0xff]  }
 0x149   : > { %2150 = vmatprep.mubr.bf16.mxu1 %v5899_v25  ;;  %v5920_v25 = vld [vmem:[%s9101_s1 + $0x4] ss:$20 sps:$4 sm:$0xff]  }
 0x14f   : > { %1572 = vmatmul.mubr.bf16.gmra.mrb[60].mxu0 %v5901_v2 }
 0x150   : > { %2151 = vmatmul.mubr.bf16.gmra.mrb[60].mxu1 %v5901_v2  ;;  %1614 = vmatprep.mubr.bf16.mxu0 %v9182_v4  ;;  %v5918_v2 = vld [vmem:[%s9101_s1] ss:$20 sps:$4 sm:$0xff]  }
 0x151   : > { %2193 = vmatprep.mubr.bf16.mxu1 %v9182_v4 }
 0x157   : > { %5005 = vmatmul.mubr.msk.bf16.vlgmr.msra.gmra.mrb[0].mxu0 %vm1134_vm1, %v5902_v8 }
 0x158   : > { %5022 = vmatmul.mubr.msk.bf16.vlgmr.msra.gmra.mrb[0].mxu1 %vm1134_vm1, %v5902_v8  ;;  %3320 = vmatpush1.bf16.msra.mxu0 %v6084_v9  ;;  %v5904_v9 = vld [vmem:[%s9101_s1 + $0x2e0] ss:$20 sps:$4 sm:$0xff]  }
 0x159   : > { %1624 = vmatprep.mubr.bf16.mxu0 %v9182_v4  ;;  %2203 = vmatprep.mubr.bf16.mxu1 %v9182_v4  ;;  %v5921_v8 = vld [vmem:[%s9101_s1 + $0x2c] ss:$20 sps:$4 sm:$0xff]  }
 0x15a   : > { %3321 = vmatprep.subr.bf16.mxu0 %v6097_v17  ;;  %3899 = vmatpush1.bf16.msra.mxu1 %v6090_v13  ;;  %v5905_v13 = vld [vmem:[%s9101_s1 + $0x308] ss:$20 sps:$4 sm:$0xff]   ;;  %v5906_v17 = vld [vmem:[%s9101_s1 + $0x330] ss:$20 sps:$4 sm:$0xff]  }
 0x15b   : > { %3900 = vmatprep.subr.bf16.mxu1 %v6099_v18  ;;  %v5907_v18 = vld [vmem:[%s9101_s1 + $0x358] ss:$20 sps:$4 sm:$0xff]  }
 0x15c   : > { %3322 = vmatpush1.bf16.msra.mxu0 %v6105_v22  ;;  %v9289_v22 = vld [vmem:[#allocation2_spill] sm:$0xff] }
 0x15d   : > { %3323 = vmatprep.subr.bf16.mxu0 %v6114_v27  ;;  %v9291_v27 = vld [vmem:[#allocation5_spill] sm:$0xff] }
 0x15e   : > { %3901 = vmatpush1.bf16.msra.mxu1 %v6112_v26  ;;  %v9290_v26 = vld [vmem:[#allocation3_spill] sm:$0xff] }
 0x15f   : > { %5006 = vmatmul.mubr.msk.bf16.gmra.mrb[4].mxu0 %vm1134_vm1, %v5903_v41  ;;  %3902 = vmatprep.subr.bf16.mxu1 %v6119_v31  ;;  %v9292_v31 = vld [vmem:[#allocation4_spill] sm:$0xff] }
 0x160   : > { %5023 = vmatmul.mubr.msk.bf16.gmra.mrb[4].mxu1 %vm1134_vm1, %v5903_v41  ;;  %1634 = vmatprep.mubr.bf16.mxu0 %v9182_v4  ;;  %v9318_v41 = vld [vmem:[#allocation31_spill] sm:$0xff] }
 0x161   : > { %2213 = vmatprep.mubr.bf16.mxu1 %v9182_v4  ;;  %3324 = vmatpush1.bf16.msra.mxu0 %v6125_v35  ;;  %v9293_v35 = vld [vmem:[#allocation6_spill] sm:$0xff] }
 0x162   : > { %3325 = vmatprep.subr.bf16.mxu0 %v6134_v40  ;;  %3903 = vmatpush1.bf16.msra.mxu1 %v6132_v39  ;;  %v9294_v39 = vld [vmem:[#allocation7_spill] sm:$0xff]  ;;  %v9295_v40 = vld [vmem:[#allocation9_spill] sm:$0xff] }
 0x163   : > { %3904 = vmatprep.subr.bf16.mxu1 %v6140_v44  ;;  %v9296_v44 = vld [vmem:[#allocation8_spill] sm:$0xff] }
 0x165   : > { %3326 = vmatpush1.bf16.msra.mxu0 %v6149_v51  ;;  %v5908_v51 = vld [vmem:[%s9101_s1 + $0x380] ss:$20 sps:$4 sm:$0xff]  }
 0x166   : > { %3327 = vmatprep.subr.bf16.mxu0 %v6155_v53  ;;  %3905 = vmatpush1.bf16.msra.mxu1 %v6153_v52  ;;  %v9297_v52 = vld [vmem:[#allocation10_spill] sm:$0xff]  ;;  %v9298_v53 = vld [vmem:[#allocation11_spill] sm:$0xff] }
 0x167   : > { %5007 = vmatmul.mubr.msk.bf16.gmra.mrb[8].mxu0 %vm1134_vm1, %v5904_v9  ;;  %3906 = vmatprep.subr.bf16.mxu1 %v6161_v57  ;;  %v9299_v57 = vld [vmem:[#allocation13_spill] sm:$0xff] }
 0x168   : > { %5024 = vmatmul.mubr.msk.bf16.gmra.mrb[8].mxu1 %vm1134_vm1, %v5904_v9  ;;  %1644 = vmatprep.mubr.bf16.mxu0 %v9182_v4  ;;  %v9319_v9 = vld [vmem:[#allocation32_spill] sm:$0xff] }
 0x169   : > { %2223 = vmatprep.mubr.bf16.mxu1 %v9182_v4  ;;  %3328 = vmatpush1.bf16.msra.mxu0 %v6169_v63  ;;  %v9300_v63 = vld [vmem:[#allocation12_spill] sm:$0xff] }
 0x16a   : > { %3329 = vmatprep.subr.bf16.mxu0 %v6175_v1  ;;  %3907 = vmatpush1.bf16.msra.mxu1 %v6173_v0  ;;  %v9301_v0 = vld [vmem:[#allocation14_spill] sm:$0xff]  ;;  %v9302_v1 = vld [vmem:[#allocation15_spill] sm:$0xff] }
 0x16b   : > { %3908 = vmatprep.subr.bf16.mxu1 %v6181_v6  ;;  %v9303_v6 = vld [vmem:[#allocation17_spill] sm:$0xff] }
 0x16d   : > { %3330 = vmatpush1.bf16.msra.mxu0 %v6189_v15  ;;  %v9304_v15 = vld [vmem:[#allocation16_spill] sm:$0xff] }
 0x16e   : > { %3331 = vmatprep.subr.bf16.mxu0 %v6195_v19  ;;  %3909 = vmatpush1.bf16.msra.mxu1 %v6193_v16  ;;  %v5909_v16 = vld [vmem:[%s9101_s1 + $0x3a8] ss:$20 sps:$4 sm:$0xff]   ;;  %v9305_v19 = vld [vmem:[#allocation18_spill] sm:$0xff] }
 0x16f   : > { %5008 = vmatmul.mubr.msk.bf16.gmra.mrb[12].mxu0 %vm1134_vm1, %v5905_v13  ;;  %3910 = vmatprep.subr.bf16.mxu1 %v6201_v24  ;;  %v9306_v24 = vld [vmem:[#allocation19_spill] sm:$0xff] }
 0x170   : > { %5025 = vmatmul.mubr.msk.bf16.gmra.mrb[12].mxu1 %vm1134_vm1, %v5905_v13  ;;  %1654 = vmatprep.mubr.bf16.mxu0 %v9182_v4  ;;  %v9320_v13 = vld [vmem:[#allocation33_spill] sm:$0xff] }
 0x171   : > { %2233 = vmatprep.mubr.bf16.mxu1 %v9182_v4  ;;  %3332 = vmatpush1.bf16.msra.mxu0 %v6209_v33  ;;  %v9307_v33 = vld [vmem:[#allocation21_spill] sm:$0xff] }
 0x172   : > { %3333 = vmatprep.subr.bf16.mxu0 %v6215_v36  ;;  %3911 = vmatpush1.bf16.msra.mxu1 %v6213_v34  ;;  %v9308_v34 = vld [vmem:[#allocation20_spill] sm:$0xff]  ;;  %v9309_v36 = vld [vmem:[#allocation22_spill] sm:$0xff] }
 0x173   : > { %3912 = vmatprep.subr.bf16.mxu1 %v6221_v42  ;;  %v9310_v42 = vld [vmem:[#allocation23_spill] sm:$0xff] }
 0x175   : > { %3334 = vmatpush1.bf16.msra.mxu0 %v6229_v49  ;;  %v9311_v49 = vld [vmem:[#allocation25_spill] sm:$0xff] }
 0x176   : > { %3335 = vmatprep.subr.bf16.mxu0 %v6235_v54  ;;  %3913 = vmatpush1.bf16.msra.mxu1 %v6233_v50  ;;  %v9312_v50 = vld [vmem:[#allocation24_spill] sm:$0xff] }
 0x177   : > { %5009 = vmatmul.mubr.msk.bf16.gmra.mrb[16].mxu0 %vm1134_vm1, %v5906_v17  ;;  %3914 = vmatprep.subr.bf16.mxu1 %v6241_v59  ;;  %v5910_v54 = vld [vmem:[%s9101_s1 + $0x3d0] ss:$20 sps:$4 sm:$0xff]  }
 0x178   : > { %5026 = vmatmul.mubr.msk.bf16.gmra.mrb[16].mxu1 %vm1134_vm1, %v5906_v17  ;;  %1664 = vmatprep.mubr.bf16.mxu0 %v9182_v4  ;;  %v9313_v59 = vld [vmem:[#allocation26_spill] sm:$0xff]  ;;  %v5923_v17 = vld [vmem:[%s9101_s1 + $0x28] ss:$20 sps:$4 sm:$0xff]  }
 0x179   : > { %2243 = vmatprep.mubr.bf16.mxu1 %v9182_v4  ;;  %3336 = vmatpush1.bf16.msra.mxu0 %v6249_v5  ;;  %v9314_v5 = vld [vmem:[#allocation27_spill] sm:$0xff] }
 0x17a   : > { %3337 = vmatprep.subr.bf16.mxu0 %v6255_v10  ;;  %3915 = vmatpush1.bf16.msra.mxu1 %v6253_v7  ;;  %v9315_v7 = vld [vmem:[#allocation28_spill] sm:$0xff]  ;;  %v9316_v10 = vld [vmem:[#allocation29_spill] sm:$0xff] }
 0x17b   : > { %3916 = vmatprep.subr.bf16.mxu1 %v9289_v22  ;;  %v9322_v22 = vld [vmem:[#allocation35_spill] sm:$0xff] }
 0x17d   : > { %3338 = vmatpush1.bf16.msra.mxu0 %v9290_v26  ;;  %v5924_v26 = vld [vmem:[%s9101_s1 + $0x54] ss:$20 sps:$4 sm:$0xff]  }
 0x17e   : > { %3339 = vmatprep.subr.bf16.mxu0 %v9291_v27  ;;  %3917 = vmatpush1.bf16.msra.mxu1 %v9292_v31  ;;  %v9323_v27 = vld [vmem:[#allocation36_spill] sm:$0xff]  ;;  %v9324_v31 = vld [vmem:[#allocation37_spill] sm:$0xff] }
 0x17f   : > { %5010 = vmatmul.mubr.msk.bf16.gmra.mrb[20].mxu0 %vm1134_vm1, %v5907_v18  ;;  %3918 = vmatprep.subr.bf16.mxu1 %v9293_v35  ;;  %v9325_v35 = vld [vmem:[#allocation38_spill] sm:$0xff] }
 0x180   : > { %5027 = vmatmul.mubr.msk.bf16.gmra.mrb[20].mxu1 %vm1134_vm1, %v5907_v18  ;;  %1674 = vmatprep.mubr.bf16.mxu0 %v9182_v4  ;;  %v9321_v18 = vld [vmem:[#allocation34_spill] sm:$0xff] }
 0x181   : > { %2253 = vmatprep.mubr.bf16.mxu1 %v9182_v4  ;;  %3340 = vmatpush1.bf16.msra.mxu0 %v9294_v39  ;;  %v9326_v39 = vld [vmem:[#allocation39_spill] sm:$0xff] }
 0x182   : > { %3341 = vmatprep.subr.bf16.mxu0 %v9295_v40  ;;  %3919 = vmatpush1.bf16.msra.mxu1 %v9296_v44  ;;  %v9327_v40 = vld [vmem:[#allocation40_spill] sm:$0xff]  ;;  %v9328_v44 = vld [vmem:[#allocation41_spill] sm:$0xff] }
 0x183   : > { %3920 = vmatprep.subr.bf16.mxu1 %v9297_v52  ;;  %v9329_v52 = vld [vmem:[#allocation42_spill] sm:$0xff] }
 0x185   : > { %3342 = vmatpush1.bf16.msra.mxu0 %v9298_v53  ;;  %v5927_v53 = vld [vmem:[%s9101_s1 + $0x7c] ss:$20 sps:$4 sm:$0xff]  }
 0x186   : > { %3343 = vmatprep.subr.bf16.mxu0 %v9299_v57  ;;  %3921 = vmatpush1.bf16.msra.mxu1 %v9300_v63  ;;  %v9330_v57 = vld [vmem:[#allocation43_spill] sm:$0xff]  ;;  %v9331_v63 = vld [vmem:[#allocation44_spill] sm:$0xff] }
 0x187   : > { %5011 = vmatmul.mubr.msk.bf16.gmra.mrb[24].mxu0 %vm1134_vm1, %v5908_v51  ;;  %3922 = vmatprep.subr.bf16.mxu1 %v9301_v0  ;;  %v9332_v0 = vld [vmem:[#allocation45_spill] sm:$0xff] }
 0x188   : > { %5028 = vmatmul.mubr.msk.bf16.gmra.mrb[24].mxu1 %vm1134_vm1, %v5908_v51  ;;  %1684 = vmatprep.mubr.bf16.mxu0 %v9182_v4  ;;  %v5926_v51 = vld [vmem:[%s9101_s1 + $0x50] ss:$20 sps:$4 sm:$0xff]  }
 0x189   : > { %2263 = vmatprep.mubr.bf16.mxu1 %v9182_v4  ;;  %3344 = vmatpush1.bf16.msra.mxu0 %v9302_v1  ;;  %v9333_v1 = vld [vmem:[#allocation46_spill] sm:$0xff] }
 0x18a   : > { %3345 = vmatprep.subr.bf16.mxu0 %v9303_v6  ;;  %3923 = vmatpush1.bf16.msra.mxu1 %v9304_v15  ;;  %v9334_v6 = vld [vmem:[#allocation47_spill] sm:$0xff]  ;;  %v9335_v15 = vld [vmem:[#allocation48_spill] sm:$0xff] }
 0x18b   : > { %3924 = vmatprep.subr.bf16.mxu1 %v9305_v19  ;;  %v5929_v19 = vld [vmem:[%s9101_s1 + $0x78] ss:$20 sps:$4 sm:$0xff]  }
 0x18d   : > { %3346 = vmatpush1.bf16.msra.mxu0 %v9306_v24  ;;  %v9337_v24 = vld [vmem:[#allocation50_spill] sm:$0xff] }
 0x18e   : > { %3347 = vmatprep.subr.bf16.mxu0 %v9307_v33  ;;  %3925 = vmatpush1.bf16.msra.mxu1 %v9308_v34  ;;  %v5930_v33 = vld [vmem:[%s9101_s1 + $0xa4] ss:$20 sps:$4 sm:$0xff]   ;;  %v9338_v34 = vld [vmem:[#allocation51_spill] sm:$0xff] }
 0x18f   : > { %5012 = vmatmul.mubr.msk.bf16.gmra.mrb[28].mxu0 %vm1134_vm1, %v5909_v16  ;;  %3926 = vmatprep.subr.bf16.mxu1 %v9309_v36  ;;  %v9339_v36 = vld [vmem:[#allocation52_spill] sm:$0xff] }
 0x190   : > { %5029 = vmatmul.mubr.msk.bf16.gmra.mrb[28].mxu1 %vm1134_vm1, %v5909_v16  ;;  %1694 = vmatprep.mubr.bf16.mxu0 %v9182_v4  ;;  %v9336_v16 = vld [vmem:[#allocation49_spill] sm:$0xff] }
 0x191   : > { %2273 = vmatprep.mubr.bf16.mxu1 %v9182_v4  ;;  %3348 = vmatpush1.bf16.msra.mxu0 %v9310_v42  ;;  %v9340_v42 = vld [vmem:[#allocation53_spill] sm:$0xff] }
 0x192   : > { %3349 = vmatprep.subr.bf16.mxu0 %v9311_v49  ;;  %3927 = vmatpush1.bf16.msra.mxu1 %v9312_v50  ;;  %v9341_v49 = vld [vmem:[#allocation54_spill] sm:$0xff]  ;;  %v9342_v50 = vld [vmem:[#allocation55_spill] sm:$0xff] }
 0x193   : > { %3928 = vmatprep.subr.bf16.mxu1 %v9313_v59  ;;  %v9344_v59 = vld [vmem:[#allocation57_spill] sm:$0xff] }
 0x195   : > { %3350 = vmatpush1.bf16.msra.mxu0 %v9314_v5  ;;  %v5932_v5 = vld [vmem:[%s9101_s1 + $0xa0] ss:$20 sps:$4 sm:$0xff]  }
 0x196   : > { %3929 = vmatpush1.bf16.msra.mxu1 %v9315_v7  ;;  %3512 = vmatprep.subr.bf16.mxu0 %v9316_v10  ;;  %v9345_v7 = vld [vmem:[#allocation58_spill] sm:$0xff] }
 0x197   : > { %5013 = vmatmul.mubr.msk.bf16.gmra.mrb[32].mxu0 %vm1134_vm1, %v5910_v54  ;;  %4091 = vmatprep.subr.bf16.mxu1 %v9317_v20  ;;  %v5933_v10 = vld [vmem:[%s9101_s1 + $0xcc] ss:$20 sps:$4 sm:$0xff]  }
 0x198   : > { %5030 = vmatmul.mubr.msk.bf16.gmra.mrb[32].mxu1 %vm1134_vm1, %v5910_v54  ;;  %1704 = vmatprep.mubr.bf16.mxu0 %v9182_v4  ;;  %v9343_v54 = vld [vmem:[#allocation56_spill] sm:$0xff]  ;;  %v9346_v20 = vld [vmem:[#allocation59_spill] sm:$0xff] }
 0x199   : > { %2283 = vmatprep.mubr.bf16.mxu1 %v9182_v4 }
 0x19f   : > { %5014 = vmatmul.mubr.msk.bf16.gmra.mrb[36].mxu0 %vm1134_vm1, %v5911_v3 }
 0x1a0   : > { %5031 = vmatmul.mubr.msk.bf16.gmra.mrb[36].mxu1 %vm1134_vm1, %v5911_v3  ;;  %1714 = vmatprep.mubr.bf16.mxu0 %v9182_v4  ;;  %v9347_v3 = vld [vmem:[#allocation60_spill] sm:$0xff] }
 0x1a1   : > { %2293 = vmatprep.mubr.bf16.mxu1 %v9182_v4 }
 0x1a7   : > { %5015 = vmatmul.mubr.msk.bf16.gmra.mrb[40].mxu0 %vm1134_vm1, %v5912_v55 }
 0x1a8   : > { %5032 = vmatmul.mubr.msk.bf16.gmra.mrb[40].mxu1 %vm1134_vm1, %v5912_v55  ;;  %1724 = vmatprep.mubr.bf16.mxu0 %v9182_v4  ;;  %v9348_v55 = vld [vmem:[#allocation61_spill] sm:$0xff] }
 0x1a9   : > { %2303 = vmatprep.mubr.bf16.mxu1 %v9182_v4 }
 0x1af   : > { %5016 = vmatmul.mubr.msk.bf16.gmra.mrb[44].mxu0 %vm1134_vm1, %v5913_v61 }
 0x1b0   : > { %5033 = vmatmul.mubr.msk.bf16.gmra.mrb[44].mxu1 %vm1134_vm1, %v5913_v61  ;;  %1734 = vmatprep.mubr.bf16.mxu0 %v9182_v4  ;;  %v9349_v61 = vld [vmem:[#allocation62_spill] sm:$0xff] }
 0x1b1   : > { %2313 = vmatprep.mubr.bf16.mxu1 %v9182_v4 }
 0x1b7   : > { %5017 = vmatmul.mubr.msk.bf16.gmra.mrb[48].mxu0 %vm1134_vm1, %v5914_v45 }
 0x1b8   : > { %5034 = vmatmul.mubr.msk.bf16.gmra.mrb[48].mxu1 %vm1134_vm1, %v5914_v45  ;;  %1744 = vmatprep.mubr.bf16.mxu0 %v9182_v4  ;;  %v9350_v45 = vld [vmem:[#allocation63_spill] sm:$0xff] }
 0x1b9   : > { %2323 = vmatprep.mubr.bf16.mxu1 %v9182_v4 }
 0x1bf   : > { %5018 = vmatmul.mubr.msk.bf16.gmra.mrb[52].mxu0 %vm1134_vm1, %v5915_v14 }
 0x1c0   : > { %5035 = vmatmul.mubr.msk.bf16.gmra.mrb[52].mxu1 %vm1134_vm1, %v5915_v14  ;;  %1754 = vmatprep.mubr.bf16.mxu0 %v9182_v4  ;;  %v9351_v14 = vld [vmem:[#allocation64_spill] sm:$0xff] }
 0x1c1   : > { %2333 = vmatprep.mubr.bf16.mxu1 %v9182_v4 }
 0x1c7   : > { %5019 = vmatmul.mubr.msk.bf16.gmra.mrb[56].mxu0 %vm1134_vm1, %v5916_v47 }
 0x1c8   : > { %5036 = vmatmul.mubr.msk.bf16.gmra.mrb[56].mxu1 %vm1134_vm1, %v5916_v47  ;;  %1764 = vmatprep.mubr.bf16.mxu0 %v9182_v4  ;;  %v9352_v47 = vld [vmem:[#allocation65_spill] sm:$0xff] }
 0x1c9   : > { %2343 = vmatprep.mubr.bf16.mxu1 %v9182_v4 }
 0x1cf   : > { %5020 = vmatmul.mubr.msk.bf16.gmra.mrb[60].mxu0 %vm1134_vm1, %v5917_v60 }
 0x1d0   : > { %5037 = vmatmul.mubr.msk.bf16.gmra.mrb[60].mxu1 %vm1134_vm1, %v5917_v60  ;;  %3351 = vmatprep.mubr.bf16.mxu0 %v5920_v25  ;;  %v5935_v60 = vld [vmem:[%s9101_s1 + $0xc8] ss:$20 sps:$4 sm:$0xff]  }
 0x1d1   : > { %3930 = vmatprep.mubr.bf16.mxu1 %v5920_v25  ;;  %v9353_v25 = vld [vmem:[#allocation66_spill] sm:$0xff] }
 0x1d7   : > { %3352 = vmatmul.mubr.bf16.vlgmr.msra.gmra.mrb[64].mxu0 %v5918_v2 }
 0x1d8   : > { %3931 = vmatmul.mubr.bf16.vlgmr.msra.gmra.mrb[64].mxu1 %v5918_v2  ;;  %3513 = vmatpush1.bf16.msra.mxu0 %v9318_v41  ;;  %v5936_v2 = vld [vmem:[%s9101_s1 + $0xf4] ss:$20 sps:$4 sm:$0xff]  }
 0x1d9   : > { %3361 = vmatprep.mubr.bf16.mxu0 %v5921_v8  ;;  %3940 = vmatprep.mubr.bf16.mxu1 %v5921_v8  ;;  %v9354_v8 = vld [vmem:[#allocation67_spill] sm:$0xff]  ;;  %v9355_v41 = vld [vmem:[#allocation68_spill] sm:$0xff] }
 0x1da   : > { %3514 = vmatprep.subr.bf16.mxu0 %v9319_v9  ;;  %4092 = vmatpush1.bf16.msra.mxu1 %v9320_v13  ;;  %v9356_v9 = vld [vmem:[#allocation69_spill] sm:$0xff]  ;;  %v9357_v13 = vld [vmem:[#allocation70_spill] sm:$0xff] }
 0x1db   : > { %4093 = vmatprep.subr.bf16.mxu1 %v9321_v18  ;;  %v9359_v18 = vld [vmem:[#allocation72_spill] sm:$0xff] }
 0x1dc   : > { %3515 = vmatpush1.bf16.msra.mxu0 %v9322_v22  ;;  %v9360_v22 = vld [vmem:[#allocation73_spill] sm:$0xff] }
 0x1dd   : > { %3516 = vmatprep.subr.bf16.mxu0 %v9323_v27  ;;  %v9361_v27 = vld [vmem:[#allocation74_spill] sm:$0xff] }
 0x1de   : > { %4094 = vmatpush1.bf16.msra.mxu1 %v9324_v31  ;;  %v5939_v31 = vld [vmem:[%s9101_s1 + $0x11c] ss:$20 sps:$4 sm:$0xff]  }
 0x1df   : > { %3362 = vmatmul.mubr.bf16.gmra.mrb[68].mxu0 %v5923_v17  ;;  %4095 = vmatprep.subr.bf16.mxu1 %v9325_v35  ;;  %v9362_v35 = vld [vmem:[#allocation75_spill] sm:$0xff] }
 0x1e0   : > { %3941 = vmatmul.mubr.bf16.gmra.mrb[68].mxu1 %v5923_v17  ;;  %3371 = vmatprep.mubr.bf16.mxu0 %v5924_v26  ;;  %v9358_v17 = vld [vmem:[#allocation71_spill] sm:$0xff] }
 0x1e1   : > { %3950 = vmatprep.mubr.bf16.mxu1 %v5924_v26  ;;  %3517 = vmatpush1.bf16.msra.mxu0 %v9326_v39  ;;  %v5938_v26 = vld [vmem:[%s9101_s1 + $0xf0] ss:$20 sps:$4 sm:$0xff]  }
 0x1e2   : > { %3518 = vmatprep.subr.bf16.mxu0 %v9327_v40  ;;  %4096 = vmatpush1.bf16.msra.mxu1 %v9328_v44  ;;  %v9363_v39 = vld [vmem:[#allocation76_spill] sm:$0xff]  ;;  %v9364_v40 = vld [vmem:[#allocation77_spill] sm:$0xff]  ;;  %v9365_v44 = vld [vmem:[#allocation78_spill] sm:$0xff] }
 0x1e3   : > { %4097 = vmatprep.subr.bf16.mxu1 %v9329_v52  ;;  %v9367_v52 = vld [vmem:[#allocation80_spill] sm:$0xff] }
 0x1e5   : > { %3519 = vmatpush1.bf16.msra.mxu0 %v9330_v57  ;;  %v5942_v57 = vld [vmem:[%s9101_s1 + $0x144] ss:$20 sps:$4 sm:$0xff]  }
 0x1e6   : > { %3520 = vmatprep.subr.bf16.mxu0 %v9331_v63  ;;  %4098 = vmatpush1.bf16.msra.mxu1 %v9332_v0 }
 0x1e7   : > { %3372 = vmatmul.mubr.bf16.gmra.mrb[72].mxu0 %v5926_v51  ;;  %4099 = vmatprep.subr.bf16.mxu1 %v9333_v1 }
 0x1e8   : > { %3951 = vmatmul.mubr.bf16.gmra.mrb[72].mxu1 %v5926_v51  ;;  %3381 = vmatprep.mubr.bf16.mxu0 %v5927_v53  ;;  %v9366_v51 = vld [vmem:[#allocation79_spill] sm:$0xff] }
 0x1e9   : > { %3960 = vmatprep.mubr.bf16.mxu1 %v5927_v53  ;;  %3521 = vmatpush1.bf16.msra.mxu0 %v9334_v6  ;;  %v5941_v53 = vld [vmem:[%s9101_s1 + $0x118] ss:$20 sps:$4 sm:$0xff]  }
 0x1ea   : > { %3522 = vmatprep.subr.bf16.mxu0 %v9335_v15  ;;  %4100 = vmatpush1.bf16.msra.mxu1 %v9336_v16  ;;  %v5956_v16 = vld [vmem:[%s9101_s1 + $0x1e0] ss:$20 sps:$4 sm:$0xff]  }
 0x1eb   : > { %4101 = vmatprep.subr.bf16.mxu1 %v9337_v24 }
 0x1ed   : > { %3523 = vmatpush1.bf16.msra.mxu0 %v9338_v34 }
 0x1ee   : > { %3524 = vmatprep.subr.bf16.mxu0 %v9339_v36  ;;  %4102 = vmatpush1.bf16.msra.mxu1 %v9340_v42 }
 0x1ef   : > { %3382 = vmatmul.mubr.bf16.gmra.mrb[76].mxu0 %v5929_v19  ;;  %4103 = vmatprep.subr.bf16.mxu1 %v9341_v49 }
 0x1f0   : > { %3961 = vmatmul.mubr.bf16.gmra.mrb[76].mxu1 %v5929_v19  ;;  %3391 = vmatprep.mubr.bf16.mxu0 %v5930_v33 }
 0x1f1   : > { %3970 = vmatprep.mubr.bf16.mxu1 %v5930_v33  ;;  %3525 = vmatpush1.bf16.msra.mxu0 %v9342_v50  ;;  %v5957_v33 = vld [vmem:[%s9101_s1 + $0x20c] ss:$20 sps:$4 sm:$0xff]  }
 0x1f2   : > { %3526 = vmatprep.subr.bf16.mxu0 %v9343_v54  ;;  %4104 = vmatpush1.bf16.msra.mxu1 %v9344_v59  ;;  %v5959_v59 = vld [vmem:[%s9101_s1 + $0x208] ss:$20 sps:$4 sm:$0xff]  }
 0x1f3   : > { %4105 = vmatprep.subr.bf16.mxu1 %v9345_v7 }
 0x1f5   : > { %3527 = vmatpush1.bf16.msra.mxu0 %v9346_v20 }
 0x1f6   : > { %3528 = vmatprep.subr.bf16.mxu0 %v9347_v3  ;;  %4106 = vmatpush1.bf16.msra.mxu1 %v9348_v55 }
 0x1f7   : > { %3392 = vmatmul.mubr.bf16.gmra.mrb[80].mxu0 %v5932_v5  ;;  %4107 = vmatprep.subr.bf16.mxu1 %v9349_v61 }
 0x1f8   : > { %3971 = vmatmul.mubr.bf16.gmra.mrb[80].mxu1 %v5932_v5  ;;  %3401 = vmatprep.mubr.bf16.mxu0 %v5933_v10 }
 0x1f9   : > { %3980 = vmatprep.mubr.bf16.mxu1 %v5933_v10  ;;  %3529 = vmatpush1.bf16.msra.mxu0 %v9350_v45  ;;  %v5960_v10 = vld [vmem:[%s9101_s1 + $0x234] ss:$20 sps:$4 sm:$0xff]  }
 0x1fa   : > { %3530 = vmatprep.subr.bf16.mxu0 %v9351_v14  ;;  %4108 = vmatpush1.bf16.msra.mxu1 %v9352_v47  ;;  %v5962_v47 = vld [vmem:[%s9101_s1 + $0x230] ss:$20 sps:$4 sm:$0xff]  }
 0x1fb   : > { %4109 = vmatprep.subr.bf16.mxu1 %v9353_v25 }
 0x1fd   : > { %3531 = vmatpush1.bf16.msra.mxu0 %v9354_v8 }
 0x1fe   : > { %3532 = vmatprep.subr.bf16.mxu0 %v9355_v41  ;;  %4110 = vmatpush1.bf16.msra.mxu1 %v9356_v9 }
 0x1ff   : > { %3402 = vmatmul.mubr.bf16.gmra.mrb[84].mxu0 %v5935_v60  ;;  %4111 = vmatprep.subr.bf16.mxu1 %v9357_v13 }
 0x200   : > { %3981 = vmatmul.mubr.bf16.gmra.mrb[84].mxu1 %v5935_v60  ;;  %3411 = vmatprep.mubr.bf16.mxu0 %v5936_v2 }
 0x201   : > { %3990 = vmatprep.mubr.bf16.mxu1 %v5936_v2  ;;  %3533 = vmatpush1.bf16.msra.mxu0 %v9358_v17  ;;  %v5963_v2 = vld [vmem:[%s9101_s1 + $0x25c] ss:$20 sps:$4 sm:$0xff]  }
 0x202   : > { %3534 = vmatprep.subr.bf16.mxu0 %v9359_v18  ;;  %4112 = vmatpush1.bf16.msra.mxu1 %v9360_v22  ;;  %v5965_v22 = vld [vmem:[%s9101_s1 + $0x258] ss:$20 sps:$4 sm:$0xff]  }
 0x203   : > { %4113 = vmatprep.subr.bf16.mxu1 %v9361_v27 }
 0x205   : > { %3535 = vmatpush1.bf16.msra.mxu0 %v9362_v35 }
 0x206   : > { %3536 = vmatprep.subr.bf16.mxu0 %v9363_v39  ;;  %4114 = vmatpush1.bf16.msra.mxu1 %v9364_v40 }
 0x207   : > { %3412 = vmatmul.mubr.bf16.gmra.mrb[88].mxu0 %v5938_v26  ;;  %4115 = vmatprep.subr.bf16.mxu1 %v9365_v44 }
 0x208   : > { %3991 = vmatmul.mubr.bf16.gmra.mrb[88].mxu1 %v5938_v26  ;;  %3421 = vmatprep.mubr.bf16.mxu0 %v5939_v31 }
 0x209   : > { %4000 = vmatprep.mubr.bf16.mxu1 %v5939_v31  ;;  %3537 = vmatpush1.bf16.msra.mxu0 %v9366_v51  ;;  %v5968_v31 = vld [vmem:[%s9101_s1 + $0xc] ss:$20 sps:$4 sm:$0xff]  }
 0x20a   : > { %3538 = vmatprep.subr.bf16.mxu0 %v9367_v52  ;;  %4116 = vmatpush1.bf16.msra.mxu1 %v6703_v21  ;;  %v5944_v21 = vld [vmem:[%s9101_s1 + $0x140] ss:$20 sps:$4 sm:$0xff]  }
 0x20b   : > { %4117 = vmatprep.subr.bf16.mxu1 %v6707_v46  ;;  %v5951_v46 = vld [vmem:[%s9101_s1 + $0x1bc] ss:$20 sps:$4 sm:$0xff]  }
 0x20d   : > { %3539 = vmatpush1.bf16.msra.mxu0 %v6716_v29 }
 0x20e   : > { %3540 = vmatprep.subr.bf16.mxu0 %v6726_v32  ;;  %4118 = vmatpush1.bf16.msra.mxu1 %v6729_v30  ;;  %v5945_v30 = vld [vmem:[%s9101_s1 + $0x16c] ss:$20 sps:$4 sm:$0xff]   ;;  %v5950_v32 = vld [vmem:[%s9101_s1 + $0x190] ss:$20 sps:$4 sm:$0xff]  }
 0x20f   : > { %3422 = vmatmul.mubr.bf16.gmra.mrb[92].mxu0 %v5941_v53  ;;  %4119 = vmatprep.subr.bf16.mxu1 %v6734_v38  ;;  %v5947_v38 = vld [vmem:[%s9101_s1 + $0x168] ss:$20 sps:$4 sm:$0xff]  }
 0x210   : > { %4001 = vmatmul.mubr.bf16.gmra.mrb[92].mxu1 %v5941_v53  ;;  %3431 = vmatprep.mubr.bf16.mxu0 %v5942_v57  ;;  %v5966_v53 = vld [vmem:[%s9101_s1 + $0x8] ss:$20 sps:$4 sm:$0xff]  }
 0x211   : > { %4010 = vmatprep.mubr.bf16.mxu1 %v5942_v57  ;;  %3541 = vmatpush1.bf16.msra.mxu0 %v6739_v48  ;;  %v5948_v48 = vld [vmem:[%s9101_s1 + $0x194] ss:$20 sps:$4 sm:$0xff]  }
 0x212   : > { %3542 = vmatprep.subr.bf16.mxu0 %v6746_v12  ;;  %4120 = vmatpush1.bf16.msra.mxu1 %v6748_v56 }
 0x213   : > { %4121 = vmatprep.subr.bf16.mxu1 %v6751_v28  ;;  %v5953_v28 = vld [vmem:[%s9101_s1 + $0x1b8] ss:$20 sps:$4 sm:$0xff]  }
 0x215   : > { %3543 = vmatpush1.bf16.msra.mxu0 %v6757_v62 }
 0x216   : > { %4122 = vmatpush1.bf16.msra.mxu1 %v6764_v37  ;;  %5118 = vmatprep.subr.msk.bf16.mxu0 %vm1183_vm0, %v6766_v43  ;;  %v5954_v43 = vld [vmem:[%s9101_s1 + $0x1e4] ss:$20 sps:$4 sm:$0xff]  }
 0x217   : > { %3432 = vmatmul.mubr.bf16.gmra.mrb[96].mxu0 %v5944_v21  ;;  %5135 = vmatprep.subr.msk.bf16.mxu1 %vm1183_vm0, %v6777_v58 }
 0x218   : > { %4011 = vmatmul.mubr.bf16.gmra.mrb[96].mxu1 %v5944_v21  ;;  %3441 = vmatprep.mubr.bf16.mxu0 %v5945_v30 }
 0x219   : > { %4020 = vmatprep.mubr.bf16.mxu1 %v5945_v30 }
 0x21f   : > { %3442 = vmatmul.mubr.bf16.gmra.mrb[100].mxu0 %v5947_v38 }
 0x220   : > { %4021 = vmatmul.mubr.bf16.gmra.mrb[100].mxu1 %v5947_v38  ;;  %3451 = vmatprep.mubr.bf16.mxu0 %v5948_v48 }
 0x221   : > { %4030 = vmatprep.mubr.bf16.mxu1 %v5948_v48  ;;  %v5969_v48 = vld [vmem:[%s9101_s1 + $0x34] ss:$20 sps:$4 sm:$0xff]  }
 0x227   : > { %3452 = vmatmul.mubr.bf16.gmra.mrb[104].mxu0 %v5950_v32 }
 0x228   : > { %4031 = vmatmul.mubr.bf16.gmra.mrb[104].mxu1 %v5950_v32  ;;  %3461 = vmatprep.mubr.bf16.mxu0 %v5951_v46 }
 0x229   : > { %4040 = vmatprep.mubr.bf16.mxu1 %v5951_v46 }
 0x22a   : > { %v1616_v29 = vpop.f32.mrb[0].mxu0 }
 0x22b   : > { %v2195_v12 = vpop.f32.mrb[0].mxu1  ;;  %2358 = vrot.lane.b32.xlu0 %v1616_v29, %s6039_s14  ;;  %v1618_v56 = vpop.f32.mrb[1].mxu0 }
 0x22c   : > { %v2197_v62 = vpop.f32.mrb[1].mxu1  ;;  %v1620_v37 = vpop.f32.mrb[2].mxu0 }
 0x22d   : > { %v2199_v58 = vpop.f32.mrb[2].mxu1  ;;  %v1622_v63 = vpop.f32.mrb[3].mxu0 }
 0x22e   : > { %2488 = vrot.lane.b32.xlu1 %v2199_v58, %s6039_s14  ;;  %v2201_v0 = vpop.f32.mrb[3].mxu1 }
 0x22f   : > { %3462 = vmatmul.mubr.bf16.gmra.mrb[108].mxu0 %v5953_v28  ;;  %2486 = vrot.lane.b32.xlu0 %v2195_v12, %s6039_s14 }
 0x230   : > { %4041 = vmatmul.mubr.bf16.gmra.mrb[108].mxu1 %v5953_v28  ;;  %3471 = vmatprep.mubr.bf16.mxu0 %v5954_v43 }
 0x231   : > { %4050 = vmatprep.mubr.bf16.mxu1 %v5954_v43 }
 0x232   : > { %2424 = vrot.lane.b32.xlu1 %v1622_v63, %s6039_s14  ;;  %v1626_v1 = vpop.f32.mrb[4].mxu0 }
 0x233   : > { %v2205_v6 = vpop.f32.mrb[4].mxu1  ;;  %2422 = vrot.lane.b32.xlu0 %v1618_v56, %s6039_s14  ;;  %v1628_v15 = vpop.f32.mrb[5].mxu0  ;;  %v5971_v56 = vld [vmem:[%s9101_s1 + $0x30] ss:$20 sps:$4 sm:$0xff]  }
 0x234   : > { %v2207_v19 = vpop.f32.mrb[5].mxu1  ;;  %v1630_v24 = vpop.f32.mrb[6].mxu0 }
 0x235   : > { %v2209_v34 = vpop.f32.mrb[6].mxu1  ;;  %v1632_v36 = vpop.f32.mrb[7].mxu0 }
 0x236   : > { %v2211_v42 = vpop.f32.mrb[7].mxu1  ;;  %2552 = vrot.lane.b32.xlu1 %v2201_v0, %s6039_s14 }
 0x237   : > { %3472 = vmatmul.mubr.bf16.gmra.mrb[112].mxu0 %v5956_v16  ;;  %2550 = vrot.lane.b32.xlu0 %v2197_v62, %s6039_s14  ;;  %v5972_v62 = vld [vmem:[%s9101_s1 + $0x5c] ss:$20 sps:$4 sm:$0xff]  }
 0x238   : > { %4051 = vmatmul.mubr.bf16.gmra.mrb[112].mxu1 %v5956_v16  ;;  %3481 = vmatprep.mubr.bf16.mxu0 %v5957_v33  ;;  %v5975_v16 = vld [vmem:[%s9101_s1 + $0x84] ss:$20 sps:$4 sm:$0xff]  }
 0x239   : > { %4060 = vmatprep.mubr.bf16.mxu1 %v5957_v33 }
 0x23a   : > { %2362 = vrot.lane.b32.xlu1 %v1626_v1, %s6039_s14  ;;  %v1636_v49 = vpop.f32.mrb[8].mxu0  ;;  %v5974_v1 = vld [vmem:[%s9101_s1 + $0x58] ss:$20 sps:$4 sm:$0xff]  }
 0x23b   : > { %v2215_v50 = vpop.f32.mrb[8].mxu1  ;;  %2360 = vrot.lane.b32.xlu0 %v1620_v37, %s6039_s14  ;;  %v1638_v54 = vpop.f32.mrb[9].mxu0 }
 0x23c   : > { %v2217_v5 = vpop.f32.mrb[9].mxu1  ;;  %v1640_v7 = vpop.f32.mrb[10].mxu0 }
 0x23d   : > { %v2219_v20 = vpop.f32.mrb[10].mxu1  ;;  %v1642_v3 = vpop.f32.mrb[11].mxu0 }
 0x23e   : > { %v2221_v55 = vpop.f32.mrb[11].mxu1  ;;  %2364 = vrot.lane.b32.xlu1 %v1630_v24, %s6039_s14 }
 0x23f   : > { %3482 = vmatmul.mubr.bf16.gmra.mrb[116].mxu0 %v5959_v59  ;;  %2490 = vrot.lane.b32.xlu0 %v2205_v6, %s6039_s14 }
 0x240   : > { %4061 = vmatmul.mubr.bf16.gmra.mrb[116].mxu1 %v5959_v59  ;;  %3491 = vmatprep.mubr.bf16.mxu0 %v5960_v10  ;;  %v5978_v59 = vld [vmem:[%s9101_s1 + $0xac] ss:$20 sps:$4 sm:$0xff]  }
 0x241   : > { %4070 = vmatprep.mubr.bf16.mxu1 %v5960_v10 }
 0x242   : > { %2492 = vrot.lane.b32.xlu1 %v2209_v34, %s6039_s14  ;;  %v1646_v61 = vpop.f32.mrb[12].mxu0 }
 0x243   : > { %v7266_v45 = vpop.f32.mrb[12].mxu1  ;;  %2426 = vrot.lane.b32.xlu0 %v1628_v15, %s6039_s14  ;;  %v7269_v14 = vpop.f32.mrb[13].mxu0 }
 0x244   : > { %v7274_v60 = vpop.f32.mrb[13].mxu1  ;;  %v1650_v25 = vpop.f32.mrb[14].mxu0 }
 0x245   : > { %v7279_v8 = vpop.f32.mrb[14].mxu1  ;;  %v7281_v41 = vpop.f32.mrb[15].mxu0 }
 0x246   : > { %v7283_v9 = vpop.f32.mrb[15].mxu1  ;;  %2428 = vrot.lane.b32.xlu1 %v1632_v36, %s6039_s14 }
 0x247   : > { %3492 = vmatmul.mubr.bf16.gmra.mrb[120].mxu0 %v5962_v47  ;;  %2554 = vrot.lane.b32.xlu0 %v2207_v19, %s6039_s14 }
 0x248   : > { %4071 = vmatmul.mubr.bf16.gmra.mrb[120].mxu1 %v5962_v47  ;;  %3501 = vmatprep.mubr.bf16.mxu0 %v5963_v2  ;;  %v5981_v47 = vld [vmem:[%s9101_s1 + $0xd4] ss:$20 sps:$4 sm:$0xff]  }
 0x249   : > { %4080 = vmatprep.mubr.bf16.mxu1 %v5963_v2 }
 0x24a   : > { %2556 = vrot.lane.b32.xlu1 %v2211_v42, %s6039_s14  ;;  %v7288_v13 = vpop.f32.mrb[16].mxu0 }
 0x24b   : > { %v7290_v17 = vpop.f32.mrb[16].mxu1  ;;  %2366 = vrot.lane.b32.xlu0 %v1636_v49, %s6039_s14  ;;  %v7293_v18 = vpop.f32.mrb[17].mxu0  ;;  %v5977_v49 = vld [vmem:[%s9101_s1 + $0x80] ss:$20 sps:$4 sm:$0xff]  }
 0x24c   : > { %v7298_v26 = vpop.f32.mrb[17].mxu1  ;;  %v7300_v27 = vpop.f32.mrb[18].mxu0 }
 0x24d   : > { %v7305_v35 = vpop.f32.mrb[18].mxu1  ;;  %v7307_v39 = vpop.f32.mrb[19].mxu0 }
 0x24e   : > { %v7309_v40 = vpop.f32.mrb[19].mxu1  ;;  %2368 = vrot.lane.b32.xlu1 %v1640_v7, %s6039_s14 }
 0x24f   : > { %3502 = vmatmul.mubr.bf16.gmra.mrb[124].mxu0 %v5965_v22  ;;  %2494 = vrot.lane.b32.xlu0 %v2215_v50, %s6039_s14 }
 0x250   : > { %4081 = vmatmul.mubr.bf16.gmra.mrb[124].mxu1 %v5965_v22  ;;  %3544 = vmatprep.mubr.bf16.mxu0 %v5968_v31  ;;  %v5984_v22 = vld [vmem:[%s9101_s1 + $0xfc] ss:$20 sps:$4 sm:$0xff]  }
 0x251   : > { %4123 = vmatprep.mubr.bf16.mxu1 %v5968_v31 }
 0x252   : > { %2496 = vrot.lane.b32.xlu1 %v2219_v20, %s6039_s14  ;;  %v7314_v44 = vpop.f32.mrb[20].mxu0 }
 0x253   : > { %v7316_v51 = vpop.f32.mrb[20].mxu1  ;;  %2430 = vrot.lane.b32.xlu0 %v1638_v54, %s6039_s14  ;;  %v7319_v52 = vpop.f32.mrb[21].mxu0 }
 0x254   : > { %v7324_v57 = vpop.f32.mrb[21].mxu1  ;;  %v7326_v21 = vpop.f32.mrb[22].mxu0 }
 0x255   : > { %v7328_v30 = vpop.f32.mrb[22].mxu1  ;;  %v7330_v38 = vpop.f32.mrb[23].mxu0 }
 0x256   : > { %v7335_v32 = vpop.f32.mrb[23].mxu1  ;;  %2432 = vrot.lane.b32.xlu1 %v1642_v3, %s6039_s14 }
 0x257   : > { %3545 = vmatmul.mubr.bf16.vlgmr.msra.gmra.mrb[64].mxu0 %v5966_v53  ;;  %2558 = vrot.lane.b32.xlu0 %v2217_v5, %s6039_s14 }
 0x258   : > { %4124 = vmatmul.mubr.bf16.vlgmr.msra.gmra.mrb[64].mxu1 %v5966_v53  ;;  %3706 = vmatpush1.bf16.msra.mxu0 %v6826_v23 }
 0x259   : > { %3554 = vmatprep.mubr.bf16.mxu0 %v5969_v48  ;;  %4133 = vmatprep.mubr.bf16.mxu1 %v5969_v48 }
 0x25a   : > { %2560 = vrot.lane.b32.xlu1 %v2221_v55, %s6039_s14  ;;  %v7341_v46 = vpop.f32.mrb[24].mxu0  ;;  %4285 = vmatpush1.bf16.msra.mxu1 %v6832_v11 }
 0x25b   : > { %v7344_v29 = vpop.f32.mrb[24].mxu1  ;;  %2370 = vrot.lane.b32.xlu0 %v1646_v61, %s6039_s14  ;;  %v7347_v12 = vpop.f32.mrb[25].mxu0  ;;  %v5980_v61 = vld [vmem:[%s9101_s1 + $0xa8] ss:$20 sps:$4 sm:$0xff]  }
 0x25c   : > { %v7352_v28 = vpop.f32.mrb[25].mxu1  ;;  %v7354_v23 = vpop.f32.mrb[26].mxu0 }
 0x25d   : > { %v7359_v37 = vpop.f32.mrb[26].mxu1  ;;  %v7361_v11 = vpop.f32.mrb[27].mxu0 }
 0x25e   : > { %v7363_v43 = vpop.f32.mrb[27].mxu1  ;;  %2372 = vrot.lane.b32.xlu1 %v1650_v25, %s6039_s14 }
 0x25f   : > { %3555 = vmatmul.mubr.bf16.gmra.mrb[68].mxu0 %v5971_v56  ;;  %2498 = vrot.lane.b32.xlu0 %v7266_v45, %s6039_s14 }
 0x260   : > { %4134 = vmatmul.mubr.bf16.gmra.mrb[68].mxu1 %v5971_v56  ;;  %3564 = vmatprep.mubr.bf16.mxu0 %v5972_v62 }
 0x261   : > { %4143 = vmatprep.mubr.bf16.mxu1 %v5972_v62 }
 0x262   : > { %2500 = vrot.lane.b32.xlu1 %v7279_v8, %s6039_s14  ;;  %v7370_v58 = vpop.f32.mrb[28].mxu0 }
 0x263   : > { %v7372_v63 = vpop.f32.mrb[28].mxu1  ;;  %2434 = vrot.lane.b32.xlu0 %v7269_v14, %s6039_s14  ;;  %v7376_v0 = vpop.f32.mrb[29].mxu0 }
 0x264   : > { %v7381_v6 = vpop.f32.mrb[29].mxu1  ;;  %v7383_v15 = vpop.f32.mrb[30].mxu0 }
 0x265   : > { %v7388_v19 = vpop.f32.mrb[30].mxu1  ;;  %v7390_v24 = vpop.f32.mrb[31].mxu0 }
 0x266   : > { %v7392_v33 = vpop.f32.mrb[31].mxu1  ;;  %2436 = vrot.lane.b32.xlu1 %v7281_v41, %s6039_s14 }
 0x267   : > { %3565 = vmatmul.mubr.bf16.gmra.mrb[72].mxu0 %v5974_v1  ;;  %2562 = vrot.lane.b32.xlu0 %v7274_v60, %s6039_s14 }
 0x268   : > { %4144 = vmatmul.mubr.bf16.gmra.mrb[72].mxu1 %v5974_v1  ;;  %3574 = vmatprep.mubr.bf16.mxu0 %v5975_v16 }
 0x269   : > { %4153 = vmatprep.mubr.bf16.mxu1 %v5975_v16 }
 0x26a   : > { %2564 = vrot.lane.b32.xlu1 %v7283_v9, %s6039_s14  ;;  %v7400_v34 = vpop.f32.mrb[32].mxu0 }
 0x26b   : > { %v7402_v36 = vpop.f32.mrb[32].mxu1  ;;  %2374 = vrot.lane.b32.xlu0 %v7288_v13, %s6039_s14  ;;  %v7406_v42 = vpop.f32.mrb[33].mxu0  ;;  %v5983_v13 = vld [vmem:[%s9101_s1 + $0xd0] ss:$20 sps:$4 sm:$0xff]  }
 0x26c   : > { %v7411_v50 = vpop.f32.mrb[33].mxu1  ;;  %v7413_v54 = vpop.f32.mrb[34].mxu0 }
 0x26d   : > { %v7418_v5 = vpop.f32.mrb[34].mxu1  ;;  %v7420_v7 = vpop.f32.mrb[35].mxu0 }
 0x26e   : > { %v7422_v10 = vpop.f32.mrb[35].mxu1  ;;  %2376 = vrot.lane.b32.xlu1 %v7300_v27, %s6039_s14 }
 0x26f   : > { %3575 = vmatmul.mubr.bf16.gmra.mrb[76].mxu0 %v5977_v49  ;;  %2502 = vrot.lane.b32.xlu0 %v7290_v17, %s6039_s14 }
 0x270   : > { %4154 = vmatmul.mubr.bf16.gmra.mrb[76].mxu1 %v5977_v49  ;;  %3584 = vmatprep.mubr.bf16.mxu0 %v5978_v59 }
 0x271   : > { %4163 = vmatprep.mubr.bf16.mxu1 %v5978_v59 }
 0x272   : > { %2504 = vrot.lane.b32.xlu1 %v7305_v35, %s6039_s14  ;;  %v7430_v20 = vpop.f32.mrb[36].mxu0 }
 0x273   : > { %v7432_v3 = vpop.f32.mrb[36].mxu1  ;;  %2438 = vrot.lane.b32.xlu0 %v7293_v18, %s6039_s14  ;;  %v7436_v55 = vpop.f32.mrb[37].mxu0 }
 0x274   : > { %v7441_v45 = vpop.f32.mrb[37].mxu1  ;;  %v7443_v14 = vpop.f32.mrb[38].mxu0 }
 0x275   : > { %v7448_v60 = vpop.f32.mrb[38].mxu1  ;;  %v7450_v25 = vpop.f32.mrb[39].mxu0 }
 0x276   : > { %v7452_v2 = vpop.f32.mrb[39].mxu1  ;;  %2440 = vrot.lane.b32.xlu1 %v7307_v39, %s6039_s14 }
 0x277   : > { %3585 = vmatmul.mubr.bf16.gmra.mrb[80].mxu0 %v5980_v61  ;;  %2566 = vrot.lane.b32.xlu0 %v7298_v26, %s6039_s14 }
 0x278   : > { %4164 = vmatmul.mubr.bf16.gmra.mrb[80].mxu1 %v5980_v61  ;;  %3594 = vmatprep.mubr.bf16.mxu0 %v5981_v47 }
 0x279   : > { %4173 = vmatprep.mubr.bf16.mxu1 %v5981_v47 }
 0x27a   : > { %2568 = vrot.lane.b32.xlu1 %v7309_v40, %s6039_s14  ;;  %v7460_v8 = vpop.f32.mrb[40].mxu0 }
 0x27b   : > { %v7462_v41 = vpop.f32.mrb[40].mxu1  ;;  %2378 = vrot.lane.b32.xlu0 %v7314_v44, %s6039_s14  ;;  %v7466_v9 = vpop.f32.mrb[41].mxu0  ;;  %v5986_v44 = vld [vmem:[%s9101_s1 + $0xf8] ss:$20 sps:$4 sm:$0xff]  }
 0x27c   : > { %v7471_v17 = vpop.f32.mrb[41].mxu1  ;;  %v7473_v18 = vpop.f32.mrb[42].mxu0 }
 0x27d   : > { %v7478_v26 = vpop.f32.mrb[42].mxu1  ;;  %v7480_v27 = vpop.f32.mrb[43].mxu0 }
 0x27e   : > { %v7482_v31 = vpop.f32.mrb[43].mxu1  ;;  %2380 = vrot.lane.b32.xlu1 %v7326_v21, %s6039_s14  ;;  %v5987_v21 = vld [vmem:[%s9101_s1 + $0x124] ss:$20 sps:$4 sm:$0xff]  }
 0x27f   : > { %3595 = vmatmul.mubr.bf16.gmra.mrb[84].mxu0 %v5983_v13  ;;  %2506 = vrot.lane.b32.xlu0 %v7316_v51, %s6039_s14 }
 0x280   : > { %4174 = vmatmul.mubr.bf16.gmra.mrb[84].mxu1 %v5983_v13  ;;  %3604 = vmatprep.mubr.bf16.mxu0 %v5984_v22 }
 0x281   : > { %4183 = vmatprep.mubr.bf16.mxu1 %v5984_v22 }
 0x282   : > { %2508 = vrot.lane.b32.xlu1 %v7328_v30, %s6039_s14  ;;  %v7490_v35 = vpop.f32.mrb[44].mxu0 }
 0x283   : > { %v7492_v39 = vpop.f32.mrb[44].mxu1  ;;  %2442 = vrot.lane.b32.xlu0 %v7319_v52, %s6039_s14  ;;  %v7496_v40 = vpop.f32.mrb[45].mxu0 }
 0x284   : > { %v7501_v51 = vpop.f32.mrb[45].mxu1  ;;  %v7503_v53 = vpop.f32.mrb[46].mxu0 }
 0x285   : > { %v7508_v30 = vpop.f32.mrb[46].mxu1  ;;  %v7510_v48 = vpop.f32.mrb[47].mxu0 }
 0x286   : > { %v7512_v56 = vpop.f32.mrb[47].mxu1  ;;  %2444 = vrot.lane.b32.xlu1 %v7330_v38, %s6039_s14  ;;  %v5989_v38 = vld [vmem:[%s9101_s1 + $0x120] ss:$20 sps:$4 sm:$0xff]  }
 0x287   : > { %3605 = vmatmul.mubr.bf16.gmra.mrb[88].mxu0 %v5986_v44  ;;  %2570 = vrot.lane.b32.xlu0 %v7324_v57, %s6039_s14 }
 0x288   : > { %4184 = vmatmul.mubr.bf16.gmra.mrb[88].mxu1 %v5986_v44  ;;  %3614 = vmatprep.mubr.bf16.mxu0 %v5987_v21 }
 0x289   : > { %4193 = vmatprep.mubr.bf16.mxu1 %v5987_v21 }
 0x28a   : > { %2572 = vrot.lane.b32.xlu1 %v7335_v32, %s6039_s14  ;;  %v7520_v52 = vpop.f32.mrb[48].mxu0  ;;  %v5990_v32 = vld [vmem:[%s9101_s1 + $0x14c] ss:$20 sps:$4 sm:$0xff]  }
 0x28b   : > { %v7522_v62 = vpop.f32.mrb[48].mxu1  ;;  %2382 = vrot.lane.b32.xlu0 %v7341_v46, %s6039_s14  ;;  %v7526_v1 = vpop.f32.mrb[49].mxu0 }
 0x28c   : > { %v7531_v57 = vpop.f32.mrb[49].mxu1  ;;  %v7533_v16 = vpop.f32.mrb[50].mxu0 }
 0x28d   : > { %v7538_v49 = vpop.f32.mrb[50].mxu1  ;;  %v7540_v59 = vpop.f32.mrb[51].mxu0 }
 0x28e   : > { %v7542_v61 = vpop.f32.mrb[51].mxu1  ;;  %2384 = vrot.lane.b32.xlu1 %v7354_v23, %s6039_s14  ;;  %v5992_v23 = vld [vmem:[%s9101_s1 + $0x148] ss:$20 sps:$4 sm:$0xff]  }
 0x28f   : > { %3615 = vmatmul.mubr.bf16.gmra.mrb[92].mxu0 %v5989_v38  ;;  %2510 = vrot.lane.b32.xlu0 %v7344_v29, %s6039_s14 }
 0x290   : > { %4194 = vmatmul.mubr.bf16.gmra.mrb[92].mxu1 %v5989_v38  ;;  %3624 = vmatprep.mubr.bf16.mxu0 %v5990_v32 }
 0x291   : > { %4203 = vmatprep.mubr.bf16.mxu1 %v5990_v32 }
 0x292   : > { %2512 = vrot.lane.b32.xlu1 %v7359_v37, %s6039_s14  ;;  %v7550_v46 = vpop.f32.mrb[52].mxu0  ;;  %v5993_v37 = vld [vmem:[%s9101_s1 + $0x174] ss:$20 sps:$4 sm:$0xff]  }
 0x293   : > { %v7552_v47 = vpop.f32.mrb[52].mxu1  ;;  %2446 = vrot.lane.b32.xlu0 %v7347_v12, %s6039_s14  ;;  %v7556_v13 = vpop.f32.mrb[53].mxu0 }
 0x294   : > { %v7561_v29 = vpop.f32.mrb[53].mxu1  ;;  %v7563_v22 = vpop.f32.mrb[54].mxu0 }
 0x295   : > { %v7568_v44 = vpop.f32.mrb[54].mxu1  ;;  %v7570_v21 = vpop.f32.mrb[55].mxu0 }
 0x296   : > { %v7572_v38 = vpop.f32.mrb[55].mxu1  ;;  %2448 = vrot.lane.b32.xlu1 %v7361_v11, %s6039_s14  ;;  %v5995_v11 = vld [vmem:[%s9101_s1 + $0x170] ss:$20 sps:$4 sm:$0xff]  }
 0x297   : > { %3625 = vmatmul.mubr.bf16.gmra.mrb[96].mxu0 %v5992_v23  ;;  %2574 = vrot.lane.b32.xlu0 %v7352_v28, %s6039_s14 }
 0x298   : > { %4204 = vmatmul.mubr.bf16.gmra.mrb[96].mxu1 %v5992_v23  ;;  %3634 = vmatprep.mubr.bf16.mxu0 %v5993_v37 }
 0x299   : > { %4213 = vmatprep.mubr.bf16.mxu1 %v5993_v37 }
 0x29a   : > { %2576 = vrot.lane.b32.xlu1 %v7363_v43, %s6039_s14  ;;  %v7580_v12 = vpop.f32.mrb[56].mxu0  ;;  %v5996_v43 = vld [vmem:[%s9101_s1 + $0x19c] ss:$20 sps:$4 sm:$0xff]  }
 0x29b   : > { %9368 = vst [vmem:[#allocation2_spill] sm:$0xff] %v7580_v12  ;;  %v7582_v32 = vpop.f32.mrb[56].mxu1  ;;  %2386 = vrot.lane.b32.xlu0 %v7370_v58, %s6039_s14  ;;  %v7586_v4 = vpop.f32.mrb[57].mxu0 }
 0x29c   : > { %9369 = vst [vmem:[#allocation3_spill] sm:$0xff] %v7582_v32  ;;  %9370 = vst [vmem:[#allocation5_spill] sm:$0xff] %v7586_v4  ;;  %v7591_v28 = vpop.f32.mrb[57].mxu1  ;;  %v7593_v23 = vpop.f32.mrb[58].mxu0 }
 0x29d   : > { %9371 = vst [vmem:[#allocation4_spill] sm:$0xff] %v7591_v28  ;;  %v7598_v37 = vpop.f32.mrb[58].mxu1  ;;  %v7600_v32 = vpop.permute.xlu0 %2358 }
 0x29e   : > { %9372 = vst [vmem:[#allocation6_spill] sm:$0xff] %v7600_v32  ;;  %v7602_v12 = vpop.f32.mrb[59].mxu1  ;;  %2388 = vrot.lane.b32.xlu1 %v7383_v15, %s6039_s14  ;;  %v7606_v58 = vpop.f32.mrb[59].mxu0 }
 0x29f   : > { %9373 = vst [vmem:[#allocation7_spill] sm:$0xff] %v7602_v12  ;;  %3635 = vmatmul.mubr.bf16.gmra.mrb[100].mxu0 %v5995_v11  ;;  %2514 = vrot.lane.b32.xlu0 %v7372_v63, %s6039_s14  ;;  %v5998_v63 = vld [vmem:[%s9101_s1 + $0x198] ss:$20 sps:$4 sm:$0xff]  }
 0x2a0   : > { %4214 = vmatmul.mubr.bf16.gmra.mrb[100].mxu1 %v5995_v11  ;;  %v7610_v28 = vpop.permute.xlu1 %2488  ;;  %3644 = vmatprep.mubr.bf16.mxu0 %v5996_v43 }
 0x2a1   : > { %9374 = vst [vmem:[#allocation9_spill] sm:$0xff] %v7610_v28  ;;  %v7612_v4 = vpop.permute.xlu0 %2486  ;;  %4223 = vmatprep.mubr.bf16.mxu1 %v5996_v43 }
 0x2a2   : > { %9375 = vst [vmem:[#allocation8_spill] sm:$0xff] %v7612_v4  ;;  %2516 = vrot.lane.b32.xlu1 %v7388_v19, %s6039_s14  ;;  %v7616_v32 = vpop.f32.mrb[60].mxu0  ;;  %v5999_v19 = vld [vmem:[%s9101_s1 + $0x1c4] ss:$20 sps:$4 sm:$0xff]  }
 0x2a3   : > { %v7618_v12 = vpop.f32.mrb[60].mxu1  ;;  %2450 = vrot.lane.b32.xlu0 %v7376_v0, %s6039_s14  ;;  %v7622_v15 = vpop.f32.mrb[61].mxu0 }
 0x2a4   : > { %9376 = vst [vmem:[#allocation10_spill] sm:$0xff] %v7618_v12  ;;  %9377 = vst [vmem:[#allocation11_spill] sm:$0xff] %v7622_v15  ;;  %v7627_v11 = vpop.f32.mrb[61].mxu1  ;;  %v7629_v28 = vpop.permute.xlu1 %2424 }
 0x2a5   : > { %9378 = vst [vmem:[#allocation13_spill] sm:$0xff] %v7627_v11  ;;  %9379 = vst [vmem:[#allocation12_spill] sm:$0xff] %v7629_v28  ;;  %v7634_v43 = vpop.f32.mrb[62].mxu0  ;;  %v7636_v4 = vpop.f32.mrb[62].mxu1 }
 0x2a6   : > { %v7638_v12 = vpop.f32.mrb[63].mxu1  ;;  %v7640_v0 = vpop.permute.xlu0 %2422  ;;  %2452 = vrot.lane.b32.xlu1 %v7390_v24, %s6039_s14  ;;  %v6001_v24 = vld [vmem:[%s9101_s1 + $0x1c0] ss:$20 sps:$4 sm:$0xff]  }
 0x2a7   : > { %9380 = vst [vmem:[#allocation14_spill] sm:$0xff] %v7640_v0  ;;  %v7644_v15 = vpop.f32.mrb[63].mxu0  ;;  %3645 = vmatmul.mubr.bf16.gmra.mrb[104].mxu0 %v5998_v63  ;;  %2578 = vrot.lane.b32.xlu0 %v7381_v6, %s6039_s14  ;;  %v6002_v6 = vld [vmem:[%s9101_s1 + $0x1ec] ss:$20 sps:$4 sm:$0xff]  }
 0x2a8   : > { %4224 = vmatmul.mubr.bf16.gmra.mrb[104].mxu1 %v5998_v63  ;;  %v7648_v28 = vpop.permute.xlu1 %2552  ;;  %3654 = vmatprep.mubr.bf16.mxu0 %v5999_v19 }
 0x2a9   : > { %9381 = vst [vmem:[#allocation15_spill] sm:$0xff] %v7648_v28  ;;  %4233 = vmatprep.mubr.bf16.mxu1 %v5999_v19 }
 0x2aa   : > { %v7650_v11 = vpop.permute.xlu0 %2550  ;;  %2580 = vrot.lane.b32.xlu1 %v7392_v33, %s6039_s14 }
 0x2ab   : > { %2390 = vrot.lane.b32.xlu0 %v7400_v34, %s6039_s14 }
 0x2ac   : > { %v7659_v0 = vpop.permute.xlu1 %2362 }
 0x2ae   : > { %v7664_v63 = vpop.permute.xlu0 %2360  ;;  %2392 = vrot.lane.b32.xlu1 %v7413_v54, %s6039_s14  ;;  %v6004_v54 = vld [vmem:[%s9101_s1 + $0x1e8] ss:$20 sps:$4 sm:$0xff]  }
 0x2af   : > { %3655 = vmatmul.mubr.bf16.gmra.mrb[108].mxu0 %v6001_v24  ;;  %2518 = vrot.lane.b32.xlu0 %v7402_v36, %s6039_s14  ;;  %v6005_v36 = vld [vmem:[%s9101_s1 + $0x214] ss:$20 sps:$4 sm:$0xff]  }
 0x2b0   : > { %4234 = vmatmul.mubr.bf16.gmra.mrb[108].mxu1 %v6001_v24  ;;  %v7670_v33 = vpop.permute.xlu1 %2364  ;;  %3664 = vmatprep.mubr.bf16.mxu0 %v6002_v6 }
 0x2b1   : > { %4243 = vmatprep.mubr.bf16.mxu1 %v6002_v6 }
 0x2b2   : > { %v7672_v34 = vpop.permute.xlu0 %2490  ;;  %2520 = vrot.lane.b32.xlu1 %v7418_v5, %s6039_s14 }
 0x2b3   : > { %9382 = vst [vmem:[#allocation17_spill] sm:$0xff] %v7672_v34  ;;  %2454 = vrot.lane.b32.xlu0 %v7406_v42, %s6039_s14 }
 0x2b4   : > { %v7681_v19 = vpop.permute.xlu1 %2492 }
 0x2b5   : > { %9383 = vst [vmem:[#allocation16_spill] sm:$0xff] %v7681_v19 }
 0x2b6   : > { %v7686_v24 = vpop.permute.xlu0 %2426  ;;  %2456 = vrot.lane.b32.xlu1 %v7420_v7, %s6039_s14  ;;  %v6007_v7 = vld [vmem:[%s9101_s1 + $0x210] ss:$20 sps:$4 sm:$0xff]  }
 0x2b7   : > { %3665 = vmatmul.mubr.bf16.gmra.mrb[112].mxu0 %v6004_v54  ;;  %2582 = vrot.lane.b32.xlu0 %v7411_v50, %s6039_s14  ;;  %v6008_v50 = vld [vmem:[%s9101_s1 + $0x23c] ss:$20 sps:$4 sm:$0xff]  }
 0x2b8   : > { %4244 = vmatmul.mubr.bf16.gmra.mrb[112].mxu1 %v6004_v54  ;;  %v7692_v42 = vpop.permute.xlu1 %2428  ;;  %3674 = vmatprep.mubr.bf16.mxu0 %v6005_v36 }
 0x2b9   : > { %4253 = vmatprep.mubr.bf16.mxu1 %v6005_v36 }
 0x2ba   : > { %v7694_v5 = vpop.permute.xlu0 %2554  ;;  %2584 = vrot.lane.b32.xlu1 %v7422_v10, %s6039_s14 }
 0x2bb   : > { %2394 = vrot.lane.b32.xlu0 %v7430_v20, %s6039_s14 }
 0x2bc   : > { %v7703_v6 = vpop.permute.xlu1 %2556 }
 0x2bd   : > { %9384 = vst [vmem:[#allocation18_spill] sm:$0xff] %v7703_v6 }
 0x2be   : > { %v7708_v54 = vpop.permute.xlu0 %2366  ;;  %2396 = vrot.lane.b32.xlu1 %v7443_v14, %s6039_s14  ;;  %v6010_v14 = vld [vmem:[%s9101_s1 + $0x238] ss:$20 sps:$4 sm:$0xff]  }
 0x2bf   : > { %3675 = vmatmul.mubr.bf16.gmra.mrb[116].mxu0 %v6007_v7  ;;  %2522 = vrot.lane.b32.xlu0 %v7432_v3, %s6039_s14  ;;  %v6011_v3 = vld [vmem:[%s9101_s1 + $0x264] ss:$20 sps:$4 sm:$0xff]  }
 0x2c0   : > { %4254 = vmatmul.mubr.bf16.gmra.mrb[116].mxu1 %v6007_v7  ;;  %v7714_v10 = vpop.permute.xlu1 %2368  ;;  %3684 = vmatprep.mubr.bf16.mxu0 %v6008_v50 }
 0x2c1   : > { %4263 = vmatprep.mubr.bf16.mxu1 %v6008_v50 }
 0x2c2   : > { %v7716_v20 = vpop.permute.xlu0 %2494  ;;  %2524 = vrot.lane.b32.xlu1 %v7448_v60, %s6039_s14 }
 0x2c3   : > { %9385 = vst [vmem:[#allocation19_spill] sm:$0xff] %v7716_v20  ;;  %2458 = vrot.lane.b32.xlu0 %v7436_v55, %s6039_s14 }
 0x2c4   : > { %v7725_v36 = vpop.permute.xlu1 %2496 }
 0x2c5   : > { %9386 = vst [vmem:[#allocation21_spill] sm:$0xff] %v7725_v36 }
 0x2c6   : > { %v7730_v7 = vpop.permute.xlu0 %2430  ;;  %2460 = vrot.lane.b32.xlu1 %v7450_v25, %s6039_s14  ;;  %v6013_v25 = vld [vmem:[%s9101_s1 + $0x260] ss:$20 sps:$4 sm:$0xff]  }
 0x2c7   : > { %3685 = vmatmul.mubr.bf16.gmra.mrb[120].mxu0 %v6010_v14  ;;  %2586 = vrot.lane.b32.xlu0 %v7441_v45, %s6039_s14 }
 0x2c8   : > { %4264 = vmatmul.mubr.bf16.gmra.mrb[120].mxu1 %v6010_v14  ;;  %v7736_v55 = vpop.permute.xlu1 %2432  ;;  %3694 = vmatprep.mubr.bf16.mxu0 %v6011_v3  ;;  %v9388_v14 = vmov 0  }
 0x2c9   : > { %4273 = vmatprep.mubr.bf16.mxu1 %v6011_v3 }
 0x2ca   : > { %v7738_v60 = vpop.permute.xlu0 %2558  ;;  %2588 = vrot.lane.b32.xlu1 %v7452_v2, %s6039_s14 }
 0x2cb   : > { %2398 = vrot.lane.b32.xlu0 %v7460_v8, %s6039_s14 }
 0x2cc   : > { %v7747_v50 = vpop.permute.xlu1 %2560 }
 0x2cd   : > { %9387 = vst [vmem:[#allocation20_spill] sm:$0xff] %v7747_v50 }
 0x2ce   : > { %v7749_v45 = vpop.permute.xlu0 %2370  ;;  %2400 = vrot.lane.b32.xlu1 %v7473_v18, %s6039_s14  ;;  %v6014_v18 = vld [vmem:[%s9101_s1 + $0x10] ss:$20 sps:$4 sm:$0xff]  }
 0x2cf   : > { %3695 = vmatmul.mubr.bf16.gmra.mrb[124].mxu0 %v6013_v25  ;;  %2526 = vrot.lane.b32.xlu0 %v7462_v41, %s6039_s14 }
 0x2d0   : > { %4274 = vmatmul.mubr.bf16.gmra.mrb[124].mxu1 %v6013_v25  ;;  %v7755_v2 = vpop.permute.xlu1 %2372  ;;  %3737 = vmatprep.mubr.bf16.mxu0 %v9388_v14  ;;  %v337_v25 = vlaneseq }
 0x2d1   : > { %4316 = vmatprep.mubr.bf16.mxu1 %v9388_v14 }
 0x2d2   : > { %v7759_v8 = vpop.permute.xlu0 %2498  ;;  %2528 = vrot.lane.b32.xlu1 %v7478_v26, %s6039_s14 }
 0x2d3   : > { %2462 = vrot.lane.b32.xlu0 %v7466_v9, %s6039_s14 }
 0x2d4   : > { %v7768_v41 = vpop.permute.xlu1 %2500 }
 0x2d6   : > { %v7770_v3 = vpop.permute.xlu0 %2434  ;;  %2464 = vrot.lane.b32.xlu1 %v7480_v27, %s6039_s14 }
 0x2d7   : > { %5119 = vmatmul.mubr.msk.bf16.vlgmr.msra.gmra.mrb[64].mxu0 %vm1134_vm1, %v6014_v18  ;;  %2590 = vrot.lane.b32.xlu0 %v7471_v17, %s6039_s14  ;;  %v6015_v17 = vld [vmem:[%s9101_s1 + $0x38] ss:$20 sps:$4 sm:$0xff]  }
 0x2d8   : > { %5136 = vmatmul.mubr.msk.bf16.vlgmr.msra.gmra.mrb[64].mxu1 %vm1134_vm1, %v6014_v18  ;;  %v7778_v26 = vpop.permute.xlu1 %2436  ;;  %3747 = vmatprep.mubr.bf16.mxu0 %v9388_v14 }
 0x2d9   : > { %4326 = vmatprep.mubr.bf16.mxu1 %v9388_v14 }
 0x2da   : > { %v7782_v9 = vpop.permute.xlu0 %2562  ;;  %2592 = vrot.lane.b32.xlu1 %v7482_v31, %s6039_s14 }
 0x2db   : > { %2402 = vrot.lane.b32.xlu0 %v7490_v35, %s6039_s14  ;;  %v7801_v35 = vand.u32 127, %v337_v25 }
 0x2dc   : > { %v7791_v27 = vpop.permute.xlu1 %2564 }
 0x2dd   : > { %vm2614_vm2 = vcmp.lt.s32.totalorder %v7801_v35, 1  ;;  %vm2354_vm3 = vcmp.eq.s32.totalorder %v7801_v35, 0 }
 0x2de   : > { %v2375_v18 = vpop.permute.xlu0 %2374  ;;  %2404 = vrot.lane.b32.xlu1 %v7503_v53, %s6039_s14 }
 0x2df   : > { %5120 = vmatmul.mubr.msk.bf16.gmra.mrb[68].mxu0 %vm1134_vm1, %v6015_v17  ;;  %2530 = vrot.lane.b32.xlu0 %v7492_v39, %s6039_s14  ;;  %v6016_v39 = vld [vmem:[%s9101_s1 + $0x60] ss:$20 sps:$4 sm:$0xff]  }
 0x2e0   : > { %5137 = vmatmul.mubr.msk.bf16.gmra.mrb[68].mxu1 %vm1134_vm1, %v6015_v17  ;;  %v2377_v31 = vpop.permute.xlu1 %2376  ;;  %3757 = vmatprep.mubr.bf16.mxu0 %v9388_v14 }
 0x2e1   : > { %4336 = vmatprep.mubr.bf16.mxu1 %v9388_v14 }
 0x2e2   : > { %v2503_v36 = vpop.permute.xlu0 %2502  ;;  %2532 = vrot.lane.b32.xlu1 %v7508_v30, %s6039_s14 }
 0x2e3   : > { %2466 = vrot.lane.b32.xlu0 %v7496_v40, %s6039_s14 }
 0x2e4   : > { %v2505_v53 = vpop.permute.xlu1 %2504 }
 0x2e6   : > { %v2439_v17 = vpop.permute.xlu0 %2438  ;;  %2468 = vrot.lane.b32.xlu1 %v7510_v48, %s6039_s14 }
 0x2e7   : > { %5121 = vmatmul.mubr.msk.bf16.gmra.mrb[72].mxu0 %vm1134_vm1, %v6016_v39  ;;  %2594 = vrot.lane.b32.xlu0 %v7501_v51, %s6039_s14  ;;  %v7818_v30 = vsel %vm2614_vm2, %v2439_v17, %v2503_v36  ;;  %v7822_v40 = vsel %vm2614_vm2, %v2375_v18, %v2439_v17  ;;  %v6017_v17 = vld [vmem:[%s9101_s1 + $0x88] ss:$20 sps:$4 sm:$0xff]  }
 0x2e8   : > { %5138 = vmatmul.mubr.msk.bf16.gmra.mrb[72].mxu1 %vm1134_vm1, %v6016_v39  ;;  %v2441_v25 = vpop.permute.xlu1 %2440  ;;  %3767 = vmatprep.mubr.bf16.mxu0 %v9388_v14 }
 0x2e9   : > { %4346 = vmatprep.mubr.bf16.mxu1 %v9388_v14  ;;  %v7829_v48 = vsel %vm2614_vm2, %v2441_v25, %v2505_v53  ;;  %v7833_v51 = vsel %vm2614_vm2, %v2377_v31, %v2441_v25 }
 0x2ea   : > { %v2567_v20 = vpop.permute.xlu0 %2566  ;;  %2596 = vrot.lane.b32.xlu1 %v7512_v56, %s6039_s14 }
 0x2eb   : > { %v7839_v39 = vsel %vm2614_vm2, %v2567_v20, %v2375_v18  ;;  %2406 = vrot.lane.b32.xlu0 %v7520_v52, %s6039_s14  ;;  %v7848_v19 = vsel %vm2614_vm2, %v2503_v36, %v2567_v20 }
 0x2ec   : > { %v2569_v25 = vpop.permute.xlu1 %2568 }
 0x2ed   : > { %v7852_v34 = vsel %vm2614_vm2, %v2569_v25, %v2377_v31  ;;  %v7856_v56 = vsel %vm2614_vm2, %v2505_v53, %v2569_v25  ;;  %v6019_v25 = vld [vmem:[%s9101_s1 + $0xd8] ss:$20 sps:$4 sm:$0xff]  }
 0x2ee   : > { %v2379_v18 = vpop.permute.xlu0 %2378  ;;  %2408 = vrot.lane.b32.xlu1 %v7533_v16, %s6039_s14  ;;  %v6018_v16 = vld [vmem:[%s9101_s1 + $0xb0] ss:$20 sps:$4 sm:$0xff]  }
 0x2ef   : > { %5122 = vmatmul.mubr.msk.bf16.gmra.mrb[76].mxu0 %vm1134_vm1, %v6017_v17  ;;  %2534 = vrot.lane.b32.xlu0 %v7522_v62, %s6039_s14 }
 0x2f0   : > { %5139 = vmatmul.mubr.msk.bf16.gmra.mrb[76].mxu1 %vm1134_vm1, %v6017_v17  ;;  %v2381_v52 = vpop.permute.xlu1 %2380  ;;  %3777 = vmatprep.mubr.bf16.mxu0 %v9388_v14 }
 0x2f1   : > { %4356 = vmatprep.mubr.bf16.mxu1 %v9388_v14 }
 0x2f2   : > { %v2507_v20 = vpop.permute.xlu0 %2506  ;;  %2536 = vrot.lane.b32.xlu1 %v7538_v49, %s6039_s14 }
 0x2f3   : > { %2470 = vrot.lane.b32.xlu0 %v7526_v1, %s6039_s14 }
 0x2f4   : > { %v2509_v36 = vpop.permute.xlu1 %2508 }
 0x2f6   : > { %v2443_v62 = vpop.permute.xlu0 %2442  ;;  %2472 = vrot.lane.b32.xlu1 %v7540_v59, %s6039_s14 }
 0x2f7   : > { %5123 = vmatmul.mubr.msk.bf16.gmra.mrb[80].mxu0 %vm1134_vm1, %v6018_v16  ;;  %2598 = vrot.lane.b32.xlu0 %v7531_v57, %s6039_s14  ;;  %v7880_v49 = vsel %vm2614_vm2, %v2443_v62, %v2507_v20  ;;  %v7884_v1 = vsel %vm2614_vm2, %v2379_v18, %v2443_v62 }
 0x2f8   : > { %5140 = vmatmul.mubr.msk.bf16.gmra.mrb[80].mxu1 %vm1134_vm1, %v6018_v16  ;;  %v2445_v31 = vpop.permute.xlu1 %2444  ;;  %3787 = vmatprep.mubr.bf16.mxu0 %v9388_v14 }
 0x2f9   : > { %4366 = vmatprep.mubr.bf16.mxu1 %v9388_v14  ;;  %v7891_v59 = vsel %vm2614_vm2, %v2445_v31, %v2509_v36  ;;  %v7895_v57 = vsel %vm2614_vm2, %v2381_v52, %v2445_v31 }
 0x2fa   : > { %v2571_v53 = vpop.permute.xlu0 %2570  ;;  %2600 = vrot.lane.b32.xlu1 %v7542_v61, %s6039_s14 }
 0x2fb   : > { %v7901_v17 = vsel %vm2614_vm2, %v2571_v53, %v2379_v18  ;;  %2410 = vrot.lane.b32.xlu0 %v7550_v46, %s6039_s14  ;;  %v7910_v16 = vsel %vm2614_vm2, %v2507_v20, %v2571_v53 }
 0x2fc   : > { %v2573_v62 = vpop.permute.xlu1 %2572 }
 0x2fd   : > { %v7914_v31 = vsel %vm2614_vm2, %v2573_v62, %v2381_v52  ;;  %v7918_v61 = vsel %vm2614_vm2, %v2509_v36, %v2573_v62  ;;  %v6021_v62 = vld [vmem:[%s9101_s1 + $0x128] ss:$20 sps:$4 sm:$0xff]  }
 0x2fe   : > { %v7920_v18 = vpop.permute.xlu0 %2382  ;;  %2412 = vrot.lane.b32.xlu1 %v7563_v22, %s6039_s14  ;;  %v6020_v22 = vld [vmem:[%s9101_s1 + $0x100] ss:$20 sps:$4 sm:$0xff]  }
 0x2ff   : > { %5124 = vmatmul.mubr.msk.bf16.gmra.mrb[84].mxu0 %vm1134_vm1, %v6019_v25  ;;  %2538 = vrot.lane.b32.xlu0 %v7552_v47, %s6039_s14 }
 0x300   : > { %5141 = vmatmul.mubr.msk.bf16.gmra.mrb[84].mxu1 %vm1134_vm1, %v6019_v25  ;;  %v2385_v46 = vpop.permute.xlu1 %2384  ;;  %3797 = vmatprep.mubr.bf16.mxu0 %v9388_v14  ;;  %v9390_v25 = vld [vmem:[#allocation2_spill] sm:$0xff] }
 0x301   : > { %4376 = vmatprep.mubr.bf16.mxu1 %v9388_v14 }
 0x302   : > { %v2511_v52 = vpop.permute.xlu0 %2510  ;;  %2540 = vrot.lane.b32.xlu1 %v7568_v44, %s6039_s14 }
 0x303   : > { %2474 = vrot.lane.b32.xlu0 %v7556_v13, %s6039_s14 }
 0x304   : > { %v2513_v20 = vpop.permute.xlu1 %2512 }
 0x306   : > { %v2447_v47 = vpop.permute.xlu0 %2446  ;;  %2476 = vrot.lane.b32.xlu1 %v7570_v21, %s6039_s14 }
 0x307   : > { %5125 = vmatmul.mubr.msk.bf16.gmra.mrb[88].mxu0 %vm1134_vm1, %v6020_v22  ;;  %2602 = vrot.lane.b32.xlu0 %v7561_v29, %s6039_s14  ;;  %v7944_v44 = vsel %vm2614_vm2, %v2447_v47, %v2511_v52  ;;  %v7949_v13 = vsel %vm2614_vm2, %v7920_v18, %v2447_v47 }
 0x308   : > { %5142 = vmatmul.mubr.msk.bf16.gmra.mrb[88].mxu1 %vm1134_vm1, %v6020_v22  ;;  %v2449_v36 = vpop.permute.xlu1 %2448  ;;  %3807 = vmatprep.mubr.bf16.mxu0 %v9388_v14 }
 0x309   : > { %4386 = vmatprep.mubr.bf16.mxu1 %v9388_v14  ;;  %v7956_v21 = vsel %vm2614_vm2, %v2449_v36, %v2513_v20  ;;  %v7960_v29 = vsel %vm2614_vm2, %v2385_v46, %v2449_v36 }
 0x30a   : > { %9389 = vst [vmem:[#allocation22_spill] sm:$0xff] %v7960_v29  ;;  %v7962_v53 = vpop.permute.xlu0 %2574  ;;  %2604 = vrot.lane.b32.xlu1 %v7572_v38, %s6039_s14 }
 0x30b   : > { %2414 = vrot.lane.b32.xlu0 %v9390_v25, %s6039_s14  ;;  %v7974_v22 = vsel %vm2614_vm2, %v2511_v52, %v7962_v53  ;;  %v9392_v25 = vld [vmem:[#allocation3_spill] sm:$0xff] }
 0x30c   : > { %v2577_v47 = vpop.permute.xlu1 %2576 }
 0x30d   : > { %v7978_v36 = vsel %vm2614_vm2, %v2577_v47, %v2385_v46  ;;  %v7982_v38 = vsel %vm2614_vm2, %v2513_v20, %v2577_v47  ;;  %v6022_v20 = vld [vmem:[%s9101_s1 + $0x150] ss:$20 sps:$4 sm:$0xff]  }
 0x30e   : > { %9391 = vst [vmem:[#allocation23_spill] sm:$0xff] %v7982_v38  ;;  %v7984_v29 = vpop.permute.xlu0 %2386  ;;  %2416 = vrot.lane.b32.xlu1 %v7593_v23, %s6039_s14  ;;  %v9395_v23 = vld [vmem:[#allocation5_spill] sm:$0xff] }
 0x30f   : > { %5126 = vmatmul.mubr.msk.bf16.gmra.mrb[92].mxu0 %vm1134_vm1, %v6021_v62  ;;  %2542 = vrot.lane.b32.xlu0 %v9392_v25, %s6039_s14  ;;  %v9398_v25 = vld [vmem:[#allocation4_spill] sm:$0xff] }
 0x310   : > { %5143 = vmatmul.mubr.msk.bf16.gmra.mrb[92].mxu1 %vm1134_vm1, %v6021_v62  ;;  %v7992_v52 = vpop.permute.xlu1 %2388  ;;  %3817 = vmatprep.mubr.bf16.mxu0 %v9388_v14 }
 0x311   : > { %9393 = vst [vmem:[#allocation25_spill] sm:$0xff] %v7992_v52  ;;  %4396 = vmatprep.mubr.bf16.mxu1 %v9388_v14 }
 0x312   : > { %v7996_v46 = vpop.permute.xlu0 %2514  ;;  %2544 = vrot.lane.b32.xlu1 %v7598_v37, %s6039_s14 }
 0x313   : > { %9394 = vst [vmem:[#allocation24_spill] sm:$0xff] %v7996_v46  ;;  %2478 = vrot.lane.b32.xlu0 %v9395_v23, %s6039_s14 }
 0x314   : > { %v8005_v47 = vpop.permute.xlu1 %2516 }
 0x315   : > { %9396 = vst [vmem:[#allocation26_spill] sm:$0xff] %v8005_v47 }
 0x316   : > { %v8007_v62 = vpop.permute.xlu0 %2450  ;;  %2480 = vrot.lane.b32.xlu1 %v7606_v58, %s6039_s14  ;;  %v6023_v58 = vld [vmem:[%s9101_s1 + $0x178] ss:$20 sps:$4 sm:$0xff]  }
 0x317   : > { %9397 = vst [vmem:[#allocation27_spill] sm:$0xff] %v8007_v62  ;;  %5127 = vmatmul.mubr.msk.bf16.gmra.mrb[96].mxu0 %vm1134_vm1, %v6022_v20  ;;  %2606 = vrot.lane.b32.xlu0 %v9398_v25, %s6039_s14  ;;  %v9400_v62 = vld [vmem:[#allocation7_spill] sm:$0xff] }
 0x318   : > { %5144 = vmatmul.mubr.msk.bf16.gmra.mrb[96].mxu1 %vm1134_vm1, %v6022_v20  ;;  %v8015_v37 = vpop.permute.xlu1 %2452  ;;  %3827 = vmatprep.mubr.bf16.mxu0 %v9388_v14 }
 0x319   : > { %9399 = vst [vmem:[#allocation28_spill] sm:$0xff] %v8015_v37  ;;  %4406 = vmatprep.mubr.bf16.mxu1 %v9388_v14 }
 0x31a   : > { %v8019_v23 = vpop.permute.xlu0 %2578  ;;  %2608 = vrot.lane.b32.xlu1 %v9400_v62, %s6039_s14 }
 0x31b   : > { %2418 = vrot.lane.b32.xlu0 %v7616_v32, %s6039_s14  ;;  %v8032_v20 = vsel %vm2614_vm2, %v7996_v46, %v8019_v23  ;;  %v9404_v32 = vld [vmem:[#allocation10_spill] sm:$0xff] }
 0x31c   : > { %9401 = vst [vmem:[#allocation29_spill] sm:$0xff] %v8032_v20  ;;  %v8034_v25 = vpop.permute.xlu1 %2580 }
 0x31d   : > { %9402 = vst [vmem:[#allocation30_spill] sm:$0xff] %v8034_v25  ;;  %v8040_v62 = vsel %vm2614_vm2, %v8005_v47, %v8034_v25 }
 0x31e   : > { %9403 = vst [vmem:[#allocation31_spill] sm:$0xff] %v8040_v62  ;;  %v2391_v37 = vpop.permute.xlu0 %2390  ;;  %2420 = vrot.lane.b32.xlu1 %v7634_v43, %s6039_s14  ;;  %v9405_v62 = vld [vmem:[#allocation11_spill] sm:$0xff]  ;;  %v6024_v43 = vld [vmem:[%s9101_s1 + $0x1a0] ss:$20 sps:$4 sm:$0xff]  }
 0x31f   : > { %5128 = vmatmul.mubr.msk.bf16.gmra.mrb[100].mxu0 %vm1134_vm1, %v6023_v58  ;;  %2546 = vrot.lane.b32.xlu0 %v9404_v32, %s6039_s14 }
 0x320   : > { %5145 = vmatmul.mubr.msk.bf16.gmra.mrb[100].mxu1 %vm1134_vm1, %v6023_v58  ;;  %v2393_v20 = vpop.permute.xlu1 %2392  ;;  %3837 = vmatprep.mubr.bf16.mxu0 %v9388_v14  ;;  %v9406_v58 = vld [vmem:[#allocation13_spill] sm:$0xff] }
 0x321   : > { %4416 = vmatprep.mubr.bf16.mxu1 %v9388_v14 }
 0x322   : > { %v2519_v46 = vpop.permute.xlu0 %2518  ;;  %2548 = vrot.lane.b32.xlu1 %v7636_v4, %s6039_s14 }
 0x323   : > { %2482 = vrot.lane.b32.xlu0 %v9405_v62, %s6039_s14 }
 0x324   : > { %v2521_v47 = vpop.permute.xlu1 %2520 }
 0x326   : > { %v2455_v32 = vpop.permute.xlu0 %2454  ;;  %2484 = vrot.lane.b32.xlu1 %v7644_v15, %s6039_s14 }
 0x327   : > { %5129 = vmatmul.mubr.msk.bf16.gmra.mrb[104].mxu0 %vm1134_vm1, %v6024_v43  ;;  %2610 = vrot.lane.b32.xlu0 %v9406_v58, %s6039_s14  ;;  %v8064_v4 = vsel %vm2614_vm2, %v2455_v32, %v2519_v46  ;;  %v8068_v62 = vsel %vm2614_vm2, %v2391_v37, %v2455_v32  ;;  %v6025_v32 = vld [vmem:[%s9101_s1 + $0x1c8] ss:$20 sps:$4 sm:$0xff]  }
 0x328   : > { %9407 = vst [vmem:[#allocation32_spill] sm:$0xff] %v8064_v4  ;;  %9408 = vst [vmem:[#allocation33_spill] sm:$0xff] %v8068_v62  ;;  %5146 = vmatmul.mubr.msk.bf16.gmra.mrb[104].mxu1 %vm1134_vm1, %v6024_v43  ;;  %v2457_v25 = vpop.permute.xlu1 %2456  ;;  %3847 = vmatprep.mubr.bf16.mxu0 %v9388_v14 }
 0x329   : > { %4426 = vmatprep.mubr.bf16.mxu1 %v9388_v14  ;;  %v8075_v15 = vsel %vm2614_vm2, %v2457_v25, %v2521_v47  ;;  %v8079_v58 = vsel %vm2614_vm2, %v2393_v20, %v2457_v25 }
 0x32a   : > { %9409 = vst [vmem:[#allocation34_spill] sm:$0xff] %v8075_v15  ;;  %9410 = vst [vmem:[#allocation35_spill] sm:$0xff] %v8079_v58  ;;  %v2583_v4 = vpop.permute.xlu0 %2582  ;;  %2612 = vrot.lane.b32.xlu1 %v7638_v12, %s6039_s14 }
 0x32b   : > { %v8085_v43 = vsel %vm2614_vm2, %v2583_v4, %v2391_v37  ;;  %v8092_v62 = vsel %vm2614_vm2, %v2519_v46, %v2583_v4 }
 0x32c   : > { %9411 = vst [vmem:[#allocation36_spill] sm:$0xff] %v8085_v43  ;;  %9412 = vst [vmem:[#allocation37_spill] sm:$0xff] %v8092_v62  ;;  %v2585_v15 = vpop.permute.xlu1 %2584 }
 0x32d   : > { %v8096_v25 = vsel %vm2614_vm2, %v2585_v15, %v2393_v20  ;;  %v8100_v12 = vsel %vm2614_vm2, %v2521_v47, %v2585_v15  ;;  %v6026_v20 = vld [vmem:[%s9101_s1 + $0x1f0] ss:$20 sps:$4 sm:$0xff]  }
 0x32e   : > { %9413 = vst [vmem:[#allocation38_spill] sm:$0xff] %v8096_v25  ;;  %9414 = vst [vmem:[#allocation39_spill] sm:$0xff] %v8100_v12  ;;  %v2395_v58 = vpop.permute.xlu0 %2394 }
 0x32f   : > { %5130 = vmatmul.mubr.msk.bf16.gmra.mrb[108].mxu0 %vm1134_vm1, %v6025_v32 }
 0x330   : > { %5147 = vmatmul.mubr.msk.bf16.gmra.mrb[108].mxu1 %vm1134_vm1, %v6025_v32  ;;  %v2397_v37 = vpop.permute.xlu1 %2396  ;;  %3857 = vmatprep.mubr.bf16.mxu0 %v9388_v14 }
 0x331   : > { %4436 = vmatprep.mubr.bf16.mxu1 %v9388_v14 }
 0x332   : > { %v2523_v46 = vpop.permute.xlu0 %2522 }
 0x334   : > { %v2525_v4 = vpop.permute.xlu1 %2524 }
 0x336   : > { %v2459_v62 = vpop.permute.xlu0 %2458 }
 0x337   : > { %5131 = vmatmul.mubr.msk.bf16.gmra.mrb[112].mxu0 %vm1134_vm1, %v6026_v20  ;;  %v8112_v47 = vsel %vm2614_vm2, %v2459_v62, %v2523_v46  ;;  %v8116_v15 = vsel %vm2614_vm2, %v2395_v58, %v2459_v62 }
 0x338   : > { %9415 = vst [vmem:[#allocation40_spill] sm:$0xff] %v8112_v47  ;;  %9416 = vst [vmem:[#allocation41_spill] sm:$0xff] %v8116_v15  ;;  %5148 = vmatmul.mubr.msk.bf16.gmra.mrb[112].mxu1 %vm1134_vm1, %v6026_v20  ;;  %v2461_v32 = vpop.permute.xlu1 %2460  ;;  %3867 = vmatprep.mubr.bf16.mxu0 %v9388_v14  ;;  %v6027_v20 = vld [vmem:[%s9101_s1 + $0x218] ss:$20 sps:$4 sm:$0xff]  }
 0x339   : > { %4446 = vmatprep.mubr.bf16.mxu1 %v9388_v14  ;;  %v8123_v12 = vsel %vm2614_vm2, %v2461_v32, %v2525_v4  ;;  %v8127_v25 = vsel %vm2614_vm2, %v2397_v37, %v2461_v32 }
 0x33a   : > { %9417 = vst [vmem:[#allocation42_spill] sm:$0xff] %v8123_v12  ;;  %9418 = vst [vmem:[#allocation43_spill] sm:$0xff] %v8127_v25  ;;  %v2587_v47 = vpop.permute.xlu0 %2586 }
 0x33b   : > { %v8131_v62 = vsel %vm2614_vm2, %v2587_v47, %v2395_v58  ;;  %v8138_v15 = vsel %vm2614_vm2, %v2523_v46, %v2587_v47 }
 0x33c   : > { %9419 = vst [vmem:[#allocation44_spill] sm:$0xff] %v8131_v62  ;;  %9420 = vst [vmem:[#allocation45_spill] sm:$0xff] %v8138_v15  ;;  %v2589_v43 = vpop.permute.xlu1 %2588 }
 0x33d   : > { %v8142_v12 = vsel %vm2614_vm2, %v2589_v43, %v2397_v37  ;;  %v8146_v32 = vsel %vm2614_vm2, %v2525_v4, %v2589_v43  ;;  %v6028_v37 = vld [vmem:[%s9101_s1 + $0x240] ss:$20 sps:$4 sm:$0xff]  }
 0x33e   : > { %9421 = vst [vmem:[#allocation46_spill] sm:$0xff] %v8142_v12  ;;  %9422 = vst [vmem:[#allocation47_spill] sm:$0xff] %v8146_v32  ;;  %v2399_v25 = vpop.permute.xlu0 %2398 }
 0x33f   : > { %5132 = vmatmul.mubr.msk.bf16.gmra.mrb[116].mxu0 %vm1134_vm1, %v6027_v20 }
 0x340   : > { %5149 = vmatmul.mubr.msk.bf16.gmra.mrb[116].mxu1 %vm1134_vm1, %v6027_v20  ;;  %v2401_v58 = vpop.permute.xlu1 %2400  ;;  %3877 = vmatprep.mubr.bf16.mxu0 %v9388_v14 }
 0x341   : > { %4456 = vmatprep.mubr.bf16.mxu1 %v9388_v14 }
 0x342   : > { %v2527_v46 = vpop.permute.xlu0 %2526 }
 0x344   : > { %v2529_v47 = vpop.permute.xlu1 %2528 }
 0x346   : > { %v2463_v15 = vpop.permute.xlu0 %2462 }
 0x347   : > { %5133 = vmatmul.mubr.msk.bf16.gmra.mrb[120].mxu0 %vm1134_vm1, %v6028_v37  ;;  %v8158_v43 = vsel %vm2614_vm2, %v2463_v15, %v2527_v46  ;;  %v8162_v4 = vsel %vm2614_vm2, %v2399_v25, %v2463_v15 }
 0x348   : > { %9423 = vst [vmem:[#allocation48_spill] sm:$0xff] %v8158_v43  ;;  %9424 = vst [vmem:[#allocation49_spill] sm:$0xff] %v8162_v4  ;;  %5150 = vmatmul.mubr.msk.bf16.gmra.mrb[120].mxu1 %vm1134_vm1, %v6028_v37  ;;  %v2465_v20 = vpop.permute.xlu1 %2464  ;;  %3887 = vmatprep.mubr.bf16.mxu0 %v9388_v14  ;;  %v6029_v37 = vld [vmem:[%s9101_s1 + $0x268] ss:$20 sps:$4 sm:$0xff]  }
 0x349   : > { %4466 = vmatprep.mubr.bf16.mxu1 %v9388_v14  ;;  %v8169_v32 = vsel %vm2614_vm2, %v2465_v20, %v2529_v47  ;;  %v8173_v12 = vsel %vm2614_vm2, %v2401_v58, %v2465_v20 }
 0x34a   : > { %9425 = vst [vmem:[#allocation50_spill] sm:$0xff] %v8169_v32  ;;  %9426 = vst [vmem:[#allocation51_spill] sm:$0xff] %v8173_v12  ;;  %v2591_v43 = vpop.permute.xlu0 %2590 }
 0x34b   : > { %v8177_v15 = vsel %vm2614_vm2, %v2591_v43, %v2399_v25  ;;  %v8184_v14 = vsel %vm2614_vm2, %v2527_v46, %v2591_v43 }
 0x34c   : > { %9427 = vst [vmem:[#allocation52_spill] sm:$0xff] %v8177_v15  ;;  %9428 = vst [vmem:[#allocation53_spill] sm:$0xff] %v8184_v14  ;;  %v2593_v4 = vpop.permute.xlu1 %2592 }
 0x34d   : > { %v8188_v32 = vsel %vm2614_vm2, %v2593_v4, %v2401_v58  ;;  %v8192_v20 = vsel %vm2614_vm2, %v2529_v47, %v2593_v4 }
 0x34e   : > { %9429 = vst [vmem:[#allocation54_spill] sm:$0xff] %v8188_v32  ;;  %9430 = vst [vmem:[#allocation55_spill] sm:$0xff] %v8192_v20  ;;  %v8194_v12 = vpop.permute.xlu0 %2402 }
 0x34f   : > { %9431 = vst [vmem:[#allocation56_spill] sm:$0xff] %v8194_v12  ;;  %5134 = vmatmul.mubr.msk.bf16.gmra.mrb[124].mxu0 %vm1134_vm1, %v6029_v37 }
 0x350   : > { %5151 = vmatmul.mubr.msk.bf16.gmra.mrb[124].mxu1 %vm1134_vm1, %v6029_v37  ;;  %v8198_v25 = vpop.permute.xlu1 %2404 }
 0x351   : > { %9432 = vst [vmem:[#allocation57_spill] sm:$0xff] %v8198_v25 }
 0x352   : > { %v8200_v15 = vpop.permute.xlu0 %2530 }
 0x353   : > { %9433 = vst [vmem:[#allocation58_spill] sm:$0xff] %v8200_v15 }
 0x354   : > { %v8202_v46 = vpop.permute.xlu1 %2532 }
 0x355   : > { %9434 = vst [vmem:[#allocation59_spill] sm:$0xff] %v8202_v46 }
 0x356   : > { %v8204_v43 = vpop.permute.xlu0 %2466 }
 0x357   : > { %9435 = vst [vmem:[#allocation60_spill] sm:$0xff] %v8204_v43 }
 0x358   : > { %v8206_v58 = vpop.permute.xlu1 %2468 }
 0x359   : > { %9436 = vst [vmem:[#allocation61_spill] sm:$0xff] %v8206_v58 }
 0x35a   : > { %v2595_v14 = vpop.permute.xlu0 %2594 }
 0x35b   : > { %v8211_v47 = vsel %vm2614_vm2, %v2595_v14, %v8194_v12  ;;  %v8216_v4 = vsel %vm2614_vm2, %v8200_v15, %v2595_v14 }
 0x35c   : > { %9437 = vst [vmem:[#allocation62_spill] sm:$0xff] %v8211_v47  ;;  %9438 = vst [vmem:[#allocation63_spill] sm:$0xff] %v8216_v4  ;;  %v2597_v37 = vpop.permute.xlu1 %2596 }
 0x35d   : > { %v8221_v20 = vsel %vm2614_vm2, %v2597_v37, %v8198_v25  ;;  %v8226_v58 = vsel %vm2614_vm2, %v8202_v46, %v2597_v37 }
 0x35e   : > { %9439 = vst [vmem:[#allocation64_spill] sm:$0xff] %v8221_v20  ;;  %9440 = vst [vmem:[#allocation65_spill] sm:$0xff] %v8226_v58  ;;  %v2407_v43 = vpop.permute.xlu0 %2406 }
 0x360   : > { %v2409_v32 = vpop.permute.xlu1 %2408 }
 0x362   : > { %v2535_v12 = vpop.permute.xlu0 %2534 }
 0x364   : > { %v2537_v47 = vpop.permute.xlu1 %2536 }
 0x366   : > { %v2471_v62 = vpop.permute.xlu0 %2470 }
 0x367   : > { %v8230_v14 = vsel %vm2614_vm2, %v2471_v62, %v2535_v12  ;;  %v8234_v4 = vsel %vm2614_vm2, %v2407_v43, %v2471_v62 }
 0x368   : > { %9441 = vst [vmem:[#allocation66_spill] sm:$0xff] %v8230_v14  ;;  %9442 = vst [vmem:[#allocation67_spill] sm:$0xff] %v8234_v4  ;;  %v2473_v25 = vpop.permute.xlu1 %2472 }
 0x369   : > { %v8238_v20 = vsel %vm2614_vm2, %v2473_v25, %v2537_v47  ;;  %v8242_v37 = vsel %vm2614_vm2, %v2409_v32, %v2473_v25 }
 0x36a   : > { %9443 = vst [vmem:[#allocation68_spill] sm:$0xff] %v8238_v20  ;;  %9444 = vst [vmem:[#allocation69_spill] sm:$0xff] %v8242_v37  ;;  %v2599_v58 = vpop.permute.xlu0 %2598 }
 0x36b   : > { %v8246_v46 = vsel %vm2614_vm2, %v2599_v58, %v2407_v43  ;;  %v8250_v14 = vsel %vm2614_vm2, %v2535_v12, %v2599_v58 }
 0x36c   : > { %9445 = vst [vmem:[#allocation70_spill] sm:$0xff] %v8246_v46  ;;  %9446 = vst [vmem:[#allocation71_spill] sm:$0xff] %v8250_v14  ;;  %v2601_v62 = vpop.permute.xlu1 %2600  ;;  %v9469_v46 = vld [vmem:[#allocation12_spill] sm:$0xff] }
 0x36d   : > { %v8254_v4 = vsel %vm2614_vm2, %v2601_v62, %v2409_v32  ;;  %v8258_v20 = vsel %vm2614_vm2, %v2537_v47, %v2601_v62 }
 0x36e   : > { %9447 = vst [vmem:[#allocation72_spill] sm:$0xff] %v8254_v4  ;;  %9448 = vst [vmem:[#allocation73_spill] sm:$0xff] %v8258_v20  ;;  %v2411_v25 = vpop.permute.xlu0 %2410 }
 0x370   : > { %v2413_v37 = vpop.permute.xlu1 %2412 }
 0x372   : > { %v2539_v15 = vpop.permute.xlu0 %2538 }
 0x374   : > { %v2541_v52 = vpop.permute.xlu1 %2540 }
 0x376   : > { %v2475_v38 = vpop.permute.xlu0 %2474 }
 0x377   : > { %v8262_v43 = vsel %vm2614_vm2, %v2475_v38, %v2539_v15  ;;  %v8266_v12 = vsel %vm2614_vm2, %v2411_v25, %v2475_v38 }
 0x378   : > { %9449 = vst [vmem:[#allocation74_spill] sm:$0xff] %v8262_v43  ;;  %9450 = vst [vmem:[#allocation75_spill] sm:$0xff] %v8266_v12  ;;  %v2477_v58 = vpop.permute.xlu1 %2476 }
 0x379   : > { %v8270_v32 = vsel %vm2614_vm2, %v2477_v58, %v2541_v52  ;;  %v8274_v47 = vsel %vm2614_vm2, %v2413_v37, %v2477_v58 }
 0x37a   : > { %9451 = vst [vmem:[#allocation76_spill] sm:$0xff] %v8270_v32  ;;  %9452 = vst [vmem:[#allocation77_spill] sm:$0xff] %v8274_v47  ;;  %v2603_v62 = vpop.permute.xlu0 %2602 }
 0x37b   : > { %v8278_v20 = vsel %vm2614_vm2, %v2603_v62, %v2411_v25  ;;  %v8282_v43 = vsel %vm2614_vm2, %v2539_v15, %v2603_v62 }
 0x37c   : > { %9453 = vst [vmem:[#allocation78_spill] sm:$0xff] %v8278_v20  ;;  %9454 = vst [vmem:[#allocation79_spill] sm:$0xff] %v8282_v43  ;;  %v2605_v38 = vpop.permute.xlu1 %2604 }
 0x37d   : > { %v8286_v12 = vsel %vm2614_vm2, %v2605_v38, %v2413_v37  ;;  %v8290_v32 = vsel %vm2614_vm2, %v2541_v52, %v2605_v38 }
 0x37e   : > { %9455 = vst [vmem:[#allocation80_spill] sm:$0xff] %v8286_v12  ;;  %9456 = vst [vmem:[#allocation2_spill] sm:$0xff] %v8290_v32  ;;  %v8292_v58 = vpop.permute.xlu0 %2414 }
 0x37f   : > { %9457 = vst [vmem:[#allocation3_spill] sm:$0xff] %v8292_v58 }
 0x380   : > { %v2417_v47 = vpop.permute.xlu1 %2416 }
 0x382   : > { %v2543_v14 = vpop.permute.xlu0 %2542 }
 0x384   : > { %v2545_v4 = vpop.permute.xlu1 %2544 }
 0x386   : > { %v2479_v25 = vpop.permute.xlu0 %2478 }
 0x387   : > { %v8296_v20 = vsel %vm2614_vm2, %v2479_v25, %v2543_v14  ;;  %v8301_v15 = vsel %vm2614_vm2, %v8292_v58, %v2479_v25 }
 0x388   : > { %9458 = vst [vmem:[#allocation5_spill] sm:$0xff] %v8296_v20  ;;  %9459 = vst [vmem:[#allocation4_spill] sm:$0xff] %v8301_v15  ;;  %v2481_v37 = vpop.permute.xlu1 %2480 }
 0x389   : > { %v8305_v52 = vsel %vm2614_vm2, %v2481_v37, %v2545_v4  ;;  %v8309_v62 = vsel %vm2614_vm2, %v2417_v47, %v2481_v37  ;;  %v9466_v37 = vld [vmem:[#allocation6_spill] sm:$0xff] }
 0x38a   : > { %9460 = vst [vmem:[#allocation7_spill] sm:$0xff] %v8305_v52  ;;  %9461 = vst [vmem:[#allocation10_spill] sm:$0xff] %v8309_v62  ;;  %v8311_v38 = vpop.permute.xlu0 %2606  ;;  %v2711_v62 = vsel %vm2614_vm2, %v7650_v11, %v9466_v37 }
 0x38b   : > { %9462 = vst [vmem:[#allocation11_spill] sm:$0xff] %v8311_v38  ;;  %v8316_v20 = vsel %vm2614_vm2, %v2543_v14, %v8311_v38  ;;  %v2743_v14 = vsel %vm2354_vm3, 0.0, %v2711_v62 }
 0x38c   : > { %9463 = vst [vmem:[#allocation13_spill] sm:$0xff] %v8316_v20  ;;  %v2609_v32 = vpop.permute.xlu1 %2608 }
 0x38d   : > { %v8320_v25 = vsel %vm2614_vm2, %v2609_v32, %v2417_v47  ;;  %v8324_v15 = vsel %vm2614_vm2, %v2545_v4, %v2609_v32  ;;  %v9467_v47 = vld [vmem:[#allocation14_spill] sm:$0xff] }
 0x38e   : > { %9464 = vst [vmem:[#allocation81_spill] sm:$0xff] %v8320_v25  ;;  %9465 = vst [vmem:[#allocation82_spill] sm:$0xff] %v8324_v15  ;;  %v2679_v4 = vsel %vm2614_vm2, %v9466_v37, %v9467_v47  ;;  %v2712_v15 = vsel %vm2614_vm2, %v7648_v28, %v7664_v63  ;;  %v2680_v28 = vsel %vm2614_vm2, %v7664_v63, %v9469_v46 }
 0x38f   : > { %v2681_v63 = vsel %vm2614_vm2, %v7659_v0, %v7686_v24 }
 0x3aa   : > { %v3739_v52 = vpop.f32.mrb[64].mxu0 }
 0x3ab   : > { %v5155_v20 = vadd.f32 %v3739_v52, %v2743_v14  ;;  %v8333_v38 = vpop.f32.mrb[64].mxu1  ;;  %v3741_v32 = vpop.f32.mrb[65].mxu0  ;;  %v2747_v14 = vsel %vm2354_vm3, 0.0, %v2712_v15 }
 0x3ac   : > { %v5156_v25 = vadd.f32 %v3741_v32, %v2679_v4  ;;  %v8343_v58 = vpop.f32.mrb[65].mxu1  ;;  %v3743_v43 = vpop.f32.mrb[66].mxu0  ;;  %v2713_v4 = vsel %vm2614_vm2, %v7694_v5, %v7659_v0 }
 0x3ad   : > { %v8345_v62 = vpop.f32.mrb[66].mxu1  ;;  %v3745_v52 = vpop.f32.mrb[67].mxu0  ;;  %4477 = vxpose.xlu0.b32.start [1/16] %v5155_v20, 128  ;;  %v5157_v37 = vadd.f32 %v3743_v43, %v2747_v14  ;;  %v2751_v20 = vsel %vm2354_vm3, 0.0, %v2713_v4 }
 0x3ae   : > { %v8349_v12 = vpop.f32.mrb[67].mxu1  ;;  %4509 = vxpose.xlu1.b32.start [1/16] %v5156_v25, 128  ;;  %v5158_v32 = vadd.f32 %v3745_v52, %v2680_v28  ;;  %v2714_v28 = vsel %vm2614_vm2, %v7703_v6, %v7670_v33  ;;  %v2682_v6 = vsel %vm2614_vm2, %v7670_v33, %v7692_v42  ;;  %v2683_v33 = vsel %vm2614_vm2, %v7708_v54, %v7730_v7 }
 0x3af   : > { %9468 = vst [vmem:[#allocation6_spill] sm:$0xff] %v8349_v12 }
 0x3b1   : > { %4478 = vxpose.xlu0.b32.cont [2/16] %v5157_v37, 128 }
 0x3b2   : > { %v3749_v15 = vpop.f32.mrb[68].mxu0  ;;  %4510 = vxpose.xlu1.b32.cont [2/16] %v5158_v32, 128 }
 0x3b3   : > { %v5159_v12 = vadd.f32 %v3749_v15, %v2751_v20  ;;  %v8361_v25 = vpop.f32.mrb[68].mxu1  ;;  %v3751_v43 = vpop.f32.mrb[69].mxu0  ;;  %v2755_v20 = vsel %vm2354_vm3, 0.0, %v2714_v28 }
 0x3b4   : > { %v5160_v52 = vadd.f32 %v3751_v43, %v2681_v63  ;;  %v8371_v14 = vpop.f32.mrb[69].mxu1  ;;  %v3753_v37 = vpop.f32.mrb[70].mxu0  ;;  %v2715_v63 = vsel %vm2614_vm2, %v7738_v60, %v7708_v54  ;;  %v2717_v54 = vsel %vm2614_vm2, %v7782_v9, %v7749_v45 }
 0x3b5   : > { %v8373_v4 = vpop.f32.mrb[70].mxu1  ;;  %v3755_v32 = vpop.f32.mrb[71].mxu0  ;;  %4479 = vxpose.xlu0.b32.cont [3/16] %v5159_v12, 128  ;;  %v5161_v0 = vadd.f32 %v3753_v37, %v2755_v20  ;;  %v2759_v12 = vsel %vm2354_vm3, 0.0, %v2715_v63 }
 0x3b6   : > { %v8377_v15 = vpop.f32.mrb[71].mxu1  ;;  %4511 = vxpose.xlu1.b32.cont [3/16] %v5160_v52, 128  ;;  %v5162_v43 = vadd.f32 %v3755_v32, %v2682_v6  ;;  %v2716_v6 = vsel %vm2614_vm2, %v7747_v50, %v7714_v10 }
 0x3b7   : > { %9470 = vst [vmem:[#allocation14_spill] sm:$0xff] %v8377_v15 }
 0x3b9   : > { %4480 = vxpose.xlu0.b32.cont [4/16] %v5161_v0, 128 }
 0x3ba   : > { %v3759_v28 = vpop.f32.mrb[72].mxu0  ;;  %4512 = vxpose.xlu1.b32.cont [4/16] %v5162_v43, 128 }
 0x3bb   : > { %v5163_v15 = vadd.f32 %v3759_v28, %v2759_v12  ;;  %v8389_v52 = vpop.f32.mrb[72].mxu1  ;;  %v3761_v37 = vpop.f32.mrb[73].mxu0  ;;  %v2763_v12 = vsel %vm2354_vm3, 0.0, %v2716_v6  ;;  %v2767_v6 = vsel %vm2354_vm3, 0.0, %v2717_v54 }
 0x3bc   : > { %v5164_v32 = vadd.f32 %v3761_v37, %v2683_v33  ;;  %v8399_v20 = vpop.f32.mrb[73].mxu1  ;;  %v3763_v0 = vpop.f32.mrb[74].mxu0  ;;  %v2684_v33 = vsel %vm2614_vm2, %v7714_v10, %v7736_v55  ;;  %v2685_v10 = vsel %vm2614_vm2, %v7749_v45, %v7770_v3  ;;  %v2622_v45 = vsel %vm2614_vm2, %v7768_v41, %v7791_v27 }
 0x3bd   : > { %v8401_v63 = vpop.f32.mrb[74].mxu1  ;;  %v3765_v43 = vpop.f32.mrb[75].mxu0  ;;  %4481 = vxpose.xlu0.b32.cont [5/16] %v5163_v15, 128  ;;  %v5165_v50 = vadd.f32 %v3763_v0, %v2763_v12  ;;  %v2718_v15 = vsel %vm2614_vm2, %v7791_v27, %v7755_v2 }
 0x3be   : > { %9471 = vst [vmem:[#allocation12_spill] sm:$0xff] %v8401_v63  ;;  %v8405_v28 = vpop.f32.mrb[75].mxu1  ;;  %4513 = vxpose.xlu1.b32.cont [5/16] %v5164_v32, 128  ;;  %v5166_v37 = vadd.f32 %v3765_v43, %v2684_v33  ;;  %v2771_v54 = vsel %vm2354_vm3, 0.0, %v2718_v15 }
 0x3bf   : > { %9472 = vst [vmem:[#allocation83_spill] sm:$0xff] %v8405_v28 }
 0x3c1   : > { %4482 = vxpose.xlu0.b32.cont [6/16] %v5165_v50, 128  ;;  %v2621_v50 = vsel %vm2614_vm2, %v7759_v8, %v7782_v9  ;;  %v2686_v9 = vsel %vm2614_vm2, %v7755_v2, %v7778_v26  ;;  %v2779_v2 = vsel %vm2354_vm3, 0.0, %v7852_v34  ;;  %v2783_v34 = vsel %vm2354_vm3, 0.0, %v7901_v17 }
 0x3c2   : > { %v3769_v32 = vpop.f32.mrb[76].mxu0  ;;  %4514 = vxpose.xlu1.b32.cont [6/16] %v5166_v37, 128 }
 0x3c3   : > { %v5167_v28 = vadd.f32 %v3769_v32, %v2767_v6  ;;  %v8421_v63 = vpop.f32.mrb[76].mxu1  ;;  %v3771_v0 = vpop.f32.mrb[77].mxu0 }
 0x3c4   : > { %9473 = vst [vmem:[#allocation84_spill] sm:$0xff] %v8421_v63  ;;  %v5168_v43 = vadd.f32 %v3771_v0, %v2685_v10  ;;  %v4350_v12 = vpop.f32.mrb[77].mxu1  ;;  %v3773_v33 = vpop.f32.mrb[78].mxu0 }
 0x3c5   : > { %v8433_v37 = vadd.f32 %v4350_v12, %v2621_v50  ;;  %v5169_v6 = vadd.f32 %v3773_v33, %v2771_v54  ;;  %v8435_v32 = vpop.f32.mrb[78].mxu1  ;;  %v3775_v63 = vpop.f32.mrb[79].mxu0  ;;  %4483 = vxpose.xlu0.b32.cont [7/16] %v5167_v28, 128  ;;  %v2775_v28 = vsel %vm2354_vm3, 0.0, %v7839_v39 }
 0x3c6   : > { %9474 = vst [vmem:[#allocation85_spill] sm:$0xff] %v8435_v32  ;;  %v4354_v10 = vpop.f32.mrb[79].mxu1  ;;  %4515 = vxpose.xlu1.b32.cont [7/16] %v5168_v43, 128  ;;  %v5170_v0 = vadd.f32 %v3775_v63, %v2686_v9 }
 0x3c7   : > { %v8445_v15 = vadd.f32 %v4354_v10, %v2622_v45 }
 0x3c9   : > { %4484 = vxpose.xlu0.b32.cont [8/16] %v5169_v6, 128 }
 0x3ca   : > { %v3779_v50 = vpop.f32.mrb[80].mxu0  ;;  %4516 = vxpose.xlu1.b32.cont [8/16] %v5170_v0, 128 }
 0x3cb   : > { %v5171_v12 = vadd.f32 %v3779_v50, %v2775_v28  ;;  %v4358_v54 = vpop.f32.mrb[80].mxu1  ;;  %v3781_v27 = vpop.f32.mrb[81].mxu0 }
 0x3cc   : > { %v8451_v43 = vadd.f32 %v4358_v54, %v7818_v30  ;;  %v5172_v33 = vadd.f32 %v3781_v27, %v7822_v40  ;;  %v4360_v32 = vpop.f32.mrb[81].mxu1  ;;  %v3783_v63 = vpop.f32.mrb[82].mxu0 }
 0x3cd   : > { %v8458_v6 = vadd.f32 %v4360_v32, %v7848_v19  ;;  %v5173_v39 = vadd.f32 %v3783_v63, %v2779_v2  ;;  %v4362_v45 = vpop.f32.mrb[82].mxu1  ;;  %v3785_v10 = vpop.f32.mrb[83].mxu0  ;;  %4485 = vxpose.xlu0.b32.cont [9/16] %v5171_v12, 128 }
 0x3ce   : > { %v8461_v9 = vadd.f32 %v4362_v45, %v7829_v48  ;;  %v5174_v30 = vadd.f32 %v3785_v10, %v7833_v51  ;;  %v4364_v0 = vpop.f32.mrb[83].mxu1  ;;  %4517 = vxpose.xlu1.b32.cont [9/16] %v5172_v33, 128 }
 0x3cf   : > { %v8465_v40 = vadd.f32 %v4364_v0, %v7856_v56  ;;  %v2787_v56 = vsel %vm2354_vm3, 0.0, %v7914_v31 }
 0x3d1   : > { %4486 = vxpose.xlu0.b32.cont [10/16] %v5173_v39, 128 }
 0x3d2   : > { %v3789_v19 = vpop.f32.mrb[84].mxu0  ;;  %4518 = vxpose.xlu1.b32.cont [10/16] %v5174_v30, 128 }
 0x3d3   : > { %v5175_v32 = vadd.f32 %v3789_v19, %v2783_v34  ;;  %v4368_v28 = vpop.f32.mrb[84].mxu1  ;;  %v3791_v50 = vpop.f32.mrb[85].mxu0 }
 0x3d4   : > { %v8471_v48 = vadd.f32 %v4368_v28, %v7880_v49  ;;  %v5176_v51 = vadd.f32 %v3791_v50, %v7884_v1  ;;  %v4370_v12 = vpop.f32.mrb[85].mxu1  ;;  %v3793_v54 = vpop.f32.mrb[86].mxu0  ;;  %v2723_v1 = vsel %vm2614_vm2, %v7962_v53, %v7920_v18 }
 0x3d5   : > { %v8478_v27 = vadd.f32 %v4370_v12, %v7910_v16  ;;  %v5177_v17 = vadd.f32 %v3793_v54, %v2787_v56  ;;  %v4372_v33 = vpop.f32.mrb[86].mxu1  ;;  %v3795_v2 = vpop.f32.mrb[87].mxu0  ;;  %4487 = vxpose.xlu0.b32.cont [11/16] %v5175_v32, 128  ;;  %v2791_v16 = vsel %vm2354_vm3, 0.0, %v2723_v1  ;;  %v9478_v54 = vld [vmem:[#allocation30_spill] sm:$0xff] }
 0x3d6   : > { %v8481_v63 = vadd.f32 %v4372_v33, %v7891_v59  ;;  %v5178_v49 = vadd.f32 %v3795_v2, %v7895_v57  ;;  %v4374_v39 = vpop.f32.mrb[87].mxu1  ;;  %4519 = vxpose.xlu1.b32.cont [11/16] %v5176_v51, 128 }
 0x3d7   : > { %v8489_v31 = vadd.f32 %v4374_v39, %v7918_v61  ;;  %v2795_v61 = vsel %vm2354_vm3, 0.0, %v7978_v36  ;;  %v9476_v36 = vld [vmem:[#allocation23_spill] sm:$0xff] }
 0x3d8   : > { %v9480_v39 = vld [vmem:[#allocation27_spill] sm:$0xff] }
 0x3d9   : > { %4488 = vxpose.xlu0.b32.cont [12/16] %v5177_v17, 128 }
 0x3da   : > { %v3799_v45 = vpop.f32.mrb[88].mxu0  ;;  %4520 = vxpose.xlu1.b32.cont [12/16] %v5178_v49, 128  ;;  %v9479_v49 = vld [vmem:[#allocation24_spill] sm:$0xff] }
 0x3db   : > { %v5179_v59 = vadd.f32 %v3799_v45, %v2791_v16  ;;  %v4378_v10 = vpop.f32.mrb[88].mxu1  ;;  %v3801_v30 = vpop.f32.mrb[89].mxu0  ;;  %v2693_v16 = vsel %vm2614_vm2, %v7984_v29, %v9480_v39 }
 0x3dc   : > { %v8494_v57 = vadd.f32 %v4378_v10, %v7944_v44  ;;  %v5180_v0 = vadd.f32 %v3801_v30, %v7949_v13  ;;  %v4380_v34 = vpop.f32.mrb[89].mxu1  ;;  %v3803_v18 = vpop.f32.mrb[90].mxu0  ;;  %v9475_v44 = vld [vmem:[#allocation22_spill] sm:$0xff]  ;;  %v2725_v13 = vsel %vm2614_vm2, %v8019_v23, %v7984_v29  ;;  %v2661_v23 = vsel %vm2614_vm2, %v9480_v39, %v9479_v49  ;;  %v9486_v39 = vld [vmem:[#allocation36_spill] sm:$0xff] }
 0x3dd   : > { %v8501_v53 = vadd.f32 %v4380_v34, %v7974_v22  ;;  %v5181_v19 = vadd.f32 %v3803_v18, %v2795_v61  ;;  %v4382_v32 = vpop.f32.mrb[90].mxu1  ;;  %v3805_v28 = vpop.f32.mrb[91].mxu0  ;;  %4489 = vxpose.xlu0.b32.cont [13/16] %v5179_v59, 128  ;;  %v9477_v22 = vld [vmem:[#allocation25_spill] sm:$0xff] }
 0x3de   : > { %v8504_v50 = vadd.f32 %v4382_v32, %v7956_v21  ;;  %v5182_v51 = vadd.f32 %v3805_v28, %v9475_v44  ;;  %v4384_v12 = vpop.f32.mrb[91].mxu1  ;;  %4521 = vxpose.xlu1.b32.cont [13/16] %v5180_v0, 128  ;;  %v2726_v17 = vsel %vm2614_vm2, %v9478_v54, %v9477_v22  ;;  %v2799_v21 = vsel %vm2354_vm3, 0.0, %v2725_v13  ;;  %v9481_v61 = vld [vmem:[#allocation29_spill] sm:$0xff]  ;;  %v9482_v32 = vld [vmem:[#allocation26_spill] sm:$0xff]  ;;  %v9483_v28 = vld [vmem:[#allocation28_spill] sm:$0xff] }
 0x3df   : > { %v8512_v56 = vadd.f32 %v4384_v12, %v9476_v36  ;;  %v2803_v0 = vsel %vm2354_vm3, 0.0, %v2726_v17  ;;  %v2662_v44 = vsel %vm2614_vm2, %v9483_v28, %v9482_v32  ;;  %v2694_v29 = vsel %vm2614_vm2, %v9477_v22, %v9483_v28  ;;  %v9484_v17 = vld [vmem:[#allocation31_spill] sm:$0xff]  ;;  %v9489_v32 = vld [vmem:[#allocation38_spill] sm:$0xff] }
 0x3e0   : > { %v2807_v22 = vsel %vm2354_vm3, 0.0, %v9486_v39 }
 0x3e1   : > { %4490 = vxpose.xlu0.b32.cont [14/16] %v5181_v19, 128 }
 0x3e2   : > { %v3809_v33 = vpop.f32.mrb[92].mxu0  ;;  %4522 = vxpose.xlu1.b32.cont [14/16] %v5182_v51, 128 }
 0x3e3   : > { %v5183_v2 = vadd.f32 %v3809_v33, %v2799_v21  ;;  %v4388_v1 = vpop.f32.mrb[92].mxu1  ;;  %v3811_v45 = vpop.f32.mrb[93].mxu0  ;;  %v9485_v33 = vld [vmem:[#allocation8_spill] sm:$0xff] }
 0x3e4   : > { %v8528_v59 = vadd.f32 %v4388_v1, %v2661_v23  ;;  %v5184_v10 = vadd.f32 %v3811_v45, %v2693_v16  ;;  %v4390_v30 = vpop.f32.mrb[93].mxu1  ;;  %v3813_v34 = vpop.f32.mrb[94].mxu0  ;;  %v2647_v49 = vsel %vm2614_vm2, %v9467_v47, %v9485_v33  ;;  %v2615_v1 = vsel %vm2614_vm2, %v9485_v33, %v7650_v11  ;;  %v9487_v47 = vld [vmem:[#allocation32_spill] sm:$0xff]  ;;  %v9493_v33 = vld [vmem:[#allocation35_spill] sm:$0xff] }
 0x3e5   : > { %v8533_v18 = vadd.f32 %v4390_v30, %v9481_v61  ;;  %v5185_v19 = vadd.f32 %v3813_v34, %v2803_v0  ;;  %v4392_v51 = vpop.f32.mrb[94].mxu1  ;;  %v3815_v12 = vpop.f32.mrb[95].mxu0  ;;  %4491 = vxpose.xlu0.b32.cont [15/16] %v5183_v2, 128  ;;  %v5219_v2 = vadd.f32 %v8333_v38, %v2647_v49  ;;  %v5220_v30 = vadd.f32 %v8343_v58, %v2615_v1  ;;  %v9488_v34 = vld [vmem:[#allocation33_spill] sm:$0xff]  ;;  %v9495_v1 = vld [vmem:[#allocation39_spill] sm:$0xff] }
 0x3e6   : > { %v8543_v13 = vadd.f32 %v4392_v51, %v2662_v44  ;;  %v5186_v36 = vadd.f32 %v3815_v12, %v2694_v29  ;;  %v4394_v54 = vpop.f32.mrb[95].mxu1  ;;  %4523 = vxpose.xlu1.b32.cont [15/16] %v5184_v10, 128  ;;  %v2811_v38 = vsel %vm2354_vm3, 0.0, %v9489_v32  ;;  %v9490_v44 = vld [vmem:[#allocation37_spill] sm:$0xff] }
 0x3e7   : > { %v8546_v21 = vadd.f32 %v4394_v54, %v9484_v17  ;;  %v9491_v58 = vld [vmem:[#allocation9_spill] sm:$0xff]  ;;  %v9492_v54 = vld [vmem:[#allocation34_spill] sm:$0xff] }
 0x3e9   : > { %4492 = vxpose.xlu0.b32.end [16/16] %v5185_v19, 128 }
 0x3ea   : > { %v3819_v23 = vpop.f32.mrb[96].mxu0  ;;  %4524 = vxpose.xlu1.b32.end [16/16] %v5186_v36, 128  ;;  %v2648_v36 = vsel %vm2614_vm2, %v9469_v46, %v9491_v58 }
 0x3eb   : > { %v8560_v16 = vadd.f32 %v3819_v23, %v2807_v22  ;;  %v4398_v45 = vpop.f32.mrb[96].mxu1  ;;  %v3821_v10 = vpop.f32.mrb[97].mxu0  ;;  %v5221_v22 = vadd.f32 %v8345_v62, %v2648_v36  ;;  %v9494_v23 = vld [vmem:[#allocation15_spill] sm:$0xff]  ;;  %v9500_v36 = vld [vmem:[#allocation41_spill] sm:$0xff] }
 0x3ec   : > { %v8564_v0 = vadd.f32 %v4398_v45, %v9487_v47  ;;  %v8567_v61 = vadd.f32 %v3821_v10, %v9488_v34  ;;  %v4400_v19 = vpop.f32.mrb[97].mxu1  ;;  %v3823_v28 = vpop.f32.mrb[98].mxu0  ;;  %v9496_v10 = vld [vmem:[#allocation6_spill] sm:$0xff]  ;;  %v9497_v47 = vld [vmem:[#allocation17_spill] sm:$0xff] }
 0x3ed   : > { %v8573_v11 = vadd.f32 %v4400_v19, %v9490_v44  ;;  %v8575_v51 = vadd.f32 %v3823_v28, %v2811_v38  ;;  %v4402_v29 = vpop.f32.mrb[98].mxu1  ;;  %v3825_v12 = vpop.f32.mrb[99].mxu0  ;;  %4541 = vxpose.xlu0.b32.start [1/16] %v5219_v2, 128  ;;  %v2616_v2 = vsel %vm2614_vm2, %v9491_v58, %v9494_v23  ;;  %v2649_v34 = vsel %vm2614_vm2, %v7686_v24, %v9497_v47  ;;  %v9498_v19 = vld [vmem:[#allocation44_spill] sm:$0xff]  ;;  %v9502_v23 = vld [vmem:[#allocation45_spill] sm:$0xff] }
 0x3ee   : > { %v8582_v17 = vadd.f32 %v4402_v29, %v9492_v54  ;;  %v8585_v49 = vadd.f32 %v3825_v12, %v9493_v33  ;;  %v4404_v39 = vpop.f32.mrb[99].mxu1  ;;  %4573 = vxpose.xlu1.b32.start [1/16] %v5220_v30, 128  ;;  %v5222_v46 = vadd.f32 %v9496_v10, %v2616_v2  ;;  %v2815_v62 = vsel %vm2354_vm3, 0.0, %v9498_v19  ;;  %v9499_v24 = vld [vmem:[#allocation40_spill] sm:$0xff]  ;;  %v9505_v19 = vld [vmem:[#allocation43_spill] sm:$0xff] }
 0x3ef   : > { %v8593_v45 = vadd.f32 %v4404_v39, %v9495_v1  ;;  %v5223_v32 = vadd.f32 %v8361_v25, %v2649_v34  ;;  %v2617_v38 = vsel %vm2614_vm2, %v9497_v47, %v7694_v5  ;;  %v9501_v39 = vld [vmem:[#allocation46_spill] sm:$0xff] }
 0x3f0   : > { %v5224_v12 = vadd.f32 %v8371_v14, %v2617_v38  ;;  %v2819_v25 = vsel %vm2354_vm3, 0.0, %v9501_v39  ;;  %v9503_v14 = vld [vmem:[#allocation16_spill] sm:$0xff]  ;;  %v9504_v47 = vld [vmem:[#allocation42_spill] sm:$0xff] }
 0x3f1   : > { %4542 = vxpose.xlu0.b32.cont [2/16] %v5221_v22, 128 }
 0x3f2   : > { %v3829_v30 = vpop.f32.mrb[100].mxu0  ;;  %4574 = vxpose.xlu1.b32.cont [2/16] %v5222_v46, 128  ;;  %v2650_v46 = vsel %vm2614_vm2, %v7692_v42, %v9503_v14 }
 0x3f3   : > { %v8608_v28 = vadd.f32 %v3829_v30, %v2815_v62  ;;  %v4408_v44 = vpop.f32.mrb[100].mxu1  ;;  %v3831_v29 = vpop.f32.mrb[101].mxu0  ;;  %v5225_v38 = vadd.f32 %v8373_v4, %v2650_v46 }
 0x3f4   : > { %v8612_v58 = vadd.f32 %v4408_v44, %v9499_v24  ;;  %v8615_v54 = vadd.f32 %v3831_v29, %v9500_v36  ;;  %v4410_v33 = vpop.f32.mrb[101].mxu1  ;;  %v3833_v22 = vpop.f32.mrb[102].mxu0  ;;  %v9506_v44 = vld [vmem:[#allocation18_spill] sm:$0xff]  ;;  %v9507_v29 = vld [vmem:[#allocation47_spill] sm:$0xff] }
 0x3f5   : > { %v8621_v5 = vadd.f32 %v4410_v33, %v9502_v23  ;;  %v8623_v2 = vadd.f32 %v3833_v22, %v2819_v25  ;;  %v4412_v1 = vpop.f32.mrb[102].mxu1  ;;  %v3835_v10 = vpop.f32.mrb[103].mxu0  ;;  %4543 = vxpose.xlu0.b32.cont [3/16] %v5223_v32, 128  ;;  %v2618_v32 = vsel %vm2614_vm2, %v9503_v14, %v9506_v44  ;;  %v9509_v36 = vld [vmem:[#allocation14_spill] sm:$0xff]  ;;  %v9510_v33 = vld [vmem:[#allocation19_spill] sm:$0xff]  ;;  %v9511_v25 = vld [vmem:[#allocation52_spill] sm:$0xff] }
 0x3f6   : > { %v8630_v34 = vadd.f32 %v4412_v1, %v9504_v47  ;;  %v8633_v62 = vadd.f32 %v3835_v10, %v9505_v19  ;;  %v4414_v30 = vpop.f32.mrb[103].mxu1  ;;  %4575 = vxpose.xlu1.b32.cont [3/16] %v5224_v12, 128  ;;  %v5226_v42 = vadd.f32 %v9509_v36, %v2618_v32  ;;  %v2651_v39 = vsel %vm2614_vm2, %v7730_v7, %v9510_v33  ;;  %v9512_v7 = vld [vmem:[#allocation48_spill] sm:$0xff]  ;;  %v9514_v19 = vld [vmem:[#allocation49_spill] sm:$0xff]  ;;  %v9515_v44 = vld [vmem:[#allocation54_spill] sm:$0xff] }
 0x3f7   : > { %v8641_v24 = vadd.f32 %v4414_v30, %v9507_v29  ;;  %v2823_v4 = vsel %vm2354_vm3, 0.0, %v9511_v25  ;;  %v5227_v22 = vadd.f32 %v8389_v52, %v2651_v39  ;;  %v2619_v23 = vsel %vm2614_vm2, %v9510_v33, %v7738_v60  ;;  %v9516_v29 = vld [vmem:[#allocation53_spill] sm:$0xff]  ;;  %v9519_v25 = vld [vmem:[#allocation50_spill] sm:$0xff] }
 0x3f8   : > { %v5228_v46 = vadd.f32 %v8399_v20, %v2619_v23  ;;  %v2827_v52 = vsel %vm2354_vm3, 0.0, %v9515_v44  ;;  %v9518_v20 = vld [vmem:[#allocation21_spill] sm:$0xff] }
 0x3f9   : > { %9508 = vst [vmem:[#allocation22_spill] sm:$0xff] %v8641_v24  ;;  %4544 = vxpose.xlu0.b32.cont [4/16] %v5225_v38, 128  ;;  %v2652_v39 = vsel %vm2614_vm2, %v7736_v55, %v9518_v20 }
 0x3fa   : > { %v3839_v12 = vpop.f32.mrb[104].mxu0  ;;  %4576 = vxpose.xlu1.b32.cont [4/16] %v5226_v42, 128 }
 0x3fb   : > { %v8656_v1 = vadd.f32 %v3839_v12, %v2823_v4  ;;  %v4418_v10 = vpop.f32.mrb[104].mxu1  ;;  %v3841_v14 = vpop.f32.mrb[105].mxu0  ;;  %v9521_v12 = vld [vmem:[#allocation51_spill] sm:$0xff] }
 0x3fc   : > { %v8660_v47 = vadd.f32 %v4418_v10, %v9512_v7  ;;  %v8663_v30 = vadd.f32 %v3841_v14, %v9514_v19  ;;  %v4420_v38 = vpop.f32.mrb[105].mxu1  ;;  %v3843_v32 = vpop.f32.mrb[106].mxu0  ;;  %v9522_v14 = vld [vmem:[#allocation12_spill] sm:$0xff] }
 0x3fd   : > { %v8669_v60 = vadd.f32 %v4420_v38, %v9516_v29  ;;  %v8671_v36 = vadd.f32 %v3843_v32, %v2827_v52  ;;  %v4422_v42 = vpop.f32.mrb[106].mxu1  ;;  %v3845_v33 = vpop.f32.mrb[107].mxu0  ;;  %4545 = vxpose.xlu0.b32.cont [5/16] %v5227_v22, 128  ;;  %v5229_v7 = vadd.f32 %v9522_v14, %v2652_v39  ;;  %v9523_v19 = vld [vmem:[#allocation20_spill] sm:$0xff]  ;;  %v9524_v38 = vld [vmem:[#allocation55_spill] sm:$0xff]  ;;  %v9527_v29 = vld [vmem:[#allocation62_spill] sm:$0xff] }
 0x3fe   : > { %9513 = vst [vmem:[#allocation23_spill] sm:$0xff] %v8660_v47  ;;  %v8678_v4 = vadd.f32 %v4422_v42, %v9519_v25  ;;  %v8681_v23 = vadd.f32 %v3845_v33, %v9521_v12  ;;  %v4424_v10 = vpop.f32.mrb[107].mxu1  ;;  %4577 = vxpose.xlu1.b32.cont [5/16] %v5228_v46, 128  ;;  %v2620_v22 = vsel %vm2614_vm2, %v9518_v20, %v9523_v19  ;;  %v9526_v52 = vld [vmem:[#allocation83_spill] sm:$0xff]  ;;  %v8692_v32 = vpop.permute.xlu0 %2418  ;;  %v2831_v42 = vsel %vm2354_vm3, 0.0, %v9527_v29  ;;  %v9528_v20 = vld [vmem:[#allocation84_spill] sm:$0xff]  ;;  %v9529_v12 = vld [vmem:[#allocation58_spill] sm:$0xff] }
 0x3ff   : > { %9517 = vst [vmem:[#allocation25_spill] sm:$0xff] %v8669_v60  ;;  %v8689_v44 = vadd.f32 %v4424_v10, %v9524_v38  ;;  %v5230_v55 = vadd.f32 %v9526_v52, %v2620_v22  ;;  %v2653_v46 = vsel %vm2614_vm2, %v7770_v3, %v7759_v8  ;;  %v9530_v10 = vld [vmem:[#allocation60_spill] sm:$0xff]  ;;  %v9566_v60 = vld [vmem:[#allocation11_spill] sm:$0xff] }
 0x400   : > { %9520 = vst [vmem:[#allocation30_spill] sm:$0xff] %v8678_v4  ;;  %v5231_v39 = vadd.f32 %v9528_v20, %v2653_v46  ;;  %v2669_v14 = vsel %vm2614_vm2, %v9530_v10, %v9529_v12  ;;  %v9531_v19 = vld [vmem:[#allocation56_spill] sm:$0xff]  ;;  %v9536_v12 = vld [vmem:[#allocation59_spill] sm:$0xff] }
 0x401   : > { %9525 = vst [vmem:[#allocation24_spill] sm:$0xff] %v8689_v44  ;;  %4546 = vxpose.xlu0.b32.cont [6/16] %v5229_v7, 128  ;;  %v2701_v8 = vsel %vm2614_vm2, %v9531_v19, %v9530_v10  ;;  %v9537_v44 = vld [vmem:[#allocation61_spill] sm:$0xff] }
 0x402   : > { %v3849_v33 = vpop.f32.mrb[108].mxu0  ;;  %4578 = vxpose.xlu1.b32.cont [6/16] %v5230_v55, 128  ;;  %v9533_v55 = vld [vmem:[#allocation64_spill] sm:$0xff]  ;;  %v2670_v10 = vsel %vm2614_vm2, %v9537_v44, %v9536_v12  ;;  %v9541_v12 = vld [vmem:[#allocation65_spill] sm:$0xff] }
 0x403   : > { %v8702_v25 = vadd.f32 %v3849_v33, %v2831_v42  ;;  %v4428_v7 = vpop.f32.mrb[108].mxu1  ;;  %v3851_v3 = vpop.f32.mrb[109].mxu0  ;;  %v2835_v46 = vsel %vm2354_vm3, 0.0, %v9533_v55  ;;  %v9534_v42 = vld [vmem:[#allocation63_spill] sm:$0xff] }
 0x404   : > { %v8712_v22 = vadd.f32 %v4428_v7, %v2669_v14  ;;  %v8714_v38 = vadd.f32 %v3851_v3, %v2701_v8  ;;  %v4430_v52 = vpop.f32.mrb[109].mxu1  ;;  %v3853_v29 = vpop.f32.mrb[110].mxu0  ;;  %v9538_v7 = vld [vmem:[#allocation57_spill] sm:$0xff]  ;;  %v2654_v3 = vsel %vm2614_vm2, %v7778_v26, %v7768_v41 }
 0x405   : > { %v8720_v33 = vadd.f32 %v4430_v52, %v9534_v42  ;;  %v8722_v20 = vadd.f32 %v3853_v29, %v2835_v46  ;;  %v4432_v14 = vpop.f32.mrb[110].mxu1  ;;  %v2702_v19 = vsel %vm2614_vm2, %v9538_v7, %v9537_v44  ;;  %v3855_v8 = vpop.f32.mrb[111].mxu0  ;;  %4547 = vxpose.xlu0.b32.cont [7/16] %v5231_v39, 128  ;;  %v9540_v29 = vld [vmem:[#allocation85_spill] sm:$0xff]  ;;  %v9543_v7 = vld [vmem:[#allocation70_spill] sm:$0xff] }
 0x406   : > { %9532 = vst [vmem:[#allocation27_spill] sm:$0xff] %v8712_v22  ;;  %v8736_v52 = vadd.f32 %v4432_v14, %v2670_v10  ;;  %v8738_v55 = vadd.f32 %v3855_v8, %v2702_v19  ;;  %v4434_v46 = vpop.f32.mrb[111].mxu1  ;;  %4579 = vxpose.xlu1.b32.cont [7/16] %v8433_v37, 128  ;;  %v5233_v42 = vadd.f32 %v9540_v29, %v2654_v3  ;;  %v8745_v44 = vpop.permute.xlu1 %2420  ;;  %v2839_v41 = vsel %vm2354_vm3, 0.0, %v9543_v7  ;;  %v9544_v19 = vld [vmem:[#allocation66_spill] sm:$0xff]  ;;  %v9546_v3 = vld [vmem:[#allocation67_spill] sm:$0xff] }
 0x407   : > { %9535 = vst [vmem:[#allocation29_spill] sm:$0xff] %v8720_v33  ;;  %v8743_v33 = vadd.f32 %v4434_v46, %v9541_v12  ;;  %v8747_v39 = vpop.permute.xlu0 %2546  ;;  %v9548_v7 = vld [vmem:[#allocation71_spill] sm:$0xff] }
 0x408   : > { %9539 = vst [vmem:[#allocation26_spill] sm:$0xff] %v8736_v52 }
 0x409   : > { %9542 = vst [vmem:[#allocation28_spill] sm:$0xff] %v8743_v33  ;;  %4548 = vxpose.xlu0.b32.cont [8/16] %v5233_v42, 128  ;;  %v9547_v42 = vld [vmem:[#allocation72_spill] sm:$0xff] }
 0x40a   : > { %v3859_v26 = vpop.f32.mrb[112].mxu0  ;;  %4580 = vxpose.xlu1.b32.cont [8/16] %v8445_v15, 128  ;;  %v2843_v12 = vsel %vm2354_vm3, 0.0, %v9547_v42  ;;  %v9553_v42 = vld [vmem:[#allocation73_spill] sm:$0xff] }
 0x40b   : > { %v8753_v10 = vadd.f32 %v3859_v26, %v2839_v41  ;;  %v4438_v37 = vpop.f32.mrb[112].mxu1  ;;  %v3861_v14 = vpop.f32.mrb[113].mxu0 }
 0x40c   : > { %v8756_v8 = vadd.f32 %v4438_v37, %v9544_v19  ;;  %v8759_v46 = vadd.f32 %v3861_v14, %v9546_v3  ;;  %v4440_v29 = vpop.f32.mrb[113].mxu1  ;;  %v3863_v33 = vpop.f32.mrb[114].mxu0  ;;  %v9550_v37 = vld [vmem:[#allocation68_spill] sm:$0xff]  ;;  %v9552_v14 = vld [vmem:[#allocation69_spill] sm:$0xff] }
 0x40d   : > { %v8765_v52 = vadd.f32 %v4440_v29, %v9548_v7  ;;  %v8767_v15 = vadd.f32 %v3863_v33, %v2843_v12  ;;  %v4442_v41 = vpop.f32.mrb[114].mxu1  ;;  %v3865_v26 = vpop.f32.mrb[115].mxu0  ;;  %4549 = vxpose.xlu0.b32.cont [9/16] %v8451_v43, 128  ;;  %v9555_v12 = vld [vmem:[#allocation78_spill] sm:$0xff] }
 0x40e   : > { %9545 = vst [vmem:[#allocation31_spill] sm:$0xff] %v8756_v8  ;;  %v8771_v19 = vadd.f32 %v4442_v41, %v9550_v37  ;;  %v8774_v3 = vadd.f32 %v3865_v26, %v9552_v14  ;;  %v4444_v8 = vpop.f32.mrb[115].mxu1  ;;  %4581 = vxpose.xlu1.b32.cont [9/16] %v8458_v6, 128  ;;  %v8780_v29 = vpop.permute.xlu1 %2548  ;;  %v2847_v43 = vsel %vm2354_vm3, 0.0, %v9555_v12  ;;  %v9556_v6 = vld [vmem:[#allocation74_spill] sm:$0xff]  ;;  %v9560_v12 = vld [vmem:[#allocation79_spill] sm:$0xff] }
 0x40f   : > { %9549 = vst [vmem:[#allocation8_spill] sm:$0xff] %v8765_v52  ;;  %v8778_v22 = vadd.f32 %v4444_v8, %v9553_v42  ;;  %v2483_v33 = vpop.permute.xlu0 %2482  ;;  %v9558_v8 = vld [vmem:[#allocation75_spill] sm:$0xff] }
 0x410   : > { %9551 = vst [vmem:[#allocation36_spill] sm:$0xff] %v8771_v19 }
 0x411   : > { %9554 = vst [vmem:[#allocation32_spill] sm:$0xff] %v8778_v22  ;;  %4550 = vxpose.xlu0.b32.cont [10/16] %v8461_v9, 128  ;;  %v9559_v9 = vld [vmem:[#allocation80_spill] sm:$0xff] }
 0x412   : > { %v3869_v7 = vpop.f32.mrb[116].mxu0  ;;  %4582 = vxpose.xlu1.b32.cont [10/16] %v8465_v40, 128  ;;  %v2851_v19 = vsel %vm2354_vm3, 0.0, %v9559_v9  ;;  %v9565_v9 = vld [vmem:[#allocation3_spill] sm:$0xff] }
 0x413   : > { %v8787_v41 = vadd.f32 %v3869_v7, %v2847_v43  ;;  %v4448_v26 = vpop.f32.mrb[116].mxu1  ;;  %v3871_v37 = vpop.f32.mrb[117].mxu0 }
 0x414   : > { %v8790_v14 = vadd.f32 %v4448_v26, %v9556_v6  ;;  %v8793_v42 = vadd.f32 %v3871_v37, %v9558_v8  ;;  %v4450_v22 = vpop.f32.mrb[117].mxu1  ;;  %v3873_v52 = vpop.f32.mrb[118].mxu0  ;;  %v9562_v26 = vld [vmem:[#allocation76_spill] sm:$0xff]  ;;  %v9564_v37 = vld [vmem:[#allocation77_spill] sm:$0xff] }
 0x415   : > { %v8799_v4 = vadd.f32 %v4450_v22, %v9560_v12  ;;  %v8801_v40 = vadd.f32 %v3873_v52, %v2851_v19  ;;  %v4452_v43 = vpop.f32.mrb[118].mxu1  ;;  %v3875_v7 = vpop.f32.mrb[119].mxu0  ;;  %4551 = vxpose.xlu0.b32.cont [11/16] %v8471_v48, 128  ;;  %v2739_v22 = vsel %vm2614_vm2, %v9566_v60, %v9565_v9  ;;  %v9567_v52 = vld [vmem:[#allocation2_spill] sm:$0xff]  ;;  %v9571_v60 = vld [vmem:[#allocation4_spill] sm:$0xff] }
 0x416   : > { %9557 = vst [vmem:[#allocation33_spill] sm:$0xff] %v8790_v14  ;;  %v8805_v6 = vadd.f32 %v4452_v43, %v9562_v26  ;;  %v8808_v8 = vadd.f32 %v3875_v7, %v9564_v37  ;;  %v4454_v14 = vpop.f32.mrb[119].mxu1  ;;  %4583 = vxpose.xlu1.b32.cont [11/16] %v8478_v27, 128  ;;  %v2485_v12 = vpop.permute.xlu1 %2484  ;;  %v2855_v43 = vsel %vm2354_vm3, 0.0, %v2739_v22  ;;  %v9573_v22 = vld [vmem:[#allocation13_spill] sm:$0xff] }
 0x417   : > { %9561 = vst [vmem:[#allocation38_spill] sm:$0xff] %v8799_v4  ;;  %v8816_v19 = vadd.f32 %v4454_v14, %v9567_v52  ;;  %v2611_v48 = vpop.permute.xlu0 %2610  ;;  %v9572_v52 = vld [vmem:[#allocation81_spill] sm:$0xff] }
 0x418   : > { %9563 = vst [vmem:[#allocation37_spill] sm:$0xff] %v8805_v6  ;;  %v9569_v6 = vld [vmem:[#allocation5_spill] sm:$0xff] }
 0x419   : > { %9568 = vst [vmem:[#allocation9_spill] sm:$0xff] %v8816_v19  ;;  %4552 = vxpose.xlu0.b32.cont [12/16] %v8481_v63, 128  ;;  %v2859_v63 = vsel %vm2354_vm3, 0.0, %v9572_v52 }
 0x41a   : > { %v3879_v7 = vpop.f32.mrb[120].mxu0  ;;  %4584 = vxpose.xlu1.b32.cont [12/16] %v8489_v31, 128 }
 0x41b   : > { %v8822_v26 = vadd.f32 %v3879_v7, %v2855_v43  ;;  %v4458_v27 = vpop.f32.mrb[120].mxu1  ;;  %v3881_v37 = vpop.f32.mrb[121].mxu0 }
 0x41c   : > { %v8825_v4 = vadd.f32 %v4458_v27, %v9569_v6  ;;  %v8828_v14 = vadd.f32 %v3881_v37, %v9571_v60  ;;  %v4460_v9 = vpop.f32.mrb[121].mxu1  ;;  %v3883_v19 = vpop.f32.mrb[122].mxu0  ;;  %v9574_v27 = vld [vmem:[#allocation7_spill] sm:$0xff]  ;;  %v9575_v37 = vld [vmem:[#allocation10_spill] sm:$0xff] }
 0x41d   : > { %v8834_v47 = vadd.f32 %v4460_v9, %v9573_v22  ;;  %v8836_v31 = vadd.f32 %v3883_v19, %v2859_v63  ;;  %v4462_v43 = vpop.f32.mrb[122].mxu1  ;;  %v3885_v7 = vpop.f32.mrb[123].mxu0  ;;  %4553 = vxpose.xlu0.b32.cont [13/16] %v8494_v57, 128  ;;  %v2741_v9 = vsel %vm2614_vm2, %v2611_v48, %v8692_v32  ;;  %v9576_v19 = vld [vmem:[#allocation82_spill] sm:$0xff] }
 0x41e   : > { %9570 = vst [vmem:[#allocation34_spill] sm:$0xff] %v8825_v4  ;;  %v2613_v6 = vpop.permute.xlu1 %2612  ;;  %v8840_v4 = vadd.f32 %v4462_v43, %v9574_v27  ;;  %v8843_v60 = vadd.f32 %v3885_v7, %v9575_v37  ;;  %v4464_v24 = vpop.f32.mrb[123].mxu1  ;;  %4585 = vxpose.xlu1.b32.cont [13/16] %v8501_v53, 128  ;;  %v2863_v63 = vsel %vm2354_vm3, 0.0, %v2741_v9  ;;  %v2677_v43 = vsel %vm2614_vm2, %v2483_v33, %v8747_v39 }
 0x41f   : > { %v8850_v52 = vadd.f32 %v4464_v24, %v9576_v19  ;;  %v2742_v57 = vsel %vm2614_vm2, %v2613_v6, %v8745_v44  ;;  %v2709_v7 = vsel %vm2614_vm2, %v8692_v32, %v2483_v33  ;;  %v2678_v32 = vsel %vm2614_vm2, %v2485_v12, %v8780_v29 }
 0x420   : > { %v2867_v19 = vsel %vm2354_vm3, 0.0, %v2742_v57 }
 0x421   : > { %9577 = vst [vmem:[#allocation35_spill] sm:$0xff] %v8850_v52  ;;  %4554 = vxpose.xlu0.b32.cont [14/16] %v8504_v50, 128 }
 0x422   : > { %v3889_v22 = vpop.f32.mrb[124].mxu0  ;;  %4586 = vxpose.xlu1.b32.cont [14/16] %v8512_v56, 128  ;;  %v2645_v56 = vsel %vm2614_vm2, %v8747_v39, %v2611_v48 }
 0x423   : > { %v8859_v53 = vadd.f32 %v3889_v22, %v2863_v63  ;;  %v4468_v24 = vpop.f32.mrb[124].mxu1  ;;  %v3891_v27 = vpop.f32.mrb[125].mxu0 }
 0x424   : > { %v8867_v37 = vadd.f32 %v4468_v24, %v2677_v43  ;;  %v8869_v50 = vadd.f32 %v3891_v27, %v2709_v7  ;;  %v4470_v9 = vpop.f32.mrb[125].mxu1  ;;  %v3893_v63 = vpop.f32.mrb[126].mxu0  ;;  %v2710_v43 = vsel %vm2614_vm2, %v8745_v44, %v2485_v12  ;;  %v2646_v24 = vsel %vm2614_vm2, %v8780_v29, %v2613_v6 }
 0x425   : > { %v8876_v22 = vadd.f32 %v4470_v9, %v2645_v56  ;;  %v8878_v52 = vadd.f32 %v3893_v63, %v2867_v19  ;;  %v4472_v33 = vpop.f32.mrb[126].mxu1  ;;  %v3895_v39 = vpop.f32.mrb[127].mxu0  ;;  %4555 = vxpose.xlu0.b32.cont [15/16] %v8528_v59, 128  ;;  %v9582_v56 = vld [vmem:[#allocation24_spill] sm:$0xff]  ;;  %v9583_v19 = vld [vmem:[#allocation27_spill] sm:$0xff] }
 0x426   : > { %v8887_v48 = vadd.f32 %v4472_v33, %v2678_v32  ;;  %v8889_v57 = vadd.f32 %v3895_v39, %v2710_v43  ;;  %v4474_v7 = vpop.f32.mrb[127].mxu1  ;;  %4587 = vxpose.xlu1.b32.cont [15/16] %v8533_v18, 128  ;;  %v9584_v32 = vld [vmem:[#allocation29_spill] sm:$0xff]  ;;  %v9585_v43 = vld [vmem:[#allocation26_spill] sm:$0xff] }
 0x427   : > { %v8895_v27 = vadd.f32 %v4474_v7, %v2646_v24  ;;  %v9587_v7 = vld [vmem:[#allocation31_spill] sm:$0xff] }
 0x429   : > { %4556 = vxpose.xlu0.b32.end [16/16] %v8543_v13, 128 }
 0x42a   : > { %4588 = vxpose.xlu1.b32.end [16/16] %v8546_v21, 128 }
 0x42d   : > { %4605 = vxpose.xlu0.b32.start [1/16] %v8560_v16, 128  ;;  %v4493_v35 = vpop.trf.xlu0 }
 0x42e   : > { %4637 = vxpose.xlu1.b32.start [1/16] %v8567_v61, 128  ;;  %v4525_v59 = vpop.trf.xlu1  ;;  %4733 = vst [vmem:[%s8903_s4] sm:$0xff] %v4493_v35 }
 0x42f   : > { %4765 = vst [vmem:[%s8903_s4 + $0x100] sm:$0xff] %v4525_v59  ;;  %v9588_v59 = vld [vmem:[#allocation8_spill] sm:$0xff] }
 0x431   : > { %4606 = vxpose.xlu0.b32.cont [2/16] %v8575_v51, 128  ;;  %v4494_v18 = vpop.trf.xlu0 }
 0x432   : > { %4638 = vxpose.xlu1.b32.cont [2/16] %v8585_v49, 128  ;;  %v4526_v13 = vpop.trf.xlu1  ;;  %4735 = vst [vmem:[%s8903_s4 + $0x10] sm:$0xff] %v4494_v18 }
 0x433   : > { %4767 = vst [vmem:[%s8903_s4 + $0x110] sm:$0xff] %v4526_v13  ;;  %v9589_v13 = vld [vmem:[#allocation36_spill] sm:$0xff] }
 0x435   : > { %4607 = vxpose.xlu0.b32.cont [3/16] %v8608_v28, 128  ;;  %v4495_v21 = vpop.trf.xlu0 }
 0x436   : > { %4639 = vxpose.xlu1.b32.cont [3/16] %v8615_v54, 128  ;;  %v4527_v16 = vpop.trf.xlu1  ;;  %4737 = vst [vmem:[%s8903_s4 + $0x20] sm:$0xff] %v4495_v21 }
 0x437   : > { %4769 = vst [vmem:[%s8903_s4 + $0x120] sm:$0xff] %v4527_v16  ;;  %v9590_v16 = vld [vmem:[#allocation32_spill] sm:$0xff] }
 0x439   : > { %4608 = vxpose.xlu0.b32.cont [4/16] %v8623_v2, 128  ;;  %v4496_v61 = vpop.trf.xlu0 }
 0x43a   : > { %4640 = vxpose.xlu1.b32.cont [4/16] %v8633_v62, 128  ;;  %v4528_v51 = vpop.trf.xlu1  ;;  %4739 = vst [vmem:[%s8903_s4 + $0x30] sm:$0xff] %v4496_v61 }
 0x43b   : > { %4771 = vst [vmem:[%s8903_s4 + $0x130] sm:$0xff] %v4528_v51  ;;  %v9591_v51 = vld [vmem:[#allocation33_spill] sm:$0xff] }
 0x43d   : > { %4609 = vxpose.xlu0.b32.cont [5/16] %v8656_v1, 128  ;;  %v4497_v49 = vpop.trf.xlu0 }
 0x43e   : > { %4641 = vxpose.xlu1.b32.cont [5/16] %v8663_v30, 128  ;;  %v4529_v28 = vpop.trf.xlu1  ;;  %4741 = vst [vmem:[%s8903_s4 + $0x40] sm:$0xff] %v4497_v49 }
 0x43f   : > { %4773 = vst [vmem:[%s8903_s4 + $0x140] sm:$0xff] %v4529_v28  ;;  %v9592_v28 = vld [vmem:[#allocation38_spill] sm:$0xff] }
 0x441   : > { %4610 = vxpose.xlu0.b32.cont [6/16] %v8671_v36, 128  ;;  %v4498_v54 = vpop.trf.xlu0 }
 0x442   : > { %4642 = vxpose.xlu1.b32.cont [6/16] %v8681_v23, 128  ;;  %v4530_v2 = vpop.trf.xlu1  ;;  %4743 = vst [vmem:[%s8903_s4 + $0x50] sm:$0xff] %v4498_v54 }
 0x443   : > { %4775 = vst [vmem:[%s8903_s4 + $0x150] sm:$0xff] %v4530_v2  ;;  %v9593_v2 = vld [vmem:[#allocation37_spill] sm:$0xff] }
 0x445   : > { %4611 = vxpose.xlu0.b32.cont [7/16] %v8702_v25, 128  ;;  %v4499_v62 = vpop.trf.xlu0 }
 0x446   : > { %4643 = vxpose.xlu1.b32.cont [7/16] %v8714_v38, 128  ;;  %v4531_v1 = vpop.trf.xlu1  ;;  %4745 = vst [vmem:[%s8903_s4 + $0x60] sm:$0xff] %v4499_v62 }
 0x447   : > { %4777 = vst [vmem:[%s8903_s4 + $0x160] sm:$0xff] %v4531_v1  ;;  %v9594_v1 = vld [vmem:[#allocation9_spill] sm:$0xff] }
 0x449   : > { %4612 = vxpose.xlu0.b32.cont [8/16] %v8722_v20, 128  ;;  %v4500_v30 = vpop.trf.xlu0 }
 0x44a   : > { %4644 = vxpose.xlu1.b32.cont [8/16] %v8738_v55, 128  ;;  %v4532_v36 = vpop.trf.xlu1  ;;  %4747 = vst [vmem:[%s8903_s4 + $0x70] sm:$0xff] %v4500_v30 }
 0x44b   : > { %4779 = vst [vmem:[%s8903_s4 + $0x170] sm:$0xff] %v4532_v36  ;;  %v9595_v36 = vld [vmem:[#allocation34_spill] sm:$0xff] }
 0x44d   : > { %4613 = vxpose.xlu0.b32.cont [9/16] %v8753_v10, 128  ;;  %v4501_v23 = vpop.trf.xlu0 }
 0x44e   : > { %4645 = vxpose.xlu1.b32.cont [9/16] %v8759_v46, 128  ;;  %v4533_v25 = vpop.trf.xlu1  ;;  %4749 = vst [vmem:[%s8903_s4 + $0x80] sm:$0xff] %v4501_v23 }
 0x44f   : > { %4781 = vst [vmem:[%s8903_s4 + $0x180] sm:$0xff] %v4533_v25 }
 0x451   : > { %4614 = vxpose.xlu0.b32.cont [10/16] %v8767_v15, 128  ;;  %v4502_v38 = vpop.trf.xlu0 }
 0x452   : > { %4646 = vxpose.xlu1.b32.cont [10/16] %v8774_v3, 128  ;;  %v4534_v20 = vpop.trf.xlu1  ;;  %4751 = vst [vmem:[%s8903_s4 + $0x90] sm:$0xff] %v4502_v38 }
 0x453   : > { %4783 = vst [vmem:[%s8903_s4 + $0x190] sm:$0xff] %v4534_v20  ;;  %v9596_v20 = vld [vmem:[#allocation35_spill] sm:$0xff] }
 0x455   : > { %4615 = vxpose.xlu0.b32.cont [11/16] %v8787_v41, 128  ;;  %v4503_v55 = vpop.trf.xlu0 }
 0x456   : > { %4647 = vxpose.xlu1.b32.cont [11/16] %v8793_v42, 128  ;;  %v4535_v44 = vpop.trf.xlu1  ;;  %4753 = vst [vmem:[%s8903_s4 + $0xa0] sm:$0xff] %v4503_v55 }
 0x457   : > { %4785 = vst [vmem:[%s8903_s4 + $0x1a0] sm:$0xff] %v4535_v44 }
 0x459   : > { %4616 = vxpose.xlu0.b32.cont [12/16] %v8801_v40, 128  ;;  %v4504_v10 = vpop.trf.xlu0 }
 0x45a   : > { %4648 = vxpose.xlu1.b32.cont [12/16] %v8808_v8, 128  ;;  %v4536_v46 = vpop.trf.xlu1  ;;  %4755 = vst [vmem:[%s8903_s4 + $0xb0] sm:$0xff] %v4504_v10 }
 0x45b   : > { %4787 = vst [vmem:[%s8903_s4 + $0x1b0] sm:$0xff] %v4536_v46 }
 0x45d   : > { %4617 = vxpose.xlu0.b32.cont [13/16] %v8822_v26, 128  ;;  %v4505_v15 = vpop.trf.xlu0 }
 0x45e   : > { %4649 = vxpose.xlu1.b32.cont [13/16] %v8828_v14, 128  ;;  %v4537_v3 = vpop.trf.xlu1  ;;  %4757 = vst [vmem:[%s8903_s4 + $0xc0] sm:$0xff] %v4505_v15 }
 0x45f   : > { %4789 = vst [vmem:[%s8903_s4 + $0x1c0] sm:$0xff] %v4537_v3 }
 0x461   : > { %4618 = vxpose.xlu0.b32.cont [14/16] %v8836_v31, 128  ;;  %v4506_v29 = vpop.trf.xlu0 }
 0x462   : > { %4650 = vxpose.xlu1.b32.cont [14/16] %v8843_v60, 128  ;;  %v4538_v41 = vpop.trf.xlu1  ;;  %4759 = vst [vmem:[%s8903_s4 + $0xd0] sm:$0xff] %v4506_v29  ;;  %v9578_v60 = vld [vmem:[#allocation22_spill] sm:$0xff] }
 0x463   : > { %4791 = vst [vmem:[%s8903_s4 + $0x1d0] sm:$0xff] %v4538_v41 }
 0x465   : > { %4619 = vxpose.xlu0.b32.cont [15/16] %v8859_v53, 128  ;;  %v4507_v42 = vpop.trf.xlu0  ;;  %v9580_v53 = vld [vmem:[#allocation25_spill] sm:$0xff] }
 0x466   : > { %4651 = vxpose.xlu1.b32.cont [15/16] %v8869_v50, 128  ;;  %v4539_v40 = vpop.trf.xlu1  ;;  %4761 = vst [vmem:[%s8903_s4 + $0xe0] sm:$0xff] %v4507_v42  ;;  %v9581_v50 = vld [vmem:[#allocation30_spill] sm:$0xff] }
 0x467   : > { %4793 = vst [vmem:[%s8903_s4 + $0x1e0] sm:$0xff] %v4539_v40 }
 0x469   : > { %4620 = vxpose.xlu0.b32.end [16/16] %v8878_v52, 128  ;;  %v4508_v8 = vpop.trf.xlu0  ;;  %v9579_v52 = vld [vmem:[#allocation23_spill] sm:$0xff] }
 0x46a   : > { %4652 = vxpose.xlu1.b32.end [16/16] %v8889_v57, 128  ;;  %v4540_v12 = vpop.trf.xlu1  ;;  %4763 = vst [vmem:[%s8903_s4 + $0xf0] sm:$0xff] %v4508_v8  ;;  %v9586_v57 = vld [vmem:[#allocation28_spill] sm:$0xff] }
 0x46b   : > { %4795 = vst [vmem:[%s8903_s4 + $0x1f0] sm:$0xff] %v4540_v12 }
 0x46d   : > { %4669 = vxpose.xlu0.b32.start [1/16] %v8564_v0, 128  ;;  %v4557_v26 = vpop.trf.xlu0 }
 0x46e   : > { %4701 = vxpose.xlu1.b32.start [1/16] %v8573_v11, 128  ;;  %v4589_v14 = vpop.trf.xlu1  ;;  %4797 = vst [vmem:[%s8903_s4 + $0x200] sm:$0xff] %v4557_v26 }
 0x46f   : > { %4829 = vst [vmem:[%s8903_s4 + $0x300] sm:$0xff] %v4589_v14 }
 0x471   : > { %4670 = vxpose.xlu0.b32.cont [2/16] %v8582_v17, 128  ;;  %v4558_v31 = vpop.trf.xlu0 }
 0x472   : > { %4702 = vxpose.xlu1.b32.cont [2/16] %v8593_v45, 128  ;;  %v4590_v6 = vpop.trf.xlu1  ;;  %4799 = vst [vmem:[%s8903_s4 + $0x210] sm:$0xff] %v4558_v31 }
 0x473   : > { %4831 = vst [vmem:[%s8903_s4 + $0x310] sm:$0xff] %v4590_v6 }
 0x475   : > { %4671 = vxpose.xlu0.b32.cont [3/16] %v8612_v58, 128  ;;  %v4559_v0 = vpop.trf.xlu0 }
 0x476   : > { %4703 = vxpose.xlu1.b32.cont [3/16] %v8621_v5, 128  ;;  %v4591_v11 = vpop.trf.xlu1  ;;  %4801 = vst [vmem:[%s8903_s4 + $0x220] sm:$0xff] %v4559_v0 }
 0x477   : > { %4833 = vst [vmem:[%s8903_s4 + $0x320] sm:$0xff] %v4591_v11 }
 0x479   : > { %4672 = vxpose.xlu0.b32.cont [4/16] %v8630_v34, 128  ;;  %v4560_v17 = vpop.trf.xlu0 }
 0x47a   : > { %4704 = vxpose.xlu1.b32.cont [4/16] %v9578_v60, 128  ;;  %v4592_v45 = vpop.trf.xlu1  ;;  %4803 = vst [vmem:[%s8903_s4 + $0x230] sm:$0xff] %v4560_v17 }
 0x47b   : > { %4835 = vst [vmem:[%s8903_s4 + $0x330] sm:$0xff] %v4592_v45 }
 0x47d   : > { %4673 = vxpose.xlu0.b32.cont [5/16] %v9579_v52, 128  ;;  %v4561_v58 = vpop.trf.xlu0 }
 0x47e   : > { %4705 = vxpose.xlu1.b32.cont [5/16] %v9580_v53, 128  ;;  %v4593_v5 = vpop.trf.xlu1  ;;  %4805 = vst [vmem:[%s8903_s4 + $0x240] sm:$0xff] %v4561_v58 }
 0x47f   : > { %4837 = vst [vmem:[%s8903_s4 + $0x340] sm:$0xff] %v4593_v5 }
 0x481   : > { %4674 = vxpose.xlu0.b32.cont [6/16] %v9581_v50, 128  ;;  %v4562_v34 = vpop.trf.xlu0 }
 0x482   : > { %4706 = vxpose.xlu1.b32.cont [6/16] %v9582_v56, 128  ;;  %v4594_v9 = vpop.trf.xlu1  ;;  %4807 = vst [vmem:[%s8903_s4 + $0x250] sm:$0xff] %v4562_v34 }
 0x483   : > { %4839 = vst [vmem:[%s8903_s4 + $0x350] sm:$0xff] %v4594_v9 }
 0x485   : > { %4675 = vxpose.xlu0.b32.cont [7/16] %v9583_v19, 128  ;;  %v4563_v63 = vpop.trf.xlu0 }
 0x486   : > { %4707 = vxpose.xlu1.b32.cont [7/16] %v9584_v32, 128  ;;  %v4595_v33 = vpop.trf.xlu1  ;;  %4809 = vst [vmem:[%s8903_s4 + $0x260] sm:$0xff] %v4563_v63 }
 0x487   : > { %4841 = vst [vmem:[%s8903_s4 + $0x360] sm:$0xff] %v4595_v33 }
 0x489   : > { %4676 = vxpose.xlu0.b32.cont [8/16] %v9585_v43, 128  ;;  %v4564_v39 = vpop.trf.xlu0 }
 0x48a   : > { %4708 = vxpose.xlu1.b32.cont [8/16] %v9586_v57, 128  ;;  %v4596_v24 = vpop.trf.xlu1  ;;  %4811 = vst [vmem:[%s8903_s4 + $0x270] sm:$0xff] %v4564_v39 }
 0x48b   : > { %4843 = vst [vmem:[%s8903_s4 + $0x370] sm:$0xff] %v4596_v24 }
 0x48d   : > { %4677 = vxpose.xlu0.b32.cont [9/16] %v9587_v7, 128  ;;  %v4565_v35 = vpop.trf.xlu0 }
 0x48e   : > { %4709 = vxpose.xlu1.b32.cont [9/16] %v9588_v59, 128  ;;  %v4597_v18 = vpop.trf.xlu1  ;;  %4813 = vst [vmem:[%s8903_s4 + $0x280] sm:$0xff] %v4565_v35 }
 0x48f   : > { %4845 = vst [vmem:[%s8903_s4 + $0x380] sm:$0xff] %v4597_v18 }
 0x491   : > { %4678 = vxpose.xlu0.b32.cont [10/16] %v9589_v13, 128  ;;  %v4566_v21 = vpop.trf.xlu0 }
 0x492   : > { %4710 = vxpose.xlu1.b32.cont [10/16] %v9590_v16, 128  ;;  %v4598_v61 = vpop.trf.xlu1  ;;  %4815 = vst [vmem:[%s8903_s4 + $0x290] sm:$0xff] %v4566_v21 }
 0x493   : > { %4847 = vst [vmem:[%s8903_s4 + $0x390] sm:$0xff] %v4598_v61 }
 0x495   : > { %4679 = vxpose.xlu0.b32.cont [11/16] %v9591_v51, 128  ;;  %v4567_v49 = vpop.trf.xlu0 }
 0x496   : > { %4711 = vxpose.xlu1.b32.cont [11/16] %v9592_v28, 128  ;;  %v4599_v54 = vpop.trf.xlu1  ;;  %4817 = vst [vmem:[%s8903_s4 + $0x2a0] sm:$0xff] %v4567_v49 }
 0x497   : > { %4849 = vst [vmem:[%s8903_s4 + $0x3a0] sm:$0xff] %v4599_v54 }
 0x499   : > { %4680 = vxpose.xlu0.b32.cont [12/16] %v9593_v2, 128  ;;  %v4568_v62 = vpop.trf.xlu0 }
 0x49a   : > { %4712 = vxpose.xlu1.b32.cont [12/16] %v9594_v1, 128  ;;  %v4600_v30 = vpop.trf.xlu1  ;;  %4819 = vst [vmem:[%s8903_s4 + $0x2b0] sm:$0xff] %v4568_v62 }
 0x49b   : > { %4851 = vst [vmem:[%s8903_s4 + $0x3b0] sm:$0xff] %v4600_v30 }
 0x49d   : > { %4681 = vxpose.xlu0.b32.cont [13/16] %v9595_v36, 128  ;;  %v4569_v23 = vpop.trf.xlu0 }
 0x49e   : > { %4713 = vxpose.xlu1.b32.cont [13/16] %v8834_v47, 128  ;;  %v4601_v25 = vpop.trf.xlu1  ;;  %4821 = vst [vmem:[%s8903_s4 + $0x2c0] sm:$0xff] %v4569_v23 }
 0x49f   : > { %4853 = vst [vmem:[%s8903_s4 + $0x3c0] sm:$0xff] %v4601_v25 }
 0x4a1   : > { %4682 = vxpose.xlu0.b32.cont [14/16] %v8840_v4, 128  ;;  %v4570_v38 = vpop.trf.xlu0 }
 0x4a2   : > { %4714 = vxpose.xlu1.b32.cont [14/16] %v9596_v20, 128  ;;  %v4602_v55 = vpop.trf.xlu1  ;;  %4823 = vst [vmem:[%s8903_s4 + $0x2d0] sm:$0xff] %v4570_v38 }
 0x4a3   : > { %4855 = vst [vmem:[%s8903_s4 + $0x3d0] sm:$0xff] %v4602_v55 }
 0x4a5   : > { %4683 = vxpose.xlu0.b32.cont [15/16] %v8867_v37, 128  ;;  %v4571_v44 = vpop.trf.xlu0 }
 0x4a6   : > { %4715 = vxpose.xlu1.b32.cont [15/16] %v8876_v22, 128  ;;  %v4603_v47 = vpop.trf.xlu1  ;;  %4825 = vst [vmem:[%s8903_s4 + $0x2e0] sm:$0xff] %v4571_v44 }
 0x4a7   : > { %4857 = vst [vmem:[%s8903_s4 + $0x3e0] sm:$0xff] %v4603_v47 }
 0x4a9   : > { %4684 = vxpose.xlu0.b32.end [16/16] %v8887_v48, 128  ;;  %v4572_v4 = vpop.trf.xlu0 }
 0x4aa   : > { %4716 = vxpose.xlu1.b32.end [16/16] %v8895_v27, 128  ;;  %v4604_v10 = vpop.trf.xlu1  ;;  %4827 = vst [vmem:[%s8903_s4 + $0x2f0] sm:$0xff] %v4572_v4 }
 0x4ab   : > { %4859 = vst [vmem:[%s8903_s4 + $0x3f0] sm:$0xff] %v4604_v10 }
 0x4ad   : > { %v4621_v37 = vpop.trf.xlu0 }
 0x4ae   : > { %v4653_v46 = vpop.trf.xlu1  ;;  %4734 = vst [vmem:[%s8903_s4 + $0x8] sm:$0xff] %v4621_v37 }
 0x4af   : > { %4766 = vst [vmem:[%s8903_s4 + $0x108] sm:$0xff] %v4653_v46 }
 0x4b1   : > { %v4622_v22 = vpop.trf.xlu0 }
 0x4b2   : > { %v4654_v15 = vpop.trf.xlu1  ;;  %4736 = vst [vmem:[%s8903_s4 + $0x18] sm:$0xff] %v4622_v22 }
 0x4b3   : > { %4768 = vst [vmem:[%s8903_s4 + $0x118] sm:$0xff] %v4654_v15 }
 0x4b5   : > { %v4623_v48 = vpop.trf.xlu0 }
 0x4b6   : > { %v4655_v3 = vpop.trf.xlu1  ;;  %4738 = vst [vmem:[%s8903_s4 + $0x28] sm:$0xff] %v4623_v48 }
 0x4b7   : > { %4770 = vst [vmem:[%s8903_s4 + $0x128] sm:$0xff] %v4655_v3 }
 0x4b9   : > { %v4624_v27 = vpop.trf.xlu0 }
 0x4ba   : > { %v4656_v29 = vpop.trf.xlu1  ;;  %4740 = vst [vmem:[%s8903_s4 + $0x38] sm:$0xff] %v4624_v27 }
 0x4bb   : > { %4772 = vst [vmem:[%s8903_s4 + $0x138] sm:$0xff] %v4656_v29 }
 0x4bd   : > { %v4625_v41 = vpop.trf.xlu0 }
 0x4be   : > { %v4657_v42 = vpop.trf.xlu1  ;;  %4742 = vst [vmem:[%s8903_s4 + $0x48] sm:$0xff] %v4625_v41 }
 0x4bf   : > { %4774 = vst [vmem:[%s8903_s4 + $0x148] sm:$0xff] %v4657_v42 }
 0x4c1   : > { %v4626_v40 = vpop.trf.xlu0 }
 0x4c2   : > { %v4658_v8 = vpop.trf.xlu1  ;;  %4744 = vst [vmem:[%s8903_s4 + $0x58] sm:$0xff] %v4626_v40 }
 0x4c3   : > { %4776 = vst [vmem:[%s8903_s4 + $0x158] sm:$0xff] %v4658_v8 }
 0x4c5   : > { %v4627_v12 = vpop.trf.xlu0 }
 0x4c6   : > { %v4659_v26 = vpop.trf.xlu1  ;;  %4746 = vst [vmem:[%s8903_s4 + $0x68] sm:$0xff] %v4627_v12 }
 0x4c7   : > { %4778 = vst [vmem:[%s8903_s4 + $0x168] sm:$0xff] %v4659_v26 }
 0x4c9   : > { %v4628_v14 = vpop.trf.xlu0 }
 0x4ca   : > { %v4660_v31 = vpop.trf.xlu1  ;;  %4748 = vst [vmem:[%s8903_s4 + $0x78] sm:$0xff] %v4628_v14 }
 0x4cb   : > { %4780 = vst [vmem:[%s8903_s4 + $0x178] sm:$0xff] %v4660_v31 }
 0x4cd   : > { %v4629_v6 = vpop.trf.xlu0 }
 0x4ce   : > { %v4661_v0 = vpop.trf.xlu1  ;;  %4750 = vst [vmem:[%s8903_s4 + $0x88] sm:$0xff] %v4629_v6 }
 0x4cf   : > { %4782 = vst [vmem:[%s8903_s4 + $0x188] sm:$0xff] %v4661_v0 }
 0x4d1   : > { %v4630_v11 = vpop.trf.xlu0 }
 0x4d2   : > { %v4662_v17 = vpop.trf.xlu1  ;;  %4752 = vst [vmem:[%s8903_s4 + $0x98] sm:$0xff] %v4630_v11 }
 0x4d3   : > { %4784 = vst [vmem:[%s8903_s4 + $0x198] sm:$0xff] %v4662_v17 }
 0x4d5   : > { %v4631_v60 = vpop.trf.xlu0 }
 0x4d6   : > { %v4663_v45 = vpop.trf.xlu1  ;;  %4754 = vst [vmem:[%s8903_s4 + $0xa8] sm:$0xff] %v4631_v60 }
 0x4d7   : > { %4786 = vst [vmem:[%s8903_s4 + $0x1a8] sm:$0xff] %v4663_v45 }
 0x4d9   : > { %v4632_v52 = vpop.trf.xlu0 }
 0x4da   : > { %v4664_v58 = vpop.trf.xlu1  ;;  %4756 = vst [vmem:[%s8903_s4 + $0xb8] sm:$0xff] %v4632_v52 }
 0x4db   : > { %4788 = vst [vmem:[%s8903_s4 + $0x1b8] sm:$0xff] %v4664_v58 }
 0x4dd   : > { %v4633_v53 = vpop.trf.xlu0 }
 0x4de   : > { %v4665_v5 = vpop.trf.xlu1  ;;  %4758 = vst [vmem:[%s8903_s4 + $0xc8] sm:$0xff] %v4633_v53 }
 0x4df   : > { %4790 = vst [vmem:[%s8903_s4 + $0x1c8] sm:$0xff] %v4665_v5 }
 0x4e1   : > { %v4634_v50 = vpop.trf.xlu0 }
 0x4e2   : > { %v4666_v34 = vpop.trf.xlu1  ;;  %4760 = vst [vmem:[%s8903_s4 + $0xd8] sm:$0xff] %v4634_v50 }
 0x4e3   : > { %4792 = vst [vmem:[%s8903_s4 + $0x1d8] sm:$0xff] %v4666_v34 }
 0x4e5   : > { %v4635_v56 = vpop.trf.xlu0 }
 0x4e6   : > { %v4667_v9 = vpop.trf.xlu1  ;;  %4762 = vst [vmem:[%s8903_s4 + $0xe8] sm:$0xff] %v4635_v56 }
 0x4e7   : > { %4794 = vst [vmem:[%s8903_s4 + $0x1e8] sm:$0xff] %v4667_v9 }
 0x4e9   : > { %v4636_v19 = vpop.trf.xlu0 }
 0x4ea   : > { %v4668_v63 = vpop.trf.xlu1  ;;  %4764 = vst [vmem:[%s8903_s4 + $0xf8] sm:$0xff] %v4636_v19 }
 0x4eb   : > { %4796 = vst [vmem:[%s8903_s4 + $0x1f8] sm:$0xff] %v4668_v63 }
 0x4ed   : > { %v4685_v32 = vpop.trf.xlu0 }
 0x4ee   : > { %v4717_v33 = vpop.trf.xlu1  ;;  %4798 = vst [vmem:[%s8903_s4 + $0x208] sm:$0xff] %v4685_v32 }
 0x4ef   : > { %4830 = vst [vmem:[%s8903_s4 + $0x308] sm:$0xff] %v4717_v33 }
 0x4f1   : > { %v4686_v43 = vpop.trf.xlu0 }
 0x4f2   : > { %v4718_v39 = vpop.trf.xlu1  ;;  %4800 = vst [vmem:[%s8903_s4 + $0x218] sm:$0xff] %v4686_v43 }
 0x4f3   : > { %4832 = vst [vmem:[%s8903_s4 + $0x318] sm:$0xff] %v4718_v39 }
 0x4f5   : > { %v4687_v57 = vpop.trf.xlu0 }
 0x4f6   : > { %v4719_v24 = vpop.trf.xlu1  ;;  %4802 = vst [vmem:[%s8903_s4 + $0x228] sm:$0xff] %v4687_v57 }
 0x4f7   : > { %4834 = vst [vmem:[%s8903_s4 + $0x328] sm:$0xff] %v4719_v24 }
 0x4f9   : > { %v4688_v7 = vpop.trf.xlu0 }
 0x4fa   : > { %v4720_v35 = vpop.trf.xlu1  ;;  %4804 = vst [vmem:[%s8903_s4 + $0x238] sm:$0xff] %v4688_v7 }
 0x4fb   : > { %4836 = vst [vmem:[%s8903_s4 + $0x338] sm:$0xff] %v4720_v35 }
 0x4fd   : > { %v4689_v59 = vpop.trf.xlu0 }
 0x4fe   : > { %v4721_v18 = vpop.trf.xlu1  ;;  %4806 = vst [vmem:[%s8903_s4 + $0x248] sm:$0xff] %v4689_v59 }
 0x4ff   : > { %4838 = vst [vmem:[%s8903_s4 + $0x348] sm:$0xff] %v4721_v18 }
 0x501   : > { %v4690_v13 = vpop.trf.xlu0 }
 0x502   : > { %v4722_v21 = vpop.trf.xlu1  ;;  %4808 = vst [vmem:[%s8903_s4 + $0x258] sm:$0xff] %v4690_v13 }
 0x503   : > { %4840 = vst [vmem:[%s8903_s4 + $0x358] sm:$0xff] %v4722_v21 }
 0x505   : > { %v4691_v16 = vpop.trf.xlu0 }
 0x506   : > { %v4723_v61 = vpop.trf.xlu1  ;;  %4810 = vst [vmem:[%s8903_s4 + $0x268] sm:$0xff] %v4691_v16 }
 0x507   : > { %4842 = vst [vmem:[%s8903_s4 + $0x368] sm:$0xff] %v4723_v61 }
 0x509   : > { %v4692_v51 = vpop.trf.xlu0 }
 0x50a   : > { %v4724_v49 = vpop.trf.xlu1  ;;  %4812 = vst [vmem:[%s8903_s4 + $0x278] sm:$0xff] %v4692_v51 }
 0x50b   : > { %4844 = vst [vmem:[%s8903_s4 + $0x378] sm:$0xff] %v4724_v49 }
 0x50d   : > { %v4693_v28 = vpop.trf.xlu0 }
 0x50e   : > { %v4725_v54 = vpop.trf.xlu1  ;;  %4814 = vst [vmem:[%s8903_s4 + $0x288] sm:$0xff] %v4693_v28 }
 0x50f   : > { %4846 = vst [vmem:[%s8903_s4 + $0x388] sm:$0xff] %v4725_v54 }
 0x511   : > { %v4694_v2 = vpop.trf.xlu0 }
 0x512   : > { %v4726_v62 = vpop.trf.xlu1  ;;  %4816 = vst [vmem:[%s8903_s4 + $0x298] sm:$0xff] %v4694_v2 }
 0x513   : > { %4848 = vst [vmem:[%s8903_s4 + $0x398] sm:$0xff] %v4726_v62 }
 0x515   : > { %v4695_v1 = vpop.trf.xlu0 }
 0x516   : > { %v4727_v30 = vpop.trf.xlu1  ;;  %4818 = vst [vmem:[%s8903_s4 + $0x2a8] sm:$0xff] %v4695_v1 }
 0x517   : > { %4850 = vst [vmem:[%s8903_s4 + $0x3a8] sm:$0xff] %v4727_v30 }
 0x519   : > { %v4696_v36 = vpop.trf.xlu0 }
 0x51a   : > { %v4728_v23 = vpop.trf.xlu1  ;;  %4820 = vst [vmem:[%s8903_s4 + $0x2b8] sm:$0xff] %v4696_v36 }
 0x51b   : > { %4852 = vst [vmem:[%s8903_s4 + $0x3b8] sm:$0xff] %v4728_v23 }
 0x51d   : > { %v4697_v25 = vpop.trf.xlu0 }
 0x51e   : > { %v4729_v38 = vpop.trf.xlu1  ;;  %4822 = vst [vmem:[%s8903_s4 + $0x2c8] sm:$0xff] %v4697_v25 }
 0x51f   : > { %4854 = vst [vmem:[%s8903_s4 + $0x3c8] sm:$0xff] %v4729_v38 }
 0x521   : > { %v4698_v20 = vpop.trf.xlu0 }
 0x522   : > { %v4730_v55 = vpop.trf.xlu1  ;;  %4824 = vst [vmem:[%s8903_s4 + $0x2d8] sm:$0xff] %v4698_v20 }
 0x523   : > { %4856 = vst [vmem:[%s8903_s4 + $0x3d8] sm:$0xff] %v4730_v55 }
 0x525   : > { %v4699_v44 = vpop.trf.xlu0 }
 0x526   : > { %v4731_v47 = vpop.trf.xlu1  ;;  %4826 = vst [vmem:[%s8903_s4 + $0x2e8] sm:$0xff] %v4699_v44 }
 0x527   : > { %4858 = vst [vmem:[%s8903_s4 + $0x3e8] sm:$0xff] %v4731_v47 }
 0x529   : > { %v4700_v4 = vpop.trf.xlu0 }
 0x52a   : > { %v4732_v10 = vpop.trf.xlu1  ;;  %4828 = vst [vmem:[%s8903_s4 + $0x2f8] sm:$0xff] %v4700_v4 }
 0x52b   : > { %4860 = vst [vmem:[%s8903_s4 + $0x3f8] sm:$0xff] %v4732_v10 }
 0x52c PF: > { %s12_s9 = sadd.s32 1, %s6036_s9  }
 0x52d   : > { %p9_p4 = scmp.ge.s32.totalorder %s12_s9, 4  }
 0x52f   :  { %11 = sbr.rel (!%p9_p4) target bundleno = 1 (0x1), region = 58 }

</bundles_post_ra>
